<compile_context>
chip_gen: v7x
topology: tpu7x:2x2x1
jax: 0.10.0
libtpu: 0.0.40
codegen_flags: <defaults>
</compile_context>

<pallas_src>
import numpy as np
import jax
import jax.numpy as jnp
from jax.experimental import pallas as pl
from jax.experimental.pallas import tpu as pltpu

_LANE = 128      # lane padding (nx, nu, nw, ny all <= 128 at these sizes)
_SUBLANE = 8     # f32 sublane tile


# ---------------------------------------------------------------------------
# Kernel: one grid step processes a chunk of TC time steps.
#   u_ref     : (TC*BP, P)   lane-padded inputs for this chunk (streamed)
#   p0_ref    : (BP, 3P)     p_0 = x_0 @ Wx (used only at program_id==0)
#   wu_ref    : (P, 3P)      [D21~^T T^-1 | D11^T | B1~^T Y^-1]
#   wx_ref    : (P, 3P)      [C2~^T  T^-1 | C1^T  | A~^T  Y^-1]
#   wwy_ref   : (P, 4P)      [(B2~^T Y^-1) @ Wx | D12^T]
#   y_ref     : (TC*BP, P)   output chunk (streamed)
#   p_scr     : (BP, 3P)     carried projected state  p_k = x_k @ Wx
#   uproj_scr : (TC*BP, 3P)  per-chunk u projection
# ---------------------------------------------------------------------------
def _ltirnn_kernel(u_ref, p0_ref, wu_ref, wx_ref, wwy_ref, y_ref,
                   p_scr, uproj_scr):
    P = _LANE
    BP = p0_ref.shape[0]
    TC = y_ref.shape[0] // BP

    @pl.when(pl.program_id(0) == 0)
    def _():
        p_scr[...] = p0_ref[...]

    # Chunk-level input projection: one MXU GEMM, off the recurrence chain.
    uproj_scr[...] = jnp.dot(u_ref[...], wu_ref[...],
                             preferred_element_type=jnp.float32)

    wx = wx_ref[...]      # (P, 3P)
    wwy = wwy_ref[...]    # (P, 4P)

    def step(t, p):
        r0 = pl.multiple_of(t * BP, BP)
        s = p + uproj_scr[pl.ds(r0, BP), :]                        # (BP, 3P)
        # x-path matmul: independent of tanh -> overlaps with the EUP op.
        rx = jnp.dot(s[:, 2 * P:3 * P], wx,
                     preferred_element_type=jnp.float32)           # (BP, 3P)
        w = jnp.tanh(s[:, 0:P])                                    # EUP
        # One K=128 matmul on the critical path produces both the next
        # projected state contribution and the D12 w term for y.
        rw = jnp.dot(w, wwy, preferred_element_type=jnp.float32)   # (BP, 4P)
        # y_k = C1 x + D11 u + D12 w   (lane-dense 128-wide store)
        y_ref[pl.ds(r0, BP), :] = s[:, P:2 * P] + rw[:, 3 * P:4 * P]
        # p_{k+1} = x_{k+1} @ Wx = (s_x + w B2~^T) Y^-1 @ Wx
        return rx + rw[:, 0:3 * P]

    p_scr[...] = jax.lax.fori_loop(0, TC, step, p_scr[...], unroll=8)


# ---------------------------------------------------------------------------
# Forward pass, matching LTIRnn.forward semantics (returns y only).
# ---------------------------------------------------------------------------
@jax.jit
def ltirnn_forward(params, u_tilde, hx):
    A_t = params["A_tilde"]; B1_t = params["B1_tilde"]; B2_t = params["B2_tilde"]
    C1 = params["C1"]; D11 = params["D11"]; D12 = params["D12"]
    C2_t = params["C2_tilde"]; D21_t = params["D21_tilde"]
    Y = params["Y"]; lambdas = params["lambdas"]

    nx = Y.shape[0]
    nu = D11.shape[1]
    ny = C1.shape[0]
    nw = C2_t.shape[0]
    B, T, _ = u_tilde.shape
    P = _LANE
    BP = max(_SUBLANE, -(-B // _SUBLANE) * _SUBLANE)
    assert max(nx, nu, ny, nw) <= P  # TODO(synk): tile feature dims > 128

    f32 = jnp.float32
    hi = jax.lax.Precision.HIGHEST

    # TODO(synk): matrix inverse has no Pallas equivalent; stays in XLA.
    Y_inv = jnp.linalg.inv(Y.astype(f32))
    t_inv = (1.0 / lambdas.reshape(-1)).astype(f32)          # diag of T^-1

    # ---- fold T^-1 (diag -> column scale) and Y^-1 into the stacked weights
    Cz = C2_t.T.astype(f32) * t_inv[None, :]                          # (nx,nw)
    Dz = D21_t.T.astype(f32) * t_inv[None, :]                         # (nu,nw)
    Ax = jnp.matmul(A_t.T.astype(f32), Y_inv, precision=hi)           # (nx,nx)
    Bu = jnp.matmul(B1_t.T.astype(f32), Y_inv, precision=hi)          # (nu,nx)
    Bw = jnp.matmul(B2_t.T.astype(f32), Y_inv, precision=hi)          # (nw,nx)

    Wx = jnp.zeros((P, 3 * P), f32)
    Wx = Wx.at[:nx, 0:nw].set(Cz)
    Wx = Wx.at[:nx, P:P + ny].set(C1.T.astype(f32))
    Wx = Wx.at[:nx, 2 * P:2 * P + nx].set(Ax)

    Wu = jnp.zeros((P, 3 * P), f32)
    Wu = Wu.at[:nu, 0:nw].set(Dz)
    Wu = Wu.at[:nu, P:P + ny].set(D11.T.astype(f32))
    Wu = Wu.at[:nu, 2 * P:2 * P + nx].set(Bu)

    Bw_p = jnp.zeros((P, P), f32).at[:nw, :nx].set(Bw)
    Wwy = jnp.zeros((P, 4 * P), f32)
    Wwy = Wwy.at[:, 0:3 * P].set(jnp.matmul(Bw_p, Wx, precision=hi))
    Wwy = Wwy.at[:nw, 3 * P:3 * P + ny].set(D12.T.astype(f32))

    # ---- initial projected state p_0 = x_0 @ Wx (tiny, once per call in XLA)
    x0 = hx[0][1].astype(f32)                                        # (B, nx)
    x0_p = jnp.zeros((BP, P), f32).at[:B, :nx].set(x0)
    p0 = jnp.matmul(x0_p, Wx, precision=hi)                          # (BP, 3P)

    # ---- time chunking: stream u / y through a 1-D grid ---------------------
    TC = min(128, -(-T // _SUBLANE) * _SUBLANE)   # chunk length, multiple of 8
    Tp = -(-T // TC) * TC
    n_chunks = Tp // TC

    # u -> (Tp, BP, P) zero-padded, flattened to (Tp*BP, P): every streamed
    # block is a 2-D, lane-dense, (8,128)-aligned slab (no in-kernel reshapes).
    u_t = jnp.transpose(u_tilde.astype(f32), (1, 0, 2))              # (T,B,nu)
    u_p = jnp.pad(u_t, ((0, Tp - T), (0, BP - B), (0, P - nu)))
    u_flat = u_p.reshape(Tp * BP, P)

    # VMEM budget sized to the actual buffers (+ margin).
    blk = TC * BP * P * 4
    vmem_bytes = int(
        2 * blk + 2 * blk                                  # u / y double buffers
        + TC * BP * 3 * P * 4                              # uproj scratch
        + BP * 3 * P * 4                                   # state scratch
        + 2 * (BP * 3 * P + 2 * P * 3 * P + P * 4 * P) * 4  # resident weights/p0
        + (4 << 20))                                       # margin

    y_flat = pl.pallas_call(
        _ltirnn_kernel,
        out_shape=jax.ShapeDtypeStruct((Tp * BP, P), f32),
        grid=(n_chunks,),
        in_specs=[
            pl.BlockSpec((TC * BP, P), lambda c: (c, 0)),   # u chunk (streamed)
            pl.BlockSpec((BP, 3 * P), lambda c: (0, 0)),    # p0 (constant)
            pl.BlockSpec((P, 3 * P), lambda c: (0, 0)),     # Wu
            pl.BlockSpec((P, 3 * P), lambda c: (0, 0)),     # Wx
            pl.BlockSpec((P, 4 * P), lambda c: (0, 0)),     # Wwy
        ],
        out_specs=pl.BlockSpec((TC * BP, P), lambda c: (c, 0)),
        scratch_shapes=[
            pltpu.VMEM((BP, 3 * P), f32),        # carried projected state
            pltpu.VMEM((TC * BP, 3 * P), f32),   # per-chunk u projection
        ],
        compiler_params=pltpu.CompilerParams(
            dimension_semantics=("arbitrary",),  # time is sequential
            vmem_limit_bytes=vmem_bytes,
        ),
    )(u_flat, p0, Wu, Wx, Wwy)

    y = y_flat.reshape(Tp, BP, P)[:T, :B, :ny]
    return jnp.transpose(y, (1, 0, 2))                               # (B,T,ny)


# ---------------------------------------------------------------------------
# Pure-JAX reference (direct transcription of LTIRnn.forward), for checking.
# ---------------------------------------------------------------------------
def ltirnn_reference(params, u_tilde, hx):
    B, T, _ = u_tilde.shape
    Y_inv = jnp.linalg.inv(params["Y"])
    t_inv = 1.0 / params["lambdas"].reshape(-1)
    x = hx[0][1]
    ys = []
    for k in range(T):
        u_k = u_tilde[:, k, :]
        z = (x @ params["C2_tilde"].T + u_k @ params["D21_tilde"].T) * t_inv[None, :]
        w = jnp.tanh(z)
        ys.append(x @ params["C1"].T + u_k @ params["D11"].T + w @ params["D12"].T)
        x = (x @ params["A_tilde"].T + u_k @ params["B1_tilde"].T
             + w @ params["B2_tilde"].T) @ Y_inv
    return jnp.stack(ys, axis=1)


# ---------------------------------------------------------------------------
# Deterministic parameter construction.
# Linear layers: PyTorch default uniform(-1/sqrt(fan_in), 1/sqrt(fan_in)).
# Y / lambdas are zeros in the torch ctor (set by initialize_lmi, a cvxpy SDP)
# -> use a well-conditioned invertible Y and positive lambdas here.
# ---------------------------------------------------------------------------
def init_params(key, nx, nu, ny, nw):
    def uni(k, shape, fan_in):
        b = 1.0 / float(np.sqrt(fan_in))
        return jax.random.uniform(k, shape, jnp.float32, -b, b)

    ks = [jax.random.fold_in(key, i) for i in range(10)]
    return {
        "A_tilde":   uni(ks[0], (nx, nx), nx),
        "B1_tilde":  uni(ks[1], (nx, nu), nu),
        "B2_tilde":  uni(ks[2], (nx, nw), nw),
        "C1":        uni(ks[3], (ny, nx), nx),
        "D11":       uni(ks[4], (ny, nu), nu),
        "D12":       uni(ks[5], (ny, nw), nw),
        "C2_tilde":  uni(ks[6], (nw, nx), nx),
        "D21_tilde": uni(ks[7], (nw, nu), nu),
        "Y": jnp.eye(nx, dtype=jnp.float32)
             + 0.05 * jax.random.normal(ks[8], (nx, nx), jnp.float32),
        "lambdas": jax.random.uniform(ks[9], (nw, 1), jnp.float32, 0.5, 1.5),
    }


if __name__ == "__main__":
    key = jax.random.PRNGKey(0)
    nx, nu, ny, nw = 32, 4, 3, 16
    B, T = 2, 8

    params = init_params(key, nx, nu, ny, nw)
    u = jax.random.normal(jax.random.fold_in(key, 100), (B, T, nu), jnp.float32)
    h0 = 0.5 * jax.random.normal(jax.random.fold_in(key, 101), (2, B, nx),
                                 jnp.float32)
    c0 = jnp.zeros((2, B, nx), jnp.float32)
    hx = (h0, c0)

    y = ltirnn_forward(params, u, hx)
    y_ref = ltirnn_reference(params, u, hx)
    jax.block_until_ready((y, y_ref))

    assert y.shape == (B, T, ny)
    np.testing.assert_allclose(np.asarray(y), np.asarray(y_ref),
                               rtol=2e-2, atol=2e-2)
    print("KERNEL_OK")
</pallas_src>

<mosaic_0001>
module attributes {stable_mosaic.version = 11 : i64} {
  func.func @_ltirnn_kernel(%arg0: i32, %arg1: memref<64x128xf32, #tpu.memory_space<vmem>>, %arg2: memref<8x384xf32, #tpu.memory_space<vmem>>, %arg3: memref<128x384xf32, #tpu.memory_space<vmem>>, %arg4: memref<128x384xf32, #tpu.memory_space<vmem>>, %arg5: memref<128x512xf32, #tpu.memory_space<vmem>>, %arg6: memref<64x128xf32, #tpu.memory_space<vmem>>, %arg7: memref<8x384xf32, #tpu.memory_space<vmem>>, %arg8: memref<64x384xf32, #tpu.memory_space<vmem>>) attributes {dimension_semantics = [#tpu.dimension_semantics<arbitrary>], iteration_bounds = array<i64: 1>, scalar_prefetch = 0 : i64, scratch_operands = 2 : i64, tpu.core_type = #tpu.core_type<tc>, window_params = [{transform_indices = @transform_0, window_bounds = array<i64: 64, 128>}, {pipeline_mode = #tpu.pipeline_mode<synchronous>, transform_indices = @transform_1, window_bounds = array<i64: 8, 384>}, {pipeline_mode = #tpu.pipeline_mode<synchronous>, transform_indices = @transform_2, window_bounds = array<i64: 128, 384>}, {pipeline_mode = #tpu.pipeline_mode<synchronous>, transform_indices = @transform_3, window_bounds = array<i64: 128, 384>}, {pipeline_mode = #tpu.pipeline_mode<synchronous>, transform_indices = @transform_4, window_bounds = array<i64: 128, 512>}, {transform_indices = @transform_5, window_bounds = array<i64: 64, 128>}]} {
    %c0_i32 = arith.constant 0 : i32
    %0 = arith.cmpi eq, %arg0, %c0_i32 : i32
    %1 = arith.extui %0 : i1 to i32
    %c0_i32_0 = arith.constant 0 : i32
    %2 = arith.cmpi ne, %1, %c0_i32_0 : i32
    scf.if %2 {
      %c0_55 = arith.constant 0 : index
      %c0_56 = arith.constant 0 : index
      %147 = vector.load %arg2[%c0_55, %c0_56] : memref<8x384xf32, #tpu.memory_space<vmem>>, vector<8x384xf32>
      %c0_57 = arith.constant 0 : index
      %c0_58 = arith.constant 0 : index
      %148 = vector.load %arg7[%c0_57, %c0_58] : memref<8x384xf32, #tpu.memory_space<vmem>>, vector<8x384xf32>
      tpu.vector_store %arg7[%c0_57, %c0_58], %147 {strides = array<i32>} : memref<8x384xf32, #tpu.memory_space<vmem>>, vector<8x384xf32>,
    } else {
    }
    %c0 = arith.constant 0 : index
    %c0_1 = arith.constant 0 : index
    %3 = vector.load %arg1[%c0, %c0_1] : memref<64x128xf32, #tpu.memory_space<vmem>>, vector<64x128xf32>
    %c0_2 = arith.constant 0 : index
    %c0_3 = arith.constant 0 : index
    %4 = vector.load %arg3[%c0_2, %c0_3] : memref<128x384xf32, #tpu.memory_space<vmem>>, vector<128x384xf32>
    %cst = arith.constant dense<0.000000e+00> : vector<64x384xf32>
    %5 = tpu.matmul %3, %4, %cst {dimension_numbers = #tpu.dot_dimension_numbers<[1], [0], [0], [1], [0, 0, 1, 1], [], []>} : vector<64x128xf32>, vector<128x384xf32>, vector<64x384xf32> -> vector<64x384xf32>
    %c0_4 = arith.constant 0 : index
    %c0_5 = arith.constant 0 : index
    %6 = vector.load %arg8[%c0_4, %c0_5] : memref<64x384xf32, #tpu.memory_space<vmem>>, vector<64x384xf32>
    tpu.vector_store %arg8[%c0_4, %c0_5], %5 {strides = array<i32>} : memref<64x384xf32, #tpu.memory_space<vmem>>, vector<64x384xf32>,
    %c0_6 = arith.constant 0 : index
    %c0_7 = arith.constant 0 : index
    %7 = vector.load %arg4[%c0_6, %c0_7] : memref<128x384xf32, #tpu.memory_space<vmem>>, vector<128x384xf32>
    %c0_8 = arith.constant 0 : index
    %c0_9 = arith.constant 0 : index
    %8 = vector.load %arg5[%c0_8, %c0_9] : memref<128x512xf32, #tpu.memory_space<vmem>>, vector<128x512xf32>
    %c0_10 = arith.constant 0 : index
    %c0_11 = arith.constant 0 : index
    %9 = vector.load %arg7[%c0_10, %c0_11] : memref<8x384xf32, #tpu.memory_space<vmem>>, vector<8x384xf32>
    %c0_i32_12 = arith.constant 0 : i32
    %c8_i32 = arith.constant 8 : i32
    %10 = arith.muli %c0_i32_12, %c8_i32 : i32
    %11 = tpu.assume_multiple %10, 8 : i32
    %12 = arith.index_cast %11 : i32 to index
    %c0_13 = arith.constant 0 : index
    %13 = vector.load %arg8[%12, %c0_13] : memref<64x384xf32, #tpu.memory_space<vmem>>, vector<8x384xf32>
    %14 = arith.addf %9, %13 : vector<8x384xf32>
    %15 = vector.extract_strided_slice %14 {offsets = [0, 256], sizes = [8, 128], strides = [1, 1]} : vector<8x384xf32> to vector<8x128xf32>
    %cst_14 = arith.constant dense<0.000000e+00> : vector<8x384xf32>
    %16 = tpu.matmul %15, %7, %cst_14 {dimension_numbers = #tpu.dot_dimension_numbers<[1], [0], [0], [1], [0, 0, 1, 1], [], []>} : vector<8x128xf32>, vector<128x384xf32>, vector<8x384xf32> -> vector<8x384xf32>
    %17 = vector.extract_strided_slice %14 {offsets = [0, 0], sizes = [8, 128], strides = [1, 1]} : vector<8x384xf32> to vector<8x128xf32>
    %18 = math.tanh %17 : vector<8x128xf32>
    %cst_15 = arith.constant dense<0.000000e+00> : vector<8x512xf32>
    %19 = tpu.matmul %18, %8, %cst_15 {dimension_numbers = #tpu.dot_dimension_numbers<[1], [0], [0], [1], [0, 0, 1, 1], [], []>} : vector<8x128xf32>, vector<128x512xf32>, vector<8x512xf32> -> vector<8x512xf32>
    %20 = vector.extract_strided_slice %14 {offsets = [0, 128], sizes = [8, 128], strides = [1, 1]} : vector<8x384xf32> to vector<8x128xf32>
    %21 = vector.extract_strided_slice %19 {offsets = [0, 384], sizes = [8, 128], strides = [1, 1]} : vector<8x512xf32> to vector<8x128xf32>
    %22 = arith.addf %20, %21 : vector<8x128xf32>
    %23 = arith.index_cast %11 : i32 to index
    %c0_16 = arith.constant 0 : index
    %24 = vector.load %arg6[%23, %c0_16] : memref<64x128xf32, #tpu.memory_space<vmem>>, vector<8x128xf32>
    tpu.vector_store %arg6[%23, %c0_16], %22 {strides = array<i32>} : memref<64x128xf32, #tpu.memory_space<vmem>>, vector<8x128xf32>,
    %25 = vector.extract_strided_slice %19 {offsets = [0, 0], sizes = [8, 384], strides = [1, 1]} : vector<8x512xf32> to vector<8x384xf32>
    %26 = arith.addf %16, %25 : vector<8x384xf32>
    %c1_i32 = arith.constant 1 : i32
    %c8_i32_17 = arith.constant 8 : i32
    %27 = arith.muli %c1_i32, %c8_i32_17 : i32
    %28 = tpu.assume_multiple %27, 8 : i32
    %29 = arith.index_cast %28 : i32 to index
    %c0_18 = arith.constant 0 : index
    %30 = vector.load %arg8[%29, %c0_18] : memref<64x384xf32, #tpu.memory_space<vmem>>, vector<8x384xf32>
    %31 = arith.addf %26, %30 : vector<8x384xf32>
    %32 = vector.extract_strided_slice %31 {offsets = [0, 256], sizes = [8, 128], strides = [1, 1]} : vector<8x384xf32> to vector<8x128xf32>
    %cst_19 = arith.constant dense<0.000000e+00> : vector<8x384xf32>
    %33 = tpu.matmul %32, %7, %cst_19 {dimension_numbers = #tpu.dot_dimension_numbers<[1], [0], [0], [1], [0, 0, 1, 1], [], []>} : vector<8x128xf32>, vector<128x384xf32>, vector<8x384xf32> -> vector<8x384xf32>
    %34 = vector.extract_strided_slice %31 {offsets = [0, 0], sizes = [8, 128], strides = [1, 1]} : vector<8x384xf32> to vector<8x128xf32>
    %35 = math.tanh %34 : vector<8x128xf32>
    %cst_20 = arith.constant dense<0.000000e+00> : vector<8x512xf32>
    %36 = tpu.matmul %35, %8, %cst_20 {dimension_numbers = #tpu.dot_dimension_numbers<[1], [0], [0], [1], [0, 0, 1, 1], [], []>} : vector<8x128xf32>, vector<128x512xf32>, vector<8x512xf32> -> vector<8x512xf32>
    %37 = vector.extract_strided_slice %31 {offsets = [0, 128], sizes = [8, 128], strides = [1, 1]} : vector<8x384xf32> to vector<8x128xf32>
    %38 = vector.extract_strided_slice %36 {offsets = [0, 384], sizes = [8, 128], strides = [1, 1]} : vector<8x512xf32> to vector<8x128xf32>
    %39 = arith.addf %37, %38 : vector<8x128xf32>
    %40 = arith.index_cast %28 : i32 to index
    %c0_21 = arith.constant 0 : index
    %41 = vector.load %arg6[%40, %c0_21] : memref<64x128xf32, #tpu.memory_space<vmem>>, vector<8x128xf32>
    tpu.vector_store %arg6[%40, %c0_21], %39 {strides = array<i32>} : memref<64x128xf32, #tpu.memory_space<vmem>>, vector<8x128xf32>,
    %42 = vector.extract_strided_slice %36 {offsets = [0, 0], sizes = [8, 384], strides = [1, 1]} : vector<8x512xf32> to vector<8x384xf32>
    %43 = arith.addf %33, %42 : vector<8x384xf32>
    %c2_i32 = arith.constant 2 : i32
    %c8_i32_22 = arith.constant 8 : i32
    %44 = arith.muli %c2_i32, %c8_i32_22 : i32
    %45 = tpu.assume_multiple %44, 8 : i32
    %46 = arith.index_cast %45 : i32 to index
    %c0_23 = arith.constant 0 : index
    %47 = vector.load %arg8[%46, %c0_23] : memref<64x384xf32, #tpu.memory_space<vmem>>, vector<8x384xf32>
    %48 = arith.addf %43, %47 : vector<8x384xf32>
    %49 = vector.extract_strided_slice %48 {offsets = [0, 256], sizes = [8, 128], strides = [1, 1]} : vector<8x384xf32> to vector<8x128xf32>
    %cst_24 = arith.constant dense<0.000000e+00> : vector<8x384xf32>
    %50 = tpu.matmul %49, %7, %cst_24 {dimension_numbers = #tpu.dot_dimension_numbers<[1], [0], [0], [1], [0, 0, 1, 1], [], []>} : vector<8x128xf32>, vector<128x384xf32>, vector<8x384xf32> -> vector<8x384xf32>
    %51 = vector.extract_strided_slice %48 {offsets = [0, 0], sizes = [8, 128], strides = [1, 1]} : vector<8x384xf32> to vector<8x128xf32>
    %52 = math.tanh %51 : vector<8x128xf32>
    %cst_25 = arith.constant dense<0.000000e+00> : vector<8x512xf32>
    %53 = tpu.matmul %52, %8, %cst_25 {dimension_numbers = #tpu.dot_dimension_numbers<[1], [0], [0], [1], [0, 0, 1, 1], [], []>} : vector<8x128xf32>, vector<128x512xf32>, vector<8x512xf32> -> vector<8x512xf32>
    %54 = vector.extract_strided_slice %48 {offsets = [0, 128], sizes = [8, 128], strides = [1, 1]} : vector<8x384xf32> to vector<8x128xf32>
    %55 = vector.extract_strided_slice %53 {offsets = [0, 384], sizes = [8, 128], strides = [1, 1]} : vector<8x512xf32> to vector<8x128xf32>
    %56 = arith.addf %54, %55 : vector<8x128xf32>
    %57 = arith.index_cast %45 : i32 to index
    %c0_26 = arith.constant 0 : index
    %58 = vector.load %arg6[%57, %c0_26] : memref<64x128xf32, #tpu.memory_space<vmem>>, vector<8x128xf32>
    tpu.vector_store %arg6[%57, %c0_26], %56 {strides = array<i32>} : memref<64x128xf32, #tpu.memory_space<vmem>>, vector<8x128xf32>,
    %59 = vector.extract_strided_slice %53 {offsets = [0, 0], sizes = [8, 384], strides = [1, 1]} : vector<8x512xf32> to vector<8x384xf32>
    %60 = arith.addf %50, %59 : vector<8x384xf32>
    %c3_i32 = arith.constant 3 : i32
    %c8_i32_27 = arith.constant 8 : i32
    %61 = arith.muli %c3_i32, %c8_i32_27 : i32
    %62 = tpu.assume_multiple %61, 8 : i32
    %63 = arith.index_cast %62 : i32 to index
    %c0_28 = arith.constant 0 : index
    %64 = vector.load %arg8[%63, %c0_28] : memref<64x384xf32, #tpu.memory_space<vmem>>, vector<8x384xf32>
    %65 = arith.addf %60, %64 : vector<8x384xf32>
    %66 = vector.extract_strided_slice %65 {offsets = [0, 256], sizes = [8, 128], strides = [1, 1]} : vector<8x384xf32> to vector<8x128xf32>
    %cst_29 = arith.constant dense<0.000000e+00> : vector<8x384xf32>
    %67 = tpu.matmul %66, %7, %cst_29 {dimension_numbers = #tpu.dot_dimension_numbers<[1], [0], [0], [1], [0, 0, 1, 1], [], []>} : vector<8x128xf32>, vector<128x384xf32>, vector<8x384xf32> -> vector<8x384xf32>
    %68 = vector.extract_strided_slice %65 {offsets = [0, 0], sizes = [8, 128], strides = [1, 1]} : vector<8x384xf32> to vector<8x128xf32>
    %69 = math.tanh %68 : vector<8x128xf32>
    %cst_30 = arith.constant dense<0.000000e+00> : vector<8x512xf32>
    %70 = tpu.matmul %69, %8, %cst_30 {dimension_numbers = #tpu.dot_dimension_numbers<[1], [0], [0], [1], [0, 0, 1, 1], [], []>} : vector<8x128xf32>, vector<128x512xf32>, vector<8x512xf32> -> vector<8x512xf32>
    %71 = vector.extract_strided_slice %65 {offsets = [0, 128], sizes = [8, 128], strides = [1, 1]} : vector<8x384xf32> to vector<8x128xf32>
    %72 = vector.extract_strided_slice %70 {offsets = [0, 384], sizes = [8, 128], strides = [1, 1]} : vector<8x512xf32> to vector<8x128xf32>
    %73 = arith.addf %71, %72 : vector<8x128xf32>
    %74 = arith.index_cast %62 : i32 to index
    %c0_31 = arith.constant 0 : index
    %75 = vector.load %arg6[%74, %c0_31] : memref<64x128xf32, #tpu.memory_space<vmem>>, vector<8x128xf32>
    tpu.vector_store %arg6[%74, %c0_31], %73 {strides = array<i32>} : memref<64x128xf32, #tpu.memory_space<vmem>>, vector<8x128xf32>,
    %76 = vector.extract_strided_slice %70 {offsets = [0, 0], sizes = [8, 384], strides = [1, 1]} : vector<8x512xf32> to vector<8x384xf32>
    %77 = arith.addf %67, %76 : vector<8x384xf32>
    %c4_i32 = arith.constant 4 : i32
    %c8_i32_32 = arith.constant 8 : i32
    %78 = arith.muli %c4_i32, %c8_i32_32 : i32
    %79 = tpu.assume_multiple %78, 8 : i32
    %80 = arith.index_cast %79 : i32 to index
    %c0_33 = arith.constant 0 : index
    %81 = vector.load %arg8[%80, %c0_33] : memref<64x384xf32, #tpu.memory_space<vmem>>, vector<8x384xf32>
    %82 = arith.addf %77, %81 : vector<8x384xf32>
    %83 = vector.extract_strided_slice %82 {offsets = [0, 256], sizes = [8, 128], strides = [1, 1]} : vector<8x384xf32> to vector<8x128xf32>
    %cst_34 = arith.constant dense<0.000000e+00> : vector<8x384xf32>
    %84 = tpu.matmul %83, %7, %cst_34 {dimension_numbers = #tpu.dot_dimension_numbers<[1], [0], [0], [1], [0, 0, 1, 1], [], []>} : vector<8x128xf32>, vector<128x384xf32>, vector<8x384xf32> -> vector<8x384xf32>
    %85 = vector.extract_strided_slice %82 {offsets = [0, 0], sizes = [8, 128], strides = [1, 1]} : vector<8x384xf32> to vector<8x128xf32>
    %86 = math.tanh %85 : vector<8x128xf32>
    %cst_35 = arith.constant dense<0.000000e+00> : vector<8x512xf32>
    %87 = tpu.matmul %86, %8, %cst_35 {dimension_numbers = #tpu.dot_dimension_numbers<[1], [0], [0], [1], [0, 0, 1, 1], [], []>} : vector<8x128xf32>, vector<128x512xf32>, vector<8x512xf32> -> vector<8x512xf32>
    %88 = vector.extract_strided_slice %82 {offsets = [0, 128], sizes = [8, 128], strides = [1, 1]} : vector<8x384xf32> to vector<8x128xf32>
    %89 = vector.extract_strided_slice %87 {offsets = [0, 384], sizes = [8, 128], strides = [1, 1]} : vector<8x512xf32> to vector<8x128xf32>
    %90 = arith.addf %88, %89 : vector<8x128xf32>
    %91 = arith.index_cast %79 : i32 to index
    %c0_36 = arith.constant 0 : index
    %92 = vector.load %arg6[%91, %c0_36] : memref<64x128xf32, #tpu.memory_space<vmem>>, vector<8x128xf32>
    tpu.vector_store %arg6[%91, %c0_36], %90 {strides = array<i32>} : memref<64x128xf32, #tpu.memory_space<vmem>>, vector<8x128xf32>,
    %93 = vector.extract_strided_slice %87 {offsets = [0, 0], sizes = [8, 384], strides = [1, 1]} : vector<8x512xf32> to vector<8x384xf32>
    %94 = arith.addf %84, %93 : vector<8x384xf32>
    %c5_i32 = arith.constant 5 : i32
    %c8_i32_37 = arith.constant 8 : i32
    %95 = arith.muli %c5_i32, %c8_i32_37 : i32
    %96 = tpu.assume_multiple %95, 8 : i32
    %97 = arith.index_cast %96 : i32 to index
    %c0_38 = arith.constant 0 : index
    %98 = vector.load %arg8[%97, %c0_38] : memref<64x384xf32, #tpu.memory_space<vmem>>, vector<8x384xf32>
    %99 = arith.addf %94, %98 : vector<8x384xf32>
    %100 = vector.extract_strided_slice %99 {offsets = [0, 256], sizes = [8, 128], strides = [1, 1]} : vector<8x384xf32> to vector<8x128xf32>
    %cst_39 = arith.constant dense<0.000000e+00> : vector<8x384xf32>
    %101 = tpu.matmul %100, %7, %cst_39 {dimension_numbers = #tpu.dot_dimension_numbers<[1], [0], [0], [1], [0, 0, 1, 1], [], []>} : vector<8x128xf32>, vector<128x384xf32>, vector<8x384xf32> -> vector<8x384xf32>
    %102 = vector.extract_strided_slice %99 {offsets = [0, 0], sizes = [8, 128], strides = [1, 1]} : vector<8x384xf32> to vector<8x128xf32>
    %103 = math.tanh %102 : vector<8x128xf32>
    %cst_40 = arith.constant dense<0.000000e+00> : vector<8x512xf32>
    %104 = tpu.matmul %103, %8, %cst_40 {dimension_numbers = #tpu.dot_dimension_numbers<[1], [0], [0], [1], [0, 0, 1, 1], [], []>} : vector<8x128xf32>, vector<128x512xf32>, vector<8x512xf32> -> vector<8x512xf32>
    %105 = vector.extract_strided_slice %99 {offsets = [0, 128], sizes = [8, 128], strides = [1, 1]} : vector<8x384xf32> to vector<8x128xf32>
    %106 = vector.extract_strided_slice %104 {offsets = [0, 384], sizes = [8, 128], strides = [1, 1]} : vector<8x512xf32> to vector<8x128xf32>
    %107 = arith.addf %105, %106 : vector<8x128xf32>
    %108 = arith.index_cast %96 : i32 to index
    %c0_41 = arith.constant 0 : index
    %109 = vector.load %arg6[%108, %c0_41] : memref<64x128xf32, #tpu.memory_space<vmem>>, vector<8x128xf32>
    tpu.vector_store %arg6[%108, %c0_41], %107 {strides = array<i32>} : memref<64x128xf32, #tpu.memory_space<vmem>>, vector<8x128xf32>,
    %110 = vector.extract_strided_slice %104 {offsets = [0, 0], sizes = [8, 384], strides = [1, 1]} : vector<8x512xf32> to vector<8x384xf32>
    %111 = arith.addf %101, %110 : vector<8x384xf32>
    %c6_i32 = arith.constant 6 : i32
    %c8_i32_42 = arith.constant 8 : i32
    %112 = arith.muli %c6_i32, %c8_i32_42 : i32
    %113 = tpu.assume_multiple %112, 8 : i32
    %114 = arith.index_cast %113 : i32 to index
    %c0_43 = arith.constant 0 : index
    %115 = vector.load %arg8[%114, %c0_43] : memref<64x384xf32, #tpu.memory_space<vmem>>, vector<8x384xf32>
    %116 = arith.addf %111, %115 : vector<8x384xf32>
    %117 = vector.extract_strided_slice %116 {offsets = [0, 256], sizes = [8, 128], strides = [1, 1]} : vector<8x384xf32> to vector<8x128xf32>
    %cst_44 = arith.constant dense<0.000000e+00> : vector<8x384xf32>
    %118 = tpu.matmul %117, %7, %cst_44 {dimension_numbers = #tpu.dot_dimension_numbers<[1], [0], [0], [1], [0, 0, 1, 1], [], []>} : vector<8x128xf32>, vector<128x384xf32>, vector<8x384xf32> -> vector<8x384xf32>
    %119 = vector.extract_strided_slice %116 {offsets = [0, 0], sizes = [8, 128], strides = [1, 1]} : vector<8x384xf32> to vector<8x128xf32>
    %120 = math.tanh %119 : vector<8x128xf32>
    %cst_45 = arith.constant dense<0.000000e+00> : vector<8x512xf32>
    %121 = tpu.matmul %120, %8, %cst_45 {dimension_numbers = #tpu.dot_dimension_numbers<[1], [0], [0], [1], [0, 0, 1, 1], [], []>} : vector<8x128xf32>, vector<128x512xf32>, vector<8x512xf32> -> vector<8x512xf32>
    %122 = vector.extract_strided_slice %116 {offsets = [0, 128], sizes = [8, 128], strides = [1, 1]} : vector<8x384xf32> to vector<8x128xf32>
    %123 = vector.extract_strided_slice %121 {offsets = [0, 384], sizes = [8, 128], strides = [1, 1]} : vector<8x512xf32> to vector<8x128xf32>
    %124 = arith.addf %122, %123 : vector<8x128xf32>
    %125 = arith.index_cast %113 : i32 to index
    %c0_46 = arith.constant 0 : index
    %126 = vector.load %arg6[%125, %c0_46] : memref<64x128xf32, #tpu.memory_space<vmem>>, vector<8x128xf32>
    tpu.vector_store %arg6[%125, %c0_46], %124 {strides = array<i32>} : memref<64x128xf32, #tpu.memory_space<vmem>>, vector<8x128xf32>,
    %127 = vector.extract_strided_slice %121 {offsets = [0, 0], sizes = [8, 384], strides = [1, 1]} : vector<8x512xf32> to vector<8x384xf32>
    %128 = arith.addf %118, %127 : vector<8x384xf32>
    %c7_i32 = arith.constant 7 : i32
    %c8_i32_47 = arith.constant 8 : i32
    %129 = arith.muli %c7_i32, %c8_i32_47 : i32
    %130 = tpu.assume_multiple %129, 8 : i32
    %131 = arith.index_cast %130 : i32 to index
    %c0_48 = arith.constant 0 : index
    %132 = vector.load %arg8[%131, %c0_48] : memref<64x384xf32, #tpu.memory_space<vmem>>, vector<8x384xf32>
    %133 = arith.addf %128, %132 : vector<8x384xf32>
    %134 = vector.extract_strided_slice %133 {offsets = [0, 256], sizes = [8, 128], strides = [1, 1]} : vector<8x384xf32> to vector<8x128xf32>
    %cst_49 = arith.constant dense<0.000000e+00> : vector<8x384xf32>
    %135 = tpu.matmul %134, %7, %cst_49 {dimension_numbers = #tpu.dot_dimension_numbers<[1], [0], [0], [1], [0, 0, 1, 1], [], []>} : vector<8x128xf32>, vector<128x384xf32>, vector<8x384xf32> -> vector<8x384xf32>
    %136 = vector.extract_strided_slice %133 {offsets = [0, 0], sizes = [8, 128], strides = [1, 1]} : vector<8x384xf32> to vector<8x128xf32>
    %137 = math.tanh %136 : vector<8x128xf32>
    %cst_50 = arith.constant dense<0.000000e+00> : vector<8x512xf32>
    %138 = tpu.matmul %137, %8, %cst_50 {dimension_numbers = #tpu.dot_dimension_numbers<[1], [0], [0], [1], [0, 0, 1, 1], [], []>} : vector<8x128xf32>, vector<128x512xf32>, vector<8x512xf32> -> vector<8x512xf32>
    %139 = vector.extract_strided_slice %133 {offsets = [0, 128], sizes = [8, 128], strides = [1, 1]} : vector<8x384xf32> to vector<8x128xf32>
    %140 = vector.extract_strided_slice %138 {offsets = [0, 384], sizes = [8, 128], strides = [1, 1]} : vector<8x512xf32> to vector<8x128xf32>
    %141 = arith.addf %139, %140 : vector<8x128xf32>
    %142 = arith.index_cast %130 : i32 to index
    %c0_51 = arith.constant 0 : index
    %143 = vector.load %arg6[%142, %c0_51] : memref<64x128xf32, #tpu.memory_space<vmem>>, vector<8x128xf32>
    tpu.vector_store %arg6[%142, %c0_51], %141 {strides = array<i32>} : memref<64x128xf32, #tpu.memory_space<vmem>>, vector<8x128xf32>,
    %144 = vector.extract_strided_slice %138 {offsets = [0, 0], sizes = [8, 384], strides = [1, 1]} : vector<8x512xf32> to vector<8x384xf32>
    %145 = arith.addf %135, %144 : vector<8x384xf32>
    %c8_i32_52 = arith.constant 8 : i32
    %c0_53 = arith.constant 0 : index
    %c0_54 = arith.constant 0 : index
    %146 = vector.load %arg7[%c0_53, %c0_54] : memref<8x384xf32, #tpu.memory_space<vmem>>, vector<8x384xf32>
    tpu.vector_store %arg7[%c0_53, %c0_54], %145 {strides = array<i32>} : memref<8x384xf32, #tpu.memory_space<vmem>>, vector<8x384xf32>,
    return
  }
  func.func @transform_0(%arg0: i32) -> (i32, i32) {
    %c0_i32 = arith.constant 0 : i32
    %c0_i32_0 = arith.constant 0 : i32
    return %arg0, %c0_i32 : i32, i32
  }
  func.func @transform_1(%arg0: i32) -> (i32, i32) {
    %c0_i32 = arith.constant 0 : i32
    %c0_i32_0 = arith.constant 0 : i32
    %c0_i32_1 = arith.constant 0 : i32
    return %c0_i32, %c0_i32_0 : i32, i32
  }
  func.func @transform_2(%arg0: i32) -> (i32, i32) {
    %c0_i32 = arith.constant 0 : i32
    %c0_i32_0 = arith.constant 0 : i32
    %c0_i32_1 = arith.constant 0 : i32
    return %c0_i32, %c0_i32_0 : i32, i32
  }
  func.func @transform_3(%arg0: i32) -> (i32, i32) {
    %c0_i32 = arith.constant 0 : i32
    %c0_i32_0 = arith.constant 0 : i32
    %c0_i32_1 = arith.constant 0 : i32
    return %c0_i32, %c0_i32_0 : i32, i32
  }
  func.func @transform_4(%arg0: i32) -> (i32, i32) {
    %c0_i32 = arith.constant 0 : i32
    %c0_i32_0 = arith.constant 0 : i32
    %c0_i32_1 = arith.constant 0 : i32
    return %c0_i32, %c0_i32_0 : i32, i32
  }
  func.func @transform_5(%arg0: i32) -> (i32, i32) {
    %c0_i32 = arith.constant 0 : i32
    %c0_i32_0 = arith.constant 0 : i32
    return %arg0, %c0_i32 : i32, i32
  }
}

</mosaic_0001>

<bundles_post_ra>
// kernel: custom-call.11
= control target key start
LH: loop header
LB: loop body
LE: loop exit
PB: predicated region body
PF: predicated region fallthrough
CT: control target
= control target key end

     0   :  { %5 = vsyncpa [#allocation1], 0  ;;  %s839_s0 = inlined_call_operand.hbm [shape: f32[32,32], index: 0, kind: input, shape index: {}]   ;;  %s840_s1 = inlined_call_operand.vmem [shape: f32[32,32], index: 1, kind: output, shape index: {0}]   ;;  %s841_s2 = inlined_call_operand.hbm [shape: s32[32], index: 2, kind: output, shape index: {1}]   ;;  %s842_s3 = inlined_call_operand.vmem [shape: s32[32], index: 3, kind: output, shape index: {2}]  }
   0x1   :  { %6 = vsyncpa [#allocation2], 0  ;;  %s695_s12 = smov [#allocation0]   ;;  %s595_s16 = scalar_lea.hbm %s839_s0, 512 }
   0x2   :  { %s10_s13 = sshll.u32 %s695_s12, 4  ;;  %p596_p0 = scmp.ne.s32.totalorder %s839_s0, %s595_s16  ;;  %s11_s13 = int_to_ptr.vmem [resolvable:$true] %s10_s13 }
   0x3   :  { %p599_p1 = scmp.lt.u32.totalorder %s595_s16, %s839_s0 }
   0x5   :  { %p601_p2 = pnand %p599_p1, %p596_p0 }
   0x7   :  { %604 = shalt.err (!%p601_p2)
}
   0x8   :  { %s605_s21 = scalar_lea.vmem %s11_s13, 512  ;;  %p610_p4 = scmp.lt.s32.totalorder %s11_s13, %s11_s13 }
   0x9   :  { %p606_p3 = scmp.ne.s32.totalorder %s11_s13, %s605_s21  ;;  %p611_p5 = scmp.lt.s32.totalorder %s605_s21, %s605_s21 }
   0xb   :  { %p612_p6 = por %p611_p5, %p610_p4 }
   0xd   :  { %p613_p7 = pnand %p612_p6, %p606_p3 }
   0xf   :  { %616 = shalt.err (!%p613_p7)
}
  0x10   :  { %13 = dma.hbm_to_vmem [thread:$0]  %s839_s0, 512, %s11_s13, [#allocation1]  }
  0x11   :  { %675 = dma.done.wait [#allocation1], 512  }
  0x12   :  { %676 = vsyncadd [#allocation1], 4294966784  ;;  %v30_v0 = vlaneseq  ;;  %v696_v1 = vmov 0   ;;  %v15_v3 = vld [vmem:[#allocation0] sm:$0xff]  ;;  %v19_v4 = vld [vmem:[#allocation0 + $0x8] sm:$0xff]  ;;  %s679_s24 = smov 0  }
  0x13   :  { %29 = vst [vmem:[#allocation4] sm:$0x1] %v696_v1  ;;  %v23_v5 = vld [vmem:[#allocation0 + $0x10] sm:$0xff]  ;;  %16 = vst [vmem:[#allocation3] sm:$0xff] %v15_v3  ;;  %v27_v6 = vld [vmem:[#allocation0 + $0x18] sm:$0xff] }
  0x14   :  { %v731_v2 = vshrl.u32 %v30_v0, 7  ;;  %20 = vst [vmem:[#allocation3 + $0x8] sm:$0xff] %v19_v4  ;;  %24 = vst [vmem:[#allocation3 + $0x10] sm:$0xff] %v23_v5 }
  0x15   :  { %28 = vst [vmem:[#allocation3 + $0x18] sm:$0xff] %v27_v6 }
  0x16 LB: > { %s499_s0 = sshll.u32 %s681_s24, 3  ;;  %s38_s24 = sadd.s32 1, %s681_s24   ;;  %s681_s24 = sphi %s679_s24, %s38_s24  }
  0x17   : > { %v42_v7 = vstv %s499_s0  ;;  %s40_s25 = scalar_lea.vmem [#allocation8], %s499_s0  ;;  %p35_p8 = scmp.ge.s32.totalorder %s38_s24, 4  }
  0x18   : > { %v43_v8 = vadd.s32 %v42_v7, %v731_v2  ;;  %s734_s26 = smov (%p35_p8), 0  }
  0x19   :  { %37 = sbr.rel (!%p35_p8) target bundleno = 22 (0x16), region = 131 }
  0x1a   : > { %44 = vst [vmem:[%s40_s25] sm:$0xff] %v43_v8 }
  0x20 LB: > { %v55_v9 = vld [vmem:[#allocation3] sm:$0xff]  ;;  %v67_v10 = vld [vmem:[#allocation3 + $0x8] sm:$0xff]  ;;  %v740_v11 = vadd.s32 8, %v731_v2  ;;  %v743_v13 = vstv %s685_s26  ;;  %v79_v15 = vld [vmem:[#allocation3 + $0x10] sm:$0xff]  ;;  %v748_v16 = vadd.s32 16, %v731_v2  ;;  %v755_v21 = vadd.s32 24, %v731_v2  ;;  %s685_s26 = sphi %s734_s26, %s50_s26  }
  0x21   : > { %v56_v12 = vand.u32 2147483647, %v55_v9  ;;  %v68_v14 = vand.u32 2147483647, %v67_v10  ;;  %vm59_vm0 = vcmp.ge.s32.totalorder %v731_v2, %v743_v13  ;;  %v80_v19 = vand.u32 2147483647, %v79_v15 }
  0x22   : > { %vm71_vm3 = vcmp.ge.s32.totalorder %v740_v11, %v743_v13  ;;  %v91_v20 = vld [vmem:[#allocation3 + $0x18] sm:$0xff]  ;;  %vm83_vm6 = vcmp.ge.s32.totalorder %v748_v16, %v743_v13  ;;  %vm95_vm9 = vcmp.ge.s32.totalorder %v755_v21, %v743_v13  ;;  %s137_s27 = ssub.s32 128, %s685_s26  ;;  %v143_v57 = vand.u32 127, %v30_v0  ;;  %v146_v59 = vld [vmem:[#allocation4] ss:$0 sm:$0xff]  ;;  %s149_s28 = scalar_lea.vmem [#allocation3], %s685_s26 }
  0x23   : > { %vm501_vm1 = vcmp.gt.f32.partialorder %v56_v12, -inf  ;;  %v92_v24 = vand.u32 2147483647, %v91_v20  ;;  %v151_v60 = vld [vmem:[%s149_s28] ss:$0 sm:$0xff]  ;;  %s155_s30 = scalar_lea.vmem [#allocation8], %s685_s26 }
  0x24   : > { %vm63_vm2 = vmand %vm59_vm0, %vm501_vm1  ;;  %v157_v61 = vld [vmem:[%s155_s30] ss:$0 sm:$0xff]  ;;  %s50_s26 = sadd.s32 1, %s685_s26  }
  0x25   : > { %v64_v17 = vsel %vm63_vm2, %v731_v2, %v743_v13  ;;  %v65_v18 = vsel %vm63_vm2, %v56_v12, -inf  ;;  %p47_p9 = scmp.ge.s32.totalorder %s50_s26, 32  }
  0x26   : > { %vm74_vm4 = vcmp.lt.f32.partialorder %v65_v18, %v68_v14  ;;  %s687_s8 = smov (%p47_p9), %s840_s1   ;;  %s691_s9 = smov (%p47_p9), [#allocation3]  }
  0x27   : > { %vm75_vm5 = vmand %vm71_vm3, %vm74_vm4  ;;  %vm767_vm3 = vcmp.eq.s32.totalorder %v143_v57, %v743_v13 }
  0x28   : > { %v76_v22 = vsel %vm75_vm5, %v740_v11, %v64_v17  ;;  %v77_v23 = vsel %vm75_vm5, %v68_v14, %v65_v18  ;;  %vm190_vm5 = vcmp.gt.s32.totalorder %v740_v11, %v743_v13 }
  0x29   : > { %vm86_vm7 = vcmp.lt.f32.partialorder %v77_v23, %v80_v19 }
  0x2a   : > { %vm87_vm8 = vmand %vm83_vm6, %vm86_vm7  ;;  %vm175_vm6 = vcmp.gt.s32.totalorder %v731_v2, %v743_v13  ;;  %vm205_vm7 = vcmp.gt.s32.totalorder %v748_v16, %v743_v13 }
  0x2b   : > { %v88_v25 = vsel %vm87_vm8, %v748_v16, %v76_v22  ;;  %v89_v26 = vsel %vm87_vm8, %v80_v19, %v77_v23 }
  0x2c   : > { %vm98_vm10 = vcmp.lt.f32.partialorder %v89_v26, %v92_v24 }
  0x2d   : > { %vm99_vm11 = vmand %vm95_vm9, %vm98_vm10  ;;  %vm220_vm9 = vcmp.gt.s32.totalorder %v755_v21, %v743_v13 }
  0x2e   : > { %v100_v27 = vsel %vm99_vm11, %v755_v21, %v88_v25  ;;  %v101_v28 = vsel %vm99_vm11, %v92_v24, %v89_v26  ;;  %vm194_vm10 = vmand %vm190_vm5, %vm767_vm3 }
  0x2f   : > { %v102_v29 = vrot.slane %v101_v28, 1  ;;  %v103_v30 = vrot.slane %v100_v27, 1  ;;  %vm179_vm11 = vmand %vm175_vm6, %vm767_vm3 }
  0x31   : > { %vm104_vm12 = vcmp.ge.f32.partialorder %v102_v29, %v101_v28  ;;  %v107_v31 = vrot.slane %v102_v29, 1  ;;  %v108_v32 = vrot.slane %v103_v30, 1 }
  0x32   : > { %v105_v33 = vsel %vm104_vm12, %v102_v29, %v101_v28  ;;  %v106_v34 = vsel %vm104_vm12, %v103_v30, %v100_v27  ;;  %vm209_vm12 = vmand %vm205_vm7, %vm767_vm3 }
  0x33   : > { %vm109_vm13 = vcmp.ge.f32.partialorder %v107_v31, %v105_v33  ;;  %v112_v35 = vrot.slane %v107_v31, 1  ;;  %v113_v36 = vrot.slane %v108_v32, 1 }
  0x34   : > { %v110_v37 = vsel %vm109_vm13, %v107_v31, %v105_v33  ;;  %v111_v38 = vsel %vm109_vm13, %v108_v32, %v106_v34  ;;  %vm224_vm13 = vmand %vm220_vm9, %vm767_vm3 }
  0x35   : > { %vm114_vm14 = vcmp.ge.f32.partialorder %v112_v35, %v110_v37  ;;  %v117_v39 = vrot.slane %v112_v35, 1  ;;  %v118_v40 = vrot.slane %v113_v36, 1 }
  0x36   : > { %v115_v41 = vsel %vm114_vm14, %v112_v35, %v110_v37  ;;  %v116_v42 = vsel %vm114_vm14, %v113_v36, %v111_v38  ;;  %vm167_vm14 = vcmp.gt.s32.totalorder %v143_v57, %v743_v13 }
  0x37   : > { %vm119_vm15 = vcmp.ge.f32.partialorder %v117_v39, %v115_v41  ;;  %v122_v43 = vrot.slane %v117_v39, 1  ;;  %v123_v44 = vrot.slane %v118_v40, 1 }
  0x38   : > { %v120_v45 = vsel %vm119_vm15, %v117_v39, %v115_v41  ;;  %v121_v46 = vsel %vm119_vm15, %v118_v40, %v116_v42 }
  0x39   : > { %vm124_vm0 = vcmp.ge.f32.partialorder %v122_v43, %v120_v45  ;;  %v127_v47 = vrot.slane %v122_v43, 1  ;;  %v128_v48 = vrot.slane %v123_v44, 1 }
  0x3a   : > { %v125_v49 = vsel %vm124_vm0, %v122_v43, %v120_v45  ;;  %v126_v50 = vsel %vm124_vm0, %v123_v44, %v121_v46 }
  0x3b   : > { %vm129_vm1 = vcmp.ge.f32.partialorder %v127_v47, %v125_v49  ;;  %v132_v51 = vrot.slane %v127_v47, 1  ;;  %v133_v52 = vrot.slane %v128_v48, 1 }
  0x3c   : > { %v130_v53 = vsel %vm129_vm1, %v127_v47, %v125_v49  ;;  %v131_v54 = vsel %vm129_vm1, %v128_v48, %v126_v50 }
  0x3d   : > { %vm134_vm2 = vcmp.ge.f32.partialorder %v132_v51, %v130_v53 }
  0x3e   : > { %v136_v55 = vsel %vm134_vm2, %v133_v52, %v131_v54 }
  0x3f   : > { %138 = vrot.lane.b32.xlu0 %v136_v55, %s137_s27 }
  0xb1   : > { %v139_v56 = vpop.permute.xlu0 %138 }
  0xb2   : > { %509 = vpush %v139_v56 }
  0xe3   : > { %s510_s29 = spop %509 }
  0xe4   : > { %v145_v62 = vstv %s510_s29  ;;  %s150_s4 = scalar_lea.vmem [#allocation3], %s510_s29  ;;  %s156_s5 = scalar_lea.vmem [#allocation8], %s510_s29 }
  0xe5   : > { %v147_v63 = vsel %vm767_vm3, %v145_v62, %v146_v59  ;;  %v152_v1 = vld [vmem:[%s150_s4] ss:$0 sm:$0xff] }
  0xe6   : > { %v158_v3 = vld [vmem:[%s156_s5] ss:$0 sm:$0xff]  ;;  %148 = vst [vmem:[#allocation4] sm:$0x1] %v147_v63  ;;  %153 = vst [vmem:[%s150_s4] sm:$0x1] %v151_v60  ;;  %vm161_vm4 = vcmp.ne.f32.partialorder %v152_v1, 0.0 }
  0xe7   : > { %159 = vst [vmem:[%s156_s5] sm:$0x1] %v157_v61  ;;  %154 = vst [vmem:[%s149_s28] sm:$0x1] %v152_v1  ;;  %v168_v28 = vsel %vm167_vm14, %v152_v1, 0.0 }
  0xe8   : > { %160 = vst [vmem:[%s155_s30] sm:$0x1] %v158_v3  ;;  %vm162_vm8 = vmand %vm767_vm3, %vm161_vm4 }
  0xe9   : > { %v163_v4 = vsel %vm162_vm8, %v152_v1, 1.0 }
  0xea   : > { %v191_v5 = vsel %vm190_vm5, %v163_v4, 1.0  ;;  %v176_v6 = vsel %vm175_vm6, %v163_v4, 1.0  ;;  %v206_v7 = vsel %vm205_vm7, %v163_v4, 1.0  ;;  %v221_v8 = vsel %vm220_vm9, %v163_v4, 1.0 }
  0xeb   : > { %587 = vrcp.f32 %v191_v5 }
  0xec   : > { %589 = vrcp.f32 %v176_v6 }
  0xed   : > { %591 = vrcp.f32 %v206_v7  ;;  %v286_v41 = vld [vmem:[#allocation4] sm:$0x1] (%p47_p9) }
  0xee   : > { %593 = vrcp.f32 %v221_v8  ;;  %v187_v10 = vld [vmem:[#allocation3 + $0x8] sm:$0xff]  ;;  %v172_v15 = vld [vmem:[#allocation3] sm:$0xff]  ;;  %v202_v19 = vld [vmem:[#allocation3 + $0x10] sm:$0xff]  ;;  %288 = vst [vmem:[#allocation5] sm:$0x1] (%p47_p9), %v286_v41 }
  0xef   : > { %v217_v11 = vld [vmem:[#allocation3 + $0x18] sm:$0xff]  ;;  %v235_v40 = vld [vmem:[#allocation8 + $0x10] sm:$0xff] (%p47_p9)  ;;  %v237_v42 = vld [vmem:[#allocation8 + $0x18] sm:$0xff] (%p47_p9) }
  0xf0   :  { %v231_v13 = vld [vmem:[#allocation8] sm:$0xff] (%p47_p9)  ;;  %v233_v39 = vld [vmem:[#allocation8 + $0x8] sm:$0xff] (%p47_p9) }
  0xf5   : > { %v588_v9 = vpop.eup %587 }
  0xf6   : > { %v590_v12 = vpop.eup %589  ;;  %v193_v14 = vmul.f32 %v588_v9, %v187_v10 }
  0xf7   : > { %v592_v17 = vpop.eup %591  ;;  %v178_v18 = vmul.f32 %v590_v12, %v172_v15 }
  0xf8   : > { %v195_v20 = vsel %vm194_vm10, %v193_v14, 0.0  ;;  %v208_v22 = vmul.f32 %v592_v17, %v202_v19  ;;  %v594_v23 = vpop.eup %593 }
  0xf9   : > { %196 = vadd.xlane.f32.xlu1 %v195_v20  ;;  %v180_v24 = vsel %vm179_vm11, %v178_v18, 0.0  ;;  %v223_v26 = vmul.f32 %v594_v23, %v217_v11 }
  0xfa   : > { %181 = vadd.xlane.f32.xlu0 %v180_v24  ;;  %v210_v25 = vsel %vm209_vm12, %v208_v22, 0.0 }
  0xfb   : > { %v225_v27 = vsel %vm224_vm13, %v223_v26, 0.0 }
  0xfd   : > { %211 = vadd.xlane.f32.xlu1 %v210_v25 }
 0x101   : > { %226 = vadd.xlane.f32.xlu1 %v225_v27 }
 0x127   :  { %250 = vxpose.xlu0.b32.start [1/4] (short) (narrow) (%p47_p9), %v231_v13, 8 }
 0x12b   :  { %251 = vxpose.xlu0.b32.cont [2/4] (short) (narrow) (%p47_p9), %v233_v39, 8 }
 0x12f   :  { %252 = vxpose.xlu0.b32.cont [3/4] (short) (narrow) (%p47_p9), %v235_v40, 8 }
 0x133   :  { %253 = vxpose.xlu0.b32.end [4/4] (short) (narrow) (%p47_p9), %v237_v42, 8 }
 0x186   : > { %v197_v29 = vpop.xlane.xlu1 %196 }
 0x187   : > { %v198_v30 = vmul.f32 %v197_v29, %v168_v28  ;;  %v182_v16 = vpop.xlane.xlu0 %181 }
 0x188   : > { %v183_v31 = vmul.f32 %v182_v16, %v168_v28 }
 0x189   : > { %v199_v32 = vsub.f32 %v193_v14, %v198_v30 }
 0x18a   : > { %v184_v33 = vsub.f32 %v178_v18, %v183_v31  ;;  %v212_v34 = vpop.xlane.xlu1 %211 }
 0x18b   : > { %200 = vst [vmem:[#allocation3 + $0x8] sm:$0xff] %v199_v32  ;;  %v213_v35 = vmul.f32 %v212_v34, %v168_v28 }
 0x18c   : > { %185 = vst [vmem:[#allocation3] sm:$0xff] %v184_v33 }
 0x18d   : > { %v214_v36 = vsub.f32 %v208_v22, %v213_v35 }
 0x18e   : > { %v227_v37 = vpop.xlane.xlu1 %226 }
 0x18f   : > { %215 = vst [vmem:[#allocation3 + $0x10] sm:$0xff] %v214_v36  ;;  %v228_v21 = vmul.f32 %v227_v37, %v168_v28 }
 0x191   : > { %v229_v38 = vsub.f32 %v223_v26, %v228_v21  ;;  %49 = sbr.rel (!%p47_p9) target bundleno = 32 (0x20), region = 142 }
 0x193   : > { %230 = vst [vmem:[#allocation3 + $0x18] sm:$0xff] %v229_v38 }
 0x1a7   :  { %v266_v43 = vpop.trf.xlu0 }
 0x1a8   :  { %282 = vst [vmem:[#allocation6] sm:$0x1] %v266_v43 }
 0x1af   :  { %v292_v44 = vld [vmem:[#allocation6] sm:$0x1] }
 0x1b0   :  { %294 = vst [vmem:[#allocation7] sm:$0x1] %v292_v44 }
 0x1b1 LB: > { %v342_v0 = vld [vmem:[%s693_s9] sm:$0xff]  ;;  %s344_s9 = scalar_lea.vmem %s693_s9, 8   ;;  %s693_s9 = sphi %s691_s9, %s344_s9   ;;  %s689_s8 = sphi %s687_s8, %s345_s8  }
 0x1b2   : > { %343 = vst [vmem:[%s689_s8] sm:$0xff] %v342_v0  ;;  %s345_s8 = scalar_lea.vmem %s689_s8, 8   ;;  %p339_p10 = scmp.gt.s32.totalorder %s344_s9, [#allocation3 + $0x18] }
 0x1b3   :  { %s697_s10 = smov (%p339_p10), [#allocation5]  }
 0x1b4   :  { %341 = sbr.rel (!%p339_p10) target bundleno = 433 (0x1b1), region = 164  ;;  %s362_s11 = sshll.u32 (%p339_p10), %s697_s10, 4  ;;  %s363_s11 = int_to_ptr.vmem [resolvable:$true] %s362_s11 }
 0x1b5   :  { %s617_s1 = scalar_lea.vmem (%p339_p10), %s363_s11, 16  ;;  %s621_s14 = scalar_lea.vmem (%p339_p10), %s363_s11, 32 }
 0x1b6   :  { %p618_p11 = scmp.ne.s32.totalorder (%p339_p10), %s363_s11, %s617_s1  ;;  %p622_p12 = scmp.lt.s32.totalorder (%p339_p10), %s363_s11, %s363_s11 }
 0x1b7   :  { %v428_v2 = vld [vmem:[#allocation7] sm:$0x1] (%p339_p10)  ;;  %p623_p13 = scmp.lt.s32.totalorder (%p339_p10), %s621_s14, %s617_s1 }
 0x1b8   :  { %429 = vst [vmem:[%s842_s3] sm:$0x1] (%p339_p10), %v428_v2 }
 0x1b9   :  { %p624_p0 = por (%p339_p10), %p623_p13, %p622_p12 }
 0x1bb   :  { %p625_p1 = pnand %p624_p0, %p618_p11 }
 0x1bd   :  { %628 = shalt.err (!%p625_p1)
}
 0x1be   :  { %s629_s17 = scalar_lea.hbm %s841_s2, 16 }
 0x1bf   :  { %p630_p2 = scmp.ne.s32.totalorder %s841_s2, %s629_s17  ;;  %p633_p3 = scmp.lt.u32.totalorder %s629_s17, %s841_s2 }
 0x1c1   :  { %p635_p4 = pnand %p633_p3, %p630_p2 }
 0x1c3   :  { %638 = shalt.err (!%p635_p4)
}
 0x1c4   :  { %365 = dma.vmem_to_hbm [thread:$0]  %s363_s11, 16, %s841_s2, [#allocation2]  }
 0x1c5   :  { %677 = dma.done.wait [#allocation2], 16  }
 0x1c6   :  { %678 = vsyncadd [#allocation2], 4294967280 }
 0x1c7   :  { %435 = vsyncpa [#allocation1], 1 }
 0x1c8   :  { %436 = vsyncpa [#allocation2], 1 }

// kernel: custom-call.13
= control target key start
LH: loop header
LB: loop body
LE: loop exit
PB: predicated region body
PF: predicated region fallthrough
CT: control target
= control target key end

     0   :  { %v46_v0 = vlaneseq  ;;  %v730_v9 = vmov -1.0   ;;  %v731_v53 = vmov 0.0   ;;  %s884_s0 = inlined_call_operand.vmem [shape: f32[1,32,32], index: 0, kind: input, shape index: {}]   ;;  %s885_s1 = inlined_call_operand.vmem [shape: f32[1,32,32], index: 1, kind: output, shape index: {}]  }
   0x1   :  { %v35_v1 = vld [vmem:[%s884_s0] sm:$0xff]  ;;  %v37_v36 = vld [vmem:[%s884_s0 + $0x8] sm:$0xff] }
   0x2   :  { %v745_v2 = vand.u32 127, %v46_v0  ;;  %v747_v3 = vshrl.u32 %v46_v0, 7 }
   0x4   :  { %vm52_vm0 = vcmp.eq.s32.totalorder %v747_v3, %v745_v2  ;;  %vm48_vm1 = vcmp.lt.s32.totalorder %v745_v2, 32  ;;  %vm57_vm2 = vcmp.ge.s32.totalorder %v747_v3, %v745_v2  ;;  %vm119_vm4 = vcmp.eq.s32.totalorder %v745_v2, 0 }
   0x5   :  { %v54_v4 = vsel %vm52_vm0, %v35_v1, 0.0  ;;  %vm58_vm3 = vmand %vm57_vm2, %vm48_vm1  ;;  %vm116_vm5 = vcmp.eq.s32.totalorder %v745_v2, %v747_v3  ;;  %v120_v10 = vsel %vm119_vm4, 1.0, %v730_v9  ;;  %vm148_vm6 = vcmp.eq.s32.totalorder %v745_v2, 1 }
   0x6   :  { %55 = vadd.xlane.f32.xlu0 %v54_v4  ;;  %v59_v6 = vsel %vm58_vm3, %v35_v1, 0.0  ;;  %v121_v11 = vsel %vm116_vm5, %v120_v10, 0.0  ;;  %vm158_vm7 = vcmp.eq.s32.totalorder %v745_v2, 2  ;;  %vm168_vm8 = vcmp.eq.s32.totalorder %v745_v2, 3 }
   0x7   :  { %vm178_vm9 = vcmp.eq.s32.totalorder %v745_v2, 4  ;;  %v67_v31 = vadd.s32 8, %v747_v3  ;;  %vm188_vm11 = vcmp.eq.s32.totalorder %v745_v2, 5  ;;  %vm198_vm14 = vcmp.eq.s32.totalorder %v745_v2, 6 }
   0x8   :  { %vm208_vm0 = vcmp.eq.s32.totalorder %v745_v2, 7  ;;  %vm218_vm2 = vcmp.eq.s32.totalorder %v745_v2, 8  ;;  %vm232_vm3 = vcmp.eq.s32.totalorder %v745_v2, 9  ;;  %vm246_vm4 = vcmp.eq.s32.totalorder %v745_v2, 10 }
   0x9   :  { %vm68_vm10 = vcmp.eq.s32.totalorder %v67_v31, %v745_v2  ;;  %vm73_vm12 = vcmp.ge.s32.totalorder %v67_v31, %v745_v2  ;;  %vm127_vm15 = vcmp.eq.s32.totalorder %v745_v2, %v67_v31  ;;  %vm260_vm5 = vcmp.eq.s32.totalorder %v745_v2, 11 }
   0xa   :  { %v70_v37 = vsel %vm68_vm10, %v37_v36, 0.0  ;;  %vm74_vm13 = vmand %vm73_vm12, %vm48_vm1  ;;  %v128_v54 = vsel %vm127_vm15, -1.0, %v731_v53  ;;  %vm316_vm12 = vcmp.eq.s32.totalorder %v745_v2, 15  ;;  %vm348_vm15 = vcmp.eq.s32.totalorder %v745_v2, 17 }
   0xb   :  { %v75_v44 = vsel %vm74_vm13, %v37_v36, 0.0 }
  0x93   :  { %v751_v5 = vpop.xlane.xlu0 %55 }
  0x94   :  { %722 = vrcp.f32 %v751_v5 }
  0x9e   :  { %v759_v7 = vpop.eup %722 }
  0x9f   :  { %v61_v8 = vmul.f32 %v759_v7, %v59_v6 }
  0xa1   :  { %62 = vst [vmem:[#allocation2] sm:$0xff] %v61_v8 }
  0xa8   :  { %v144_v12 = vld [vmem:[#allocation2 + $0x1] ss:$0 sm:$0xff]  ;;  %v154_v15 = vld [vmem:[#allocation2 + $0x2] ss:$0 sm:$0xff]  ;;  %v164_v20 = vld [vmem:[#allocation2 + $0x3] ss:$0 sm:$0xff] }
  0xa9   :  { %v145_v13 = vxor.u32 2147483648, %v144_v12  ;;  %v155_v17 = vxor.u32 2147483648, %v154_v15  ;;  %v165_v22 = vxor.u32 2147483648, %v164_v20  ;;  %v174_v25 = vld [vmem:[#allocation2 + $0x4] ss:$0 sm:$0xff] }
  0xaa   :  { %v175_v27 = vxor.u32 2147483648, %v174_v25  ;;  %v184_v30 = vld [vmem:[#allocation2 + $0x5] ss:$0 sm:$0xff]  ;;  %v194_v38 = vld [vmem:[#allocation2 + $0x6] ss:$0 sm:$0xff] }
  0xab   :  { %v149_v14 = vmul.f32 %v145_v13, %v121_v11  ;;  %v185_v33 = vxor.u32 2147483648, %v184_v30  ;;  %v195_v40 = vxor.u32 2147483648, %v194_v38  ;;  %v204_v47 = vld [vmem:[#allocation2 + $0x7] ss:$0 sm:$0xff] }
  0xac   :  { %v205_v50 = vxor.u32 2147483648, %v204_v47  ;;  %v83_v47 = vadd.s32 16, %v747_v3 }
  0xad   :  { %150 = vadd.xlane.f32.xlu0 %v149_v14 }
  0xae   :  { %vm89_vm10 = vcmp.ge.s32.totalorder %v83_v47, %v745_v2  ;;  %vm134_vm13 = vcmp.eq.s32.totalorder %v745_v2, %v83_v47 }
 0x13a   :  { %v151_v16 = vpop.xlane.xlu0 %150 }
 0x13b   :  { %v152_v18 = vsel %vm148_vm6, %v151_v16, %v121_v11  ;;  %vm274_vm6 = vcmp.eq.s32.totalorder %v745_v2, 12 }
 0x13c   :  { %v159_v19 = vmul.f32 %v155_v17, %v152_v18 }
 0x13e   :  { %160 = vadd.xlane.f32.xlu1 %v159_v19 }
 0x1cb   :  { %v161_v21 = vpop.xlane.xlu1 %160 }
 0x1cc   :  { %v162_v23 = vsel %vm158_vm7, %v161_v21, %v152_v18  ;;  %vm288_vm7 = vcmp.eq.s32.totalorder %v745_v2, 13 }
 0x1cd   :  { %v169_v24 = vmul.f32 %v165_v22, %v162_v23 }
 0x1cf   :  { %170 = vadd.xlane.f32.xlu1 %v169_v24 }
 0x25c   :  { %v171_v26 = vpop.xlane.xlu1 %170 }
 0x25d   :  { %v172_v28 = vsel %vm168_vm8, %v171_v26, %v162_v23  ;;  %vm84_vm8 = vcmp.eq.s32.totalorder %v83_v47, %v745_v2 }
 0x25e   :  { %v179_v29 = vmul.f32 %v175_v27, %v172_v28 }
 0x260   :  { %180 = vadd.xlane.f32.xlu0 %v179_v29 }
 0x2ed   :  { %v181_v32 = vpop.xlane.xlu0 %180 }
 0x2ee   :  { %v182_v34 = vsel %vm178_vm9, %v181_v32, %v172_v28  ;;  %vm302_vm9 = vcmp.eq.s32.totalorder %v745_v2, 14 }
 0x2ef   :  { %v189_v35 = vmul.f32 %v185_v33, %v182_v34 }
 0x2f1   :  { %190 = vadd.xlane.f32.xlu1 %v189_v35 }
 0x2f5   :  { %71 = vadd.xlane.f32.xlu1 %v70_v37 }
 0x37e   :  { %v191_v39 = vpop.xlane.xlu1 %190 }
 0x37f   :  { %v192_v41 = vsel %vm188_vm11, %v191_v39, %v182_v34  ;;  %vm90_vm11 = vmand %vm89_vm10, %vm48_vm1  ;;  %vm474_vm10 = vcmp.eq.s32.totalorder %v745_v2, 24 }
 0x380   :  { %v199_v42 = vmul.f32 %v195_v40, %v192_v41 }
 0x382   :  { %200 = vadd.xlane.f32.xlu0 %v199_v42  ;;  %v775_v43 = vpop.xlane.xlu1 %71 }
 0x383   :  { %724 = vrcp.f32 %v775_v43 }
 0x38d   :  { %v781_v45 = vpop.eup %724 }
 0x38e   :  { %v77_v46 = vmul.f32 %v781_v45, %v75_v44 }
 0x390   :  { %78 = vst [vmem:[#allocation2 + $0x8] sm:$0xff] %v77_v46 }
 0x397   :  { %v214_v48 = vld [vmem:[#allocation2 + $0x8] ss:$0 sm:$0xff]  ;;  %v228_v59 = vld [vmem:[#allocation2 + $0x9] ss:$0 sm:$0xff]  ;;  %v242_v6 = vld [vmem:[#allocation2 + $0xa] ss:$0 sm:$0xff] }
 0x398   :  { %v215_v51 = vxor.u32 2147483648, %v214_v48  ;;  %v229_v62 = vxor.u32 2147483648, %v228_v59  ;;  %v243_v10 = vxor.u32 2147483648, %v242_v6  ;;  %v256_v15 = vld [vmem:[#allocation2 + $0xb] ss:$0 sm:$0xff] }
 0x399   :  { %v257_v18 = vxor.u32 2147483648, %v256_v15  ;;  %v270_v23 = vld [vmem:[#allocation2 + $0xc] ss:$0 sm:$0xff]  ;;  %v284_v31 = vld [vmem:[#allocation2 + $0xd] ss:$0 sm:$0xff] }
 0x39a   :  { %v223_v56 = vmul.f32 %v215_v51, %v128_v54  ;;  %v271_v26 = vxor.u32 2147483648, %v270_v23  ;;  %v285_v34 = vxor.u32 2147483648, %v284_v31  ;;  %v298_v39 = vld [vmem:[#allocation2 + $0xe] ss:$0 sm:$0xff] }
 0x39b   :  { %v299_v42 = vxor.u32 2147483648, %v298_v39 }
 0x40f   :  { %v201_v49 = vpop.xlane.xlu0 %200 }
 0x410   :  { %v202_v52 = vsel %vm198_vm14, %v201_v49, %v192_v41  ;;  %vm330_vm14 = vcmp.eq.s32.totalorder %v745_v2, 16 }
 0x411   :  { %v209_v55 = vmul.f32 %v205_v50, %v202_v52 }
 0x413   :  { %210 = vadd.xlane.f32.xlu0 %v209_v55  ;;  %v312_v55 = vld [vmem:[#allocation2 + $0xf] ss:$0 sm:$0xff] }
 0x417   :  { %224 = vadd.xlane.f32.xlu0 %v223_v56 }
 0x4a0   :  { %v211_v57 = vpop.xlane.xlu0 %210 }
 0x4a1   :  { %v212_v58 = vsel %vm208_vm0, %v211_v57, %v202_v52  ;;  %v313_v57 = vxor.u32 2147483648, %v312_v55  ;;  %vm366_vm0 = vcmp.eq.s32.totalorder %v745_v2, 18 }
 0x4a2   :  { %v219_v60 = vmul.f32 %v215_v51, %v212_v58  ;;  %v39_v51 = vld [vmem:[%s884_s0 + $0x10] sm:$0xff] }
 0x4a4   :  { %v225_v61 = vpop.xlane.xlu0 %224  ;;  %220 = vadd.xlane.f32.xlu1 %v219_v60 }
 0x4a5   :  { %v226_v63 = vsel %vm218_vm2, %v225_v61, %v128_v54  ;;  %v86_v54 = vsel %vm84_vm8, %v39_v51, 0.0 }
 0x4a6   :  { %v237_v0 = vmul.f32 %v229_v62, %v226_v63 }
 0x4a8   :  { %238 = vadd.xlane.f32.xlu0 %v237_v0 }
 0x531   :  { %v221_v1 = vpop.xlane.xlu1 %220 }
 0x532   :  { %v222_v4 = vsel %vm218_vm2, %v221_v1, %v212_v58  ;;  %vm384_vm2 = vcmp.eq.s32.totalorder %v745_v2, 19 }
 0x533   :  { %v233_v8 = vmul.f32 %v229_v62, %v222_v4 }
 0x535   :  { %v239_v9 = vpop.xlane.xlu0 %238  ;;  %234 = vadd.xlane.f32.xlu1 %v233_v8 }
 0x536   :  { %v240_v11 = vsel %vm232_vm3, %v239_v9, %v226_v63  ;;  %v91_v63 = vsel %vm90_vm11, %v39_v51, 0.0  ;;  %vm496_vm11 = vcmp.eq.s32.totalorder %v745_v2, 25 }
 0x537   :  { %v251_v12 = vmul.f32 %v243_v10, %v240_v11 }
 0x539   :  { %252 = vadd.xlane.f32.xlu0 %v251_v12 }
 0x5c2   :  { %v235_v13 = vpop.xlane.xlu1 %234 }
 0x5c3   :  { %v236_v14 = vsel %vm232_vm3, %v235_v13, %v222_v4  ;;  %vm402_vm3 = vcmp.eq.s32.totalorder %v745_v2, 20 }
 0x5c4   :  { %v247_v16 = vmul.f32 %v243_v10, %v236_v14 }
 0x5c6   :  { %v253_v17 = vpop.xlane.xlu0 %252  ;;  %248 = vadd.xlane.f32.xlu1 %v247_v16 }
 0x5c7   :  { %v254_v19 = vsel %vm246_vm4, %v253_v17, %v240_v11 }
 0x5c8   :  { %v265_v20 = vmul.f32 %v257_v18, %v254_v19 }
 0x5ca   :  { %266 = vadd.xlane.f32.xlu0 %v265_v20 }
 0x653   :  { %v249_v21 = vpop.xlane.xlu1 %248 }
 0x654   :  { %v250_v22 = vsel %vm246_vm4, %v249_v21, %v236_v14  ;;  %v135_v14 = vsel %vm134_vm13, -1.0, %v731_v53  ;;  %vm420_vm4 = vcmp.eq.s32.totalorder %v745_v2, 21  ;;  %vm540_vm13 = vcmp.eq.s32.totalorder %v745_v2, 27 }
 0x655   :  { %v261_v24 = vmul.f32 %v257_v18, %v250_v22 }
 0x657   :  { %v267_v25 = vpop.xlane.xlu0 %266  ;;  %262 = vadd.xlane.f32.xlu1 %v261_v24 }
 0x658   :  { %v268_v27 = vsel %vm260_vm5, %v267_v25, %v254_v19 }
 0x659   :  { %v279_v28 = vmul.f32 %v271_v26, %v268_v27 }
 0x65b   :  { %280 = vadd.xlane.f32.xlu0 %v279_v28 }
 0x6e4   :  { %v263_v29 = vpop.xlane.xlu1 %262 }
 0x6e5   :  { %v264_v30 = vsel %vm260_vm5, %v263_v29, %v250_v22 }
 0x6e6   :  { %v275_v32 = vmul.f32 %v271_v26, %v264_v30 }
 0x6e8   :  { %v281_v33 = vpop.xlane.xlu0 %280  ;;  %276 = vadd.xlane.f32.xlu1 %v275_v32 }
 0x6e9   :  { %v282_v35 = vsel %vm274_vm6, %v281_v33, %v268_v27 }
 0x6ea   :  { %v293_v36 = vmul.f32 %v285_v34, %v282_v35 }
 0x6ec   :  { %294 = vadd.xlane.f32.xlu0 %v293_v36 }
 0x775   :  { %v277_v37 = vpop.xlane.xlu1 %276 }
 0x776   :  { %v278_v38 = vsel %vm274_vm6, %v277_v37, %v264_v30  ;;  %vm438_vm6 = vcmp.eq.s32.totalorder %v745_v2, 22 }
 0x777   :  { %v289_v40 = vmul.f32 %v285_v34, %v278_v38 }
 0x779   :  { %v295_v41 = vpop.xlane.xlu0 %294  ;;  %290 = vadd.xlane.f32.xlu1 %v289_v40 }
 0x77a   :  { %v296_v44 = vsel %vm288_vm7, %v295_v41, %v282_v35 }
 0x77b   :  { %v307_v46 = vmul.f32 %v299_v42, %v296_v44 }
 0x77d   :  { %308 = vadd.xlane.f32.xlu0 %v307_v46 }
 0x806   :  { %v291_v48 = vpop.xlane.xlu1 %290 }
 0x807   :  { %v292_v49 = vsel %vm288_vm7, %v291_v48, %v278_v38 }
 0x808   :  { %v303_v50 = vmul.f32 %v299_v42, %v292_v49 }
 0x80a   :  { %v309_v52 = vpop.xlane.xlu0 %308  ;;  %304 = vadd.xlane.f32.xlu1 %v303_v50 }
 0x80b   :  { %v310_v56 = vsel %vm302_vm9, %v309_v52, %v296_v44 }
 0x80c   :  { %v321_v58 = vmul.f32 %v313_v57, %v310_v56 }
 0x80e   :  { %87 = vadd.xlane.f32.xlu1 %v86_v54 }
 0x812   :  { %322 = vadd.xlane.f32.xlu1 %v321_v58 }
 0x897   :  { %v305_v59 = vpop.xlane.xlu1 %304 }
 0x898   :  { %v306_v60 = vsel %vm302_vm9, %v305_v59, %v292_v49 }
 0x899   :  { %v317_v61 = vmul.f32 %v313_v57, %v306_v60 }
 0x89b   :  { %318 = vadd.xlane.f32.xlu0 %v317_v61  ;;  %v800_v62 = vpop.xlane.xlu1 %87 }
 0x89c   :  { %726 = vrcp.f32 %v800_v62 }
 0x89f   :  { %v323_v4 = vpop.xlane.xlu1 %322 }
 0x8a0   :  { %v324_v9 = vsel %vm316_vm12, %v323_v4, %v310_v56 }
 0x8a6   :  { %v806_v0 = vpop.eup %726 }
 0x8a7   :  { %v93_v1 = vmul.f32 %v806_v0, %v91_v63 }
 0x8a9   :  { %94 = vst [vmem:[#allocation2 + $0x10] sm:$0xff] %v93_v1 }
 0x8b0   :  { %v326_v6 = vld [vmem:[#allocation2 + $0x10] ss:$0 sm:$0xff]  ;;  %v344_v16 = vld [vmem:[#allocation2 + $0x11] ss:$0 sm:$0xff]  ;;  %v362_v27 = vld [vmem:[#allocation2 + $0x12] ss:$0 sm:$0xff] }
 0x8b1   :  { %v327_v8 = vxor.u32 2147483648, %v326_v6  ;;  %v345_v18 = vxor.u32 2147483648, %v344_v16  ;;  %v363_v29 = vxor.u32 2147483648, %v362_v27  ;;  %v380_v38 = vld [vmem:[#allocation2 + $0x13] ss:$0 sm:$0xff] }
 0x8b2   :  { %v381_v40 = vxor.u32 2147483648, %v380_v38  ;;  %v398_v51 = vld [vmem:[#allocation2 + $0x14] ss:$0 sm:$0xff]  ;;  %v416_v1 = vld [vmem:[#allocation2 + $0x15] ss:$0 sm:$0xff] }
 0x8b3   :  { %v335_v10 = vmul.f32 %v327_v8, %v324_v9  ;;  %v339_v15 = vmul.f32 %v327_v8, %v135_v14  ;;  %v399_v54 = vxor.u32 2147483648, %v398_v51  ;;  %v417_v6 = vxor.u32 2147483648, %v416_v1  ;;  %v434_v16 = vld [vmem:[#allocation2 + $0x16] ss:$0 sm:$0xff] }
 0x8b5   :  { %336 = vadd.xlane.f32.xlu1 %v335_v10 }
 0x928   :  { %v319_v11 = vpop.xlane.xlu0 %318 }
 0x929   :  { %v320_v12 = vsel %vm316_vm12, %v319_v11, %v306_v60  ;;  %vm518_vm12 = vcmp.eq.s32.totalorder %v745_v2, 26 }
 0x92a   :  { %v331_v13 = vmul.f32 %v327_v8, %v320_v12 }
 0x92c   :  { %332 = vadd.xlane.f32.xlu0 %v331_v13 }
 0x930   :  { %340 = vadd.xlane.f32.xlu0 %v339_v15 }
 0x942   :  { %v337_v17 = vpop.xlane.xlu1 %336 }
 0x943   :  { %v338_v19 = vsel %vm330_vm14, %v337_v17, %v324_v9  ;;  %v99_v17 = vadd.s32 24, %v747_v3 }
 0x944   :  { %v353_v20 = vmul.f32 %v345_v18, %v338_v19 }
 0x945   :  { %vm100_vm5 = vcmp.eq.s32.totalorder %v99_v17, %v745_v2  ;;  %vm105_vm7 = vcmp.ge.s32.totalorder %v99_v17, %v745_v2  ;;  %vm141_vm9 = vcmp.eq.s32.totalorder %v745_v2, %v99_v17 }
 0x946   :  { %354 = vadd.xlane.f32.xlu0 %v353_v20  ;;  %vm106_vm8 = vmand %vm105_vm7, %vm48_vm1  ;;  %vm456_vm1 = vcmp.eq.s32.totalorder %v745_v2, 23 }
 0x9b9   :  { %v333_v21 = vpop.xlane.xlu0 %332 }
 0x9ba   :  { %v334_v22 = vsel %vm330_vm14, %v333_v21, %v320_v12 }
 0x9bb   :  { %v349_v23 = vmul.f32 %v345_v18, %v334_v22 }
 0x9bd   :  { %v341_v24 = vpop.xlane.xlu0 %340  ;;  %350 = vadd.xlane.f32.xlu1 %v349_v23 }
 0x9be   :  { %v342_v25 = vsel %vm330_vm14, %v341_v24, %v135_v14  ;;  %vm562_vm14 = vcmp.eq.s32.totalorder %v745_v2, 28 }
 0x9bf   :  { %v357_v26 = vmul.f32 %v345_v18, %v342_v25 }
 0x9c1   :  { %358 = vadd.xlane.f32.xlu1 %v357_v26 }
 0x9d3   :  { %v355_v28 = vpop.xlane.xlu0 %354 }
 0x9d4   :  { %v356_v30 = vsel %vm348_vm15, %v355_v28, %v338_v19  ;;  %v435_v19 = vxor.u32 2147483648, %v434_v16 }
 0x9d5   :  { %v371_v31 = vmul.f32 %v363_v29, %v356_v30 }
 0x9d7   :  { %372 = vadd.xlane.f32.xlu1 %v371_v31 }
 0xa4a   :  { %v351_v32 = vpop.xlane.xlu1 %350 }
 0xa4b   :  { %v352_v33 = vsel %vm348_vm15, %v351_v32, %v334_v22  ;;  %v41_v22 = vld [vmem:[%s884_s0 + $0x18] sm:$0xff] }
 0xa4c   :  { %v367_v34 = vmul.f32 %v363_v29, %v352_v33  ;;  %v102_v23 = vsel %vm100_vm5, %v41_v22, 0.0  ;;  %vm647_vm5 = vweird.f32 %v751_v5 }
 0xa4e   :  { %368 = vadd.xlane.f32.xlu0 %v367_v34  ;;  %v359_v35 = vpop.xlane.xlu1 %358 }
 0xa4f   :  { %v360_v36 = vsel %vm348_vm15, %v359_v35, %v342_v25  ;;  %v107_v35 = vsel %vm106_vm8, %v41_v22, 0.0  ;;  %vm584_vm15 = vcmp.eq.s32.totalorder %v745_v2, 29 }
 0xa50   :  { %v375_v37 = vmul.f32 %v363_v29, %v360_v36  ;;  %v452_v29 = vld [vmem:[#allocation2 + $0x17] ss:$0 sm:$0xff] }
 0xa51   :  { %v453_v31 = vxor.u32 2147483648, %v452_v29 }
 0xa52   :  { %376 = vadd.xlane.f32.xlu0 %v375_v37 }
 0xa64   :  { %v373_v39 = vpop.xlane.xlu1 %372 }
 0xa65   :  { %v374_v41 = vsel %vm366_vm0, %v373_v39, %v356_v30 }
 0xa66   :  { %v389_v42 = vmul.f32 %v381_v40, %v374_v41 }
 0xa68   :  { %390 = vadd.xlane.f32.xlu0 %v389_v42 }
 0xadb   :  { %v369_v44 = vpop.xlane.xlu0 %368 }
 0xadc   :  { %v370_v46 = vsel %vm366_vm0, %v369_v44, %v352_v33 }
 0xadd   :  { %v385_v47 = vmul.f32 %v381_v40, %v370_v46 }
 0xadf   :  { %386 = vadd.xlane.f32.xlu1 %v385_v47  ;;  %v377_v48 = vpop.xlane.xlu0 %376 }
 0xae0   :  { %v378_v49 = vsel %vm366_vm0, %v377_v48, %v360_v36  ;;  %vm606_vm0 = vcmp.eq.s32.totalorder %v745_v2, 30 }
 0xae1   :  { %v393_v50 = vmul.f32 %v381_v40, %v378_v49 }
 0xae3   :  { %394 = vadd.xlane.f32.xlu1 %v393_v50  ;;  %v142_v50 = vsel %vm141_vm9, -1.0, %v731_v53 }
 0xaf5   :  { %v391_v52 = vpop.xlane.xlu0 %390 }
 0xaf6   :  { %v392_v55 = vsel %vm384_vm2, %v391_v52, %v374_v41 }
 0xaf7   :  { %v407_v56 = vmul.f32 %v399_v54, %v392_v55 }
 0xaf9   :  { %408 = vadd.xlane.f32.xlu1 %v407_v56 }
 0xb6c   :  { %v387_v57 = vpop.xlane.xlu1 %386 }
 0xb6d   :  { %v388_v58 = vsel %vm384_vm2, %v387_v57, %v370_v46 }
 0xb6e   :  { %v403_v59 = vmul.f32 %v399_v54, %v388_v58 }
 0xb70   :  { %404 = vadd.xlane.f32.xlu0 %v403_v59  ;;  %v395_v60 = vpop.xlane.xlu1 %394 }
 0xb71   :  { %v396_v61 = vsel %vm384_vm2, %v395_v60, %v378_v49  ;;  %vm628_vm2 = vcmp.eq.s32.totalorder %v745_v2, 31 }
 0xb72   :  { %v411_v63 = vmul.f32 %v399_v54, %v396_v61 }
 0xb74   :  { %412 = vadd.xlane.f32.xlu0 %v411_v63 }
 0xb86   :  { %v409_v4 = vpop.xlane.xlu1 %408 }
 0xb87   :  { %v410_v8 = vsel %vm402_vm3, %v409_v4, %v392_v55 }
 0xb88   :  { %v425_v9 = vmul.f32 %v417_v6, %v410_v8 }
 0xb8a   :  { %426 = vadd.xlane.f32.xlu0 %v425_v9 }
 0xbfd   :  { %v405_v10 = vpop.xlane.xlu0 %404 }
 0xbfe   :  { %v406_v11 = vsel %vm402_vm3, %v405_v10, %v388_v58 }
 0xbff   :  { %v421_v12 = vmul.f32 %v417_v6, %v406_v11 }
 0xc01   :  { %422 = vadd.xlane.f32.xlu1 %v421_v12  ;;  %v413_v13 = vpop.xlane.xlu0 %412 }
 0xc02   :  { %v414_v14 = vsel %vm402_vm3, %v413_v13, %v396_v61  ;;  %vm652_vm3 = vweird.f32 %v775_v43 }
 0xc03   :  { %v429_v15 = vmul.f32 %v417_v6, %v414_v14 }
 0xc05   :  { %430 = vadd.xlane.f32.xlu1 %v429_v15 }
 0xc17   :  { %v427_v18 = vpop.xlane.xlu0 %426 }
 0xc18   :  { %v428_v20 = vsel %vm420_vm4, %v427_v18, %v410_v8 }
 0xc19   :  { %v443_v21 = vmul.f32 %v435_v19, %v428_v20 }
 0xc1b   :  { %444 = vadd.xlane.f32.xlu1 %v443_v21 }
 0xc1f   :  { %103 = vadd.xlane.f32.xlu1 %v102_v23 }
 0xc8e   :  { %v423_v24 = vpop.xlane.xlu1 %422 }
 0xc8f   :  { %v424_v25 = vsel %vm420_vm4, %v423_v24, %v406_v11 }
 0xc90   :  { %v439_v3 = vmul.f32 %v435_v19, %v424_v25 }
 0xc92   :  { %440 = vadd.xlane.f32.xlu0 %v439_v3  ;;  %v431_v26 = vpop.xlane.xlu1 %430 }
 0xc93   :  { %v432_v27 = vsel %vm420_vm4, %v431_v26, %v414_v14 }
 0xc94   :  { %v447_v28 = vmul.f32 %v435_v19, %v432_v27 }
 0xc96   :  { %448 = vadd.xlane.f32.xlu0 %v447_v28 }
 0xca8   :  { %v445_v30 = vpop.xlane.xlu1 %444 }
 0xca9   :  { %v446_v32 = vsel %vm438_vm6, %v445_v30, %v428_v20 }
 0xcaa   :  { %v461_v33 = vmul.f32 %v453_v31, %v446_v32 }
 0xcac   :  { %462 = vadd.xlane.f32.xlu1 %v461_v33  ;;  %v832_v34 = vpop.xlane.xlu1 %103 }
 0xcad   :  { %728 = vrcp.f32 %v832_v34  ;;  %vm664_vm4 = vweird.f32 %v832_v34 }
 0xcb7   :  { %v838_v36 = vpop.eup %728 }
 0xcb8   :  { %v109_v37 = vmul.f32 %v838_v36, %v107_v35 }
 0xcba   :  { %110 = vst [vmem:[#allocation2 + $0x18] sm:$0xff] %v109_v37 }
 0xcc1   :  { %v470_v46 = vld [vmem:[#allocation2 + $0x18] ss:$0 sm:$0xff]  ;;  %v492_v60 = vld [vmem:[#allocation2 + $0x19] ss:$0 sm:$0xff]  ;;  %v514_v15 = vld [vmem:[#allocation2 + $0x1a] ss:$0 sm:$0xff] }
 0xcc2   :  { %v471_v47 = vxor.u32 2147483648, %v470_v46  ;;  %v493_v63 = vxor.u32 2147483648, %v492_v60  ;;  %v515_v17 = vxor.u32 2147483648, %v514_v15  ;;  %v536_v28 = vld [vmem:[#allocation2 + $0x1b] ss:$0 sm:$0xff] }
 0xcc3   :  { %v537_v30 = vxor.u32 2147483648, %v536_v28  ;;  %v558_v46 = vld [vmem:[#allocation2 + $0x1c] ss:$0 sm:$0xff] }
 0xcc4   :  { %v487_v52 = vmul.f32 %v471_v47, %v142_v50 }
 0xd1f   :  { %v441_v38 = vpop.xlane.xlu0 %440 }
 0xd20   :  { %v442_v39 = vsel %vm438_vm6, %v441_v38, %v424_v25 }
 0xd21   :  { %v457_v40 = vmul.f32 %v453_v31, %v442_v39 }
 0xd23   :  { %458 = vadd.xlane.f32.xlu0 %v457_v40  ;;  %v449_v41 = vpop.xlane.xlu0 %448 }
 0xd24   :  { %v450_v42 = vsel %vm438_vm6, %v449_v41, %v432_v27  ;;  %vm658_vm6 = vweird.f32 %v800_v62 }
 0xd25   :  { %v465_v44 = vmul.f32 %v453_v31, %v450_v42 }
 0xd27   :  { %466 = vadd.xlane.f32.xlu0 %v465_v44 }
 0xd39   :  { %v463_v48 = vpop.xlane.xlu1 %462 }
 0xd3a   :  { %v464_v49 = vsel %vm456_vm1, %v463_v48, %v446_v32  ;;  %v559_v48 = vxor.u32 2147483648, %v558_v46 }
 0xd3b   :  { %v479_v51 = vmul.f32 %v471_v47, %v464_v49 }
 0xd3d   :  { %480 = vadd.xlane.f32.xlu0 %v479_v51 }
 0xd41   :  { %488 = vadd.xlane.f32.xlu0 %v487_v52 }
 0xdb0   :  { %v459_v54 = vpop.xlane.xlu0 %458 }
 0xdb1   :  { %v460_v55 = vsel %vm456_vm1, %v459_v54, %v442_v39 }
 0xdb2   :  { %v475_v56 = vmul.f32 %v471_v47, %v460_v55 }
 0xdb4   :  { %v467_v57 = vpop.xlane.xlu0 %466  ;;  %476 = vadd.xlane.f32.xlu1 %v475_v56 }
 0xdb5   :  { %v468_v58 = vsel %vm456_vm1, %v467_v57, %v450_v42 }
 0xdb6   :  { %v483_v59 = vmul.f32 %v471_v47, %v468_v58 }
 0xdb8   :  { %484 = vadd.xlane.f32.xlu1 %v483_v59 }
 0xdca   :  { %v481_v61 = vpop.xlane.xlu0 %480 }
 0xdcb   :  { %v482_v1 = vsel %vm474_vm10, %v481_v61, %v464_v49  ;;  %v580_v61 = vld [vmem:[#allocation2 + $0x1d] ss:$0 sm:$0xff] }
 0xdcc   :  { %v501_v4 = vmul.f32 %v493_v63, %v482_v1 }
 0xdce   :  { %502 = vadd.xlane.f32.xlu0 %v501_v4  ;;  %v489_v53 = vpop.xlane.xlu0 %488 }
 0xdcf   :  { %v490_v6 = vsel %vm474_vm10, %v489_v53, %v142_v50 }
 0xdd0   :  { %v509_v8 = vmul.f32 %v493_v63, %v490_v6 }
 0xdd2   :  { %510 = vadd.xlane.f32.xlu0 %v509_v8 }
 0xe41   :  { %v477_v9 = vpop.xlane.xlu1 %476 }
 0xe42   :  { %v478_v10 = vsel %vm474_vm10, %v477_v9, %v460_v55 }
 0xe43   :  { %v497_v11 = vmul.f32 %v493_v63, %v478_v10 }
 0xe45   :  { %498 = vadd.xlane.f32.xlu1 %v497_v11  ;;  %v485_v12 = vpop.xlane.xlu1 %484 }
 0xe46   :  { %v486_v13 = vsel %vm474_vm10, %v485_v12, %v468_v58 }
 0xe47   :  { %v505_v14 = vmul.f32 %v493_v63, %v486_v13 }
 0xe49   :  { %506 = vadd.xlane.f32.xlu1 %v505_v14 }
 0xe5b   :  { %v503_v16 = vpop.xlane.xlu0 %502 }
 0xe5c   :  { %v504_v18 = vsel %vm496_vm11, %v503_v16, %v482_v1  ;;  %v581_v1 = vxor.u32 2147483648, %v580_v61  ;;  %v602_v16 = vld [vmem:[#allocation2 + $0x1e] ss:$0 sm:$0xff] }
 0xe5d   :  { %v523_v19 = vmul.f32 %v515_v17, %v504_v18 }
 0xe5f   :  { %524 = vadd.xlane.f32.xlu0 %v523_v19  ;;  %v511_v20 = vpop.xlane.xlu0 %510 }
 0xe60   :  { %v512_v21 = vsel %vm496_vm11, %v511_v20, %v490_v6 }
 0xe61   :  { %v531_v22 = vmul.f32 %v515_v17, %v512_v21 }
 0xe63   :  { %532 = vadd.xlane.f32.xlu0 %v531_v22 }
 0xed2   :  { %v499_v23 = vpop.xlane.xlu1 %498 }
 0xed3   :  { %v500_v24 = vsel %vm496_vm11, %v499_v23, %v478_v10 }
 0xed4   :  { %v519_v25 = vmul.f32 %v515_v17, %v500_v24 }
 0xed6   :  { %520 = vadd.xlane.f32.xlu1 %v519_v25  ;;  %v507_v3 = vpop.xlane.xlu1 %506 }
 0xed7   :  { %v508_v26 = vsel %vm496_vm11, %v507_v3, %v486_v13 }
 0xed8   :  { %v527_v27 = vmul.f32 %v515_v17, %v508_v26 }
 0xeda   :  { %528 = vadd.xlane.f32.xlu1 %v527_v27 }
 0xeec   :  { %v525_v29 = vpop.xlane.xlu0 %524 }
 0xeed   :  { %v526_v31 = vsel %vm518_vm12, %v525_v29, %v504_v18  ;;  %v603_v18 = vxor.u32 2147483648, %v602_v16  ;;  %v624_v29 = vld [vmem:[#allocation2 + $0x1f] ss:$0 sm:$0xff] }
 0xeee   :  { %v545_v32 = vmul.f32 %v537_v30, %v526_v31 }
 0xef0   :  { %546 = vadd.xlane.f32.xlu0 %v545_v32  ;;  %v533_v33 = vpop.xlane.xlu0 %532 }
 0xef1   :  { %v534_v35 = vsel %vm518_vm12, %v533_v33, %v512_v21 }
 0xef2   :  { %v553_v37 = vmul.f32 %v537_v30, %v534_v35 }
 0xef4   :  { %554 = vadd.xlane.f32.xlu0 %v553_v37 }
 0xf63   :  { %v521_v38 = vpop.xlane.xlu1 %520 }
 0xf64   :  { %v522_v39 = vsel %vm518_vm12, %v521_v38, %v500_v24 }
 0xf65   :  { %v541_v40 = vmul.f32 %v537_v30, %v522_v39 }
 0xf67   :  { %542 = vadd.xlane.f32.xlu1 %v541_v40  ;;  %v529_v41 = vpop.xlane.xlu1 %528 }
 0xf68   :  { %v530_v42 = vsel %vm518_vm12, %v529_v41, %v508_v26 }
 0xf69   :  { %v549_v44 = vmul.f32 %v537_v30, %v530_v42 }
 0xf6b   :  { %550 = vadd.xlane.f32.xlu1 %v549_v44 }
 0xf7d   :  { %v547_v47 = vpop.xlane.xlu0 %546 }
 0xf7e   :  { %v548_v49 = vsel %vm540_vm13, %v547_v47, %v526_v31  ;;  %v625_v31 = vxor.u32 2147483648, %v624_v29 }
 0xf7f   :  { %v567_v50 = vmul.f32 %v559_v48, %v548_v49 }
 0xf81   :  { %568 = vadd.xlane.f32.xlu0 %v567_v50  ;;  %v555_v51 = vpop.xlane.xlu0 %554 }
 0xf82   :  { %v556_v52 = vsel %vm540_vm13, %v555_v51, %v534_v35 }
 0xf83   :  { %v575_v54 = vmul.f32 %v559_v48, %v556_v52 }
 0xf85   :  { %576 = vadd.xlane.f32.xlu0 %v575_v54 }
 0xff4   :  { %v543_v55 = vpop.xlane.xlu1 %542 }
 0xff5   :  { %v544_v56 = vsel %vm540_vm13, %v543_v55, %v522_v39 }
 0xff6   :  { %v563_v57 = vmul.f32 %v559_v48, %v544_v56 }
 0xff8   :  { %564 = vadd.xlane.f32.xlu1 %v563_v57  ;;  %v551_v58 = vpop.xlane.xlu1 %550 }
 0xff9   :  { %v552_v59 = vsel %vm540_vm13, %v551_v58, %v530_v42 }
 0xffa   :  { %v571_v60 = vmul.f32 %v559_v48, %v552_v59 }
 0xffc   :  { %572 = vadd.xlane.f32.xlu1 %v571_v60 }
0x100e   :  { %v569_v63 = vpop.xlane.xlu0 %568 }
0x100f   :  { %v570_v4 = vsel %vm562_vm14, %v569_v63, %v548_v49 }
0x1010   :  { %v589_v53 = vmul.f32 %v581_v1, %v570_v4 }
0x1012   :  { %590 = vadd.xlane.f32.xlu0 %v589_v53  ;;  %v577_v6 = vpop.xlane.xlu0 %576 }
0x1013   :  { %v578_v8 = vsel %vm562_vm14, %v577_v6, %v556_v52 }
0x1014   :  { %v597_v9 = vmul.f32 %v581_v1, %v578_v8 }
0x1016   :  { %598 = vadd.xlane.f32.xlu0 %v597_v9 }
0x1085   :  { %v565_v10 = vpop.xlane.xlu1 %564 }
0x1086   :  { %v566_v11 = vsel %vm562_vm14, %v565_v10, %v544_v56 }
0x1087   :  { %v585_v12 = vmul.f32 %v581_v1, %v566_v11 }
0x1089   :  { %586 = vadd.xlane.f32.xlu1 %v585_v12  ;;  %v573_v13 = vpop.xlane.xlu1 %572 }
0x108a   :  { %v574_v14 = vsel %vm562_vm14, %v573_v13, %v552_v59 }
0x108b   :  { %v593_v15 = vmul.f32 %v581_v1, %v574_v14 }
0x108d   :  { %594 = vadd.xlane.f32.xlu1 %v593_v15 }
0x109f   :  { %v591_v17 = vpop.xlane.xlu0 %590 }
0x10a0   :  { %v592_v19 = vsel %vm584_vm15, %v591_v17, %v570_v4 }
0x10a1   :  { %v611_v20 = vmul.f32 %v603_v18, %v592_v19 }
0x10a3   :  { %612 = vadd.xlane.f32.xlu0 %v611_v20  ;;  %v599_v21 = vpop.xlane.xlu0 %598 }
0x10a4   :  { %v600_v22 = vsel %vm584_vm15, %v599_v21, %v578_v8 }
0x10a5   :  { %v619_v23 = vmul.f32 %v603_v18, %v600_v22 }
0x10a7   :  { %620 = vadd.xlane.f32.xlu0 %v619_v23 }
0x1116   :  { %v587_v24 = vpop.xlane.xlu1 %586 }
0x1117   :  { %v588_v25 = vsel %vm584_vm15, %v587_v24, %v566_v11 }
0x1118   :  { %v607_v3 = vmul.f32 %v603_v18, %v588_v25 }
0x111a   :  { %608 = vadd.xlane.f32.xlu1 %v607_v3  ;;  %v595_v26 = vpop.xlane.xlu1 %594 }
0x111b   :  { %v596_v27 = vsel %vm584_vm15, %v595_v26, %v574_v14 }
0x111c   :  { %v615_v28 = vmul.f32 %v603_v18, %v596_v27 }
0x111e   :  { %616 = vadd.xlane.f32.xlu1 %v615_v28 }
0x1130   :  { %v613_v30 = vpop.xlane.xlu0 %612 }
0x1131   :  { %v614_v32 = vsel %vm606_vm0, %v613_v30, %v592_v19 }
0x1132   :  { %v633_v33 = vmul.f32 %v625_v31, %v614_v32 }
0x1134   :  { %634 = vadd.xlane.f32.xlu0 %v633_v33  ;;  %v621_v35 = vpop.xlane.xlu0 %620 }
0x1135   :  { %v622_v37 = vsel %vm606_vm0, %v621_v35, %v600_v22 }
0x1136   :  { %v641_v38 = vmul.f32 %v625_v31, %v622_v37 }
0x1138   :  { %642 = vadd.xlane.f32.xlu0 %v641_v38 }
0x11a7   :  { %v609_v39 = vpop.xlane.xlu1 %608 }
0x11a8   :  { %v610_v40 = vsel %vm606_vm0, %v609_v39, %v588_v25 }
0x11a9   :  { %v629_v41 = vmul.f32 %v625_v31, %v610_v40 }
0x11ab   :  { %630 = vadd.xlane.f32.xlu1 %v629_v41  ;;  %v617_v42 = vpop.xlane.xlu1 %616 }
0x11ac   :  { %v618_v44 = vsel %vm606_vm0, %v617_v42, %v596_v27 }
0x11ad   :  { %v637_v46 = vmul.f32 %v625_v31, %v618_v44 }
0x11af   :  { %638 = vadd.xlane.f32.xlu1 %v637_v46 }
0x11c1   :  { %v635_v47 = vpop.xlane.xlu0 %634 }
0x11c2   :  { %v636_v48 = vsel %vm628_vm2, %v635_v47, %v614_v32 }
0x11c3   :  { %v651_v49 = vmul.f32 %v781_v45, %v636_v48 }
0x11c5   :  { %v653_v50 = vsel %vm652_vm3, %v636_v48, %v651_v49  ;;  %v643_v51 = vpop.xlane.xlu0 %642 }
0x11c6   :  { %704 = vst [vmem:[%s885_s1 + $0x8] sm:$0xff] %v653_v50  ;;  %v644_v52 = vsel %vm628_vm2, %v643_v51, %v622_v37 }
0x11c7   :  { %v663_v54 = vmul.f32 %v838_v36, %v644_v52 }
0x11c9   :  { %v665_v55 = vsel %vm664_vm4, %v644_v52, %v663_v54 }
0x11ca   :  { %708 = vst [vmem:[%s885_s1 + $0x18] sm:$0xff] %v665_v55 }
0x1238   :  { %v631_v45 = vpop.xlane.xlu1 %630 }
0x1239   :  { %v632_v43 = vsel %vm628_vm2, %v631_v45, %v610_v40 }
0x123a   :  { %v646_v56 = vmul.f32 %v759_v7, %v632_v43 }
0x123c   :  { %v648_v57 = vsel %vm647_vm5, %v632_v43, %v646_v56  ;;  %v639_v58 = vpop.xlane.xlu1 %638 }
0x123d   :  { %702 = vst [vmem:[%s885_s1] sm:$0xff] %v648_v57  ;;  %v640_v34 = vsel %vm628_vm2, %v639_v58, %v618_v44 }
0x123e   :  { %v657_v36 = vmul.f32 %v806_v0, %v640_v34 }
0x1240   :  { %v659_v59 = vsel %vm658_vm6, %v640_v34, %v657_v36 }
0x1241   :  { %706 = vst [vmem:[%s885_s1 + $0x10] sm:$0xff] %v659_v59 }

// kernel: custom-call.12
= control target key start
LH: loop header
LB: loop body
LE: loop exit
PB: predicated region body
PF: predicated region fallthrough
CT: control target
= control target key end

     0   :  { %v46_v0 = vlaneseq  ;;  %v729_v10 = vmov -1.0   ;;  %v730_v48 = vmov 0.0   ;;  %s1003_s0 = inlined_call_operand.vmem [shape: f32[1,32,32], index: 0, kind: input, shape index: {}]   ;;  %s1004_s1 = inlined_call_operand.vmem [shape: f32[1,32,32], index: 1, kind: output, shape index: {}]  }
   0x1   :  { %v41_v3 = vld [vmem:[%s1003_s0 + $0x18] sm:$0xff]  ;;  %v39_v37 = vld [vmem:[%s1003_s0 + $0x10] sm:$0xff] }
   0x2   :  { %v741_v1 = vand.u32 127, %v46_v0  ;;  %v743_v2 = vshrl.u32 %v46_v0, 7 }
   0x4   :  { %vm48_vm0 = vcmp.lt.s32.totalorder %v741_v1, 32  ;;  %v99_v4 = vadd.s32 24, %v743_v2  ;;  %vm140_vm4 = vcmp.eq.s32.totalorder %v741_v1, 31  ;;  %vm148_vm6 = vcmp.eq.s32.totalorder %v741_v1, 30 }
   0x5   :  { %v141_v11 = vsel %vm140_vm4, 1.0, %v729_v10  ;;  %vm158_vm7 = vcmp.eq.s32.totalorder %v741_v1, 29  ;;  %vm168_vm8 = vcmp.eq.s32.totalorder %v741_v1, 28  ;;  %vm178_vm9 = vcmp.eq.s32.totalorder %v741_v1, 27 }
   0x6   :  { %vm100_vm1 = vcmp.eq.s32.totalorder %v99_v4, %v741_v1  ;;  %vm105_vm2 = vcmp.le.s32.totalorder %v99_v4, %v741_v1  ;;  %vm137_vm5 = vcmp.eq.s32.totalorder %v741_v1, %v99_v4  ;;  %v83_v32 = vadd.s32 16, %v743_v2 }
   0x7   :  { %v102_v5 = vsel %vm100_vm1, %v41_v3, 0.0  ;;  %vm106_vm3 = vmand %vm105_vm2, %vm48_vm0  ;;  %v142_v12 = vsel %vm137_vm5, %v141_v11, 0.0  ;;  %vm188_vm11 = vcmp.eq.s32.totalorder %v741_v1, 26  ;;  %vm198_vm15 = vcmp.eq.s32.totalorder %v741_v1, 25 }
   0x8   :  { %v107_v6 = vsel %vm106_vm3, %v41_v3, 0.0  ;;  %103 = vadd.xlane.f32.xlu0 %v102_v5  ;;  %vm84_vm10 = vcmp.eq.s32.totalorder %v83_v32, %v741_v1  ;;  %vm89_vm12 = vcmp.le.s32.totalorder %v83_v32, %v741_v1  ;;  %vm130_vm14 = vcmp.eq.s32.totalorder %v741_v1, %v83_v32 }
   0x9   :  { %v86_v38 = vsel %vm84_vm10, %v39_v37, 0.0  ;;  %vm90_vm13 = vmand %vm89_vm12, %vm48_vm0  ;;  %v131_v49 = vsel %vm130_vm14, -1.0, %v730_v48  ;;  %vm218_vm1 = vcmp.eq.s32.totalorder %v741_v1, 23  ;;  %vm208_vm2 = vcmp.eq.s32.totalorder %v741_v1, 24 }
   0xa   :  { %v91_v45 = vsel %vm90_vm13, %v39_v37, 0.0  ;;  %vm232_vm3 = vcmp.eq.s32.totalorder %v741_v1, 22  ;;  %vm246_vm4 = vcmp.eq.s32.totalorder %v741_v1, 21  ;;  %vm260_vm5 = vcmp.eq.s32.totalorder %v741_v1, 20 }
   0xb   :  { %vm316_vm13 = vcmp.eq.s32.totalorder %v741_v1, 16  ;;  %vm330_vm14 = vcmp.eq.s32.totalorder %v741_v1, 15 }
  0x95   :  { %v754_v7 = vpop.xlane.xlu0 %103 }
  0x96   :  { %721 = vrcp.f32 %v754_v7 }
  0xa0   :  { %v757_v8 = vpop.eup %721 }
  0xa1   :  { %v109_v9 = vmul.f32 %v757_v8, %v107_v6 }
  0xa3   :  { %110 = vst [vmem:[#allocation2 + $0x18] sm:$0xff] %v109_v9 }
  0xaa   :  { %v144_v13 = vld [vmem:[#allocation2 + $0x1e] ss:$0 sm:$0xff]  ;;  %v154_v16 = vld [vmem:[#allocation2 + $0x1d] ss:$0 sm:$0xff]  ;;  %v164_v21 = vld [vmem:[#allocation2 + $0x1c] ss:$0 sm:$0xff] }
  0xab   :  { %v145_v14 = vxor.u32 2147483648, %v144_v13  ;;  %v155_v18 = vxor.u32 2147483648, %v154_v16  ;;  %v165_v23 = vxor.u32 2147483648, %v164_v21  ;;  %v174_v26 = vld [vmem:[#allocation2 + $0x1b] ss:$0 sm:$0xff] }
  0xac   :  { %v175_v28 = vxor.u32 2147483648, %v174_v26  ;;  %v184_v31 = vld [vmem:[#allocation2 + $0x1a] ss:$0 sm:$0xff]  ;;  %v194_v39 = vld [vmem:[#allocation2 + $0x19] ss:$0 sm:$0xff] }
  0xad   :  { %v149_v15 = vmul.f32 %v145_v14, %v142_v12  ;;  %v185_v34 = vxor.u32 2147483648, %v184_v31  ;;  %v195_v41 = vxor.u32 2147483648, %v194_v39  ;;  %v204_v53 = vld [vmem:[#allocation2 + $0x18] ss:$0 sm:$0xff]  ;;  %v67_v39 = vadd.s32 8, %v743_v2 }
  0xae   :  { %v205_v55 = vxor.u32 2147483648, %v204_v53 }
  0xaf   :  { %150 = vadd.xlane.f32.xlu0 %v149_v15  ;;  %vm123_vm12 = vcmp.eq.s32.totalorder %v741_v1, %v67_v39 }
 0x13c   :  { %v151_v17 = vpop.xlane.xlu0 %150 }
 0x13d   :  { %v152_v19 = vsel %vm148_vm6, %v151_v17, %v142_v12  ;;  %vm274_vm6 = vcmp.eq.s32.totalorder %v741_v1, 19 }
 0x13e   :  { %v159_v20 = vmul.f32 %v155_v18, %v152_v19 }
 0x140   :  { %160 = vadd.xlane.f32.xlu1 %v159_v20 }
 0x1cd   :  { %v161_v22 = vpop.xlane.xlu1 %160 }
 0x1ce   :  { %v162_v24 = vsel %vm158_vm7, %v161_v22, %v152_v19  ;;  %vm288_vm7 = vcmp.eq.s32.totalorder %v741_v1, 18 }
 0x1cf   :  { %v169_v25 = vmul.f32 %v165_v23, %v162_v24 }
 0x1d1   :  { %170 = vadd.xlane.f32.xlu1 %v169_v25 }
 0x25e   :  { %v171_v27 = vpop.xlane.xlu1 %170 }
 0x25f   :  { %v172_v29 = vsel %vm168_vm8, %v171_v27, %v162_v24  ;;  %vm68_vm8 = vcmp.eq.s32.totalorder %v67_v39, %v741_v1 }
 0x260   :  { %v179_v30 = vmul.f32 %v175_v28, %v172_v29 }
 0x262   :  { %180 = vadd.xlane.f32.xlu0 %v179_v30 }
 0x2ef   :  { %v181_v33 = vpop.xlane.xlu0 %180 }
 0x2f0   :  { %v182_v35 = vsel %vm178_vm9, %v181_v33, %v172_v29  ;;  %vm73_vm9 = vcmp.le.s32.totalorder %v67_v39, %v741_v1 }
 0x2f1   :  { %v189_v36 = vmul.f32 %v185_v34, %v182_v35  ;;  %vm74_vm10 = vmand %vm73_vm9, %vm48_vm0  ;;  %vm116_vm9 = vcmp.eq.s32.totalorder %v741_v1, %v743_v2 }
 0x2f3   :  { %190 = vadd.xlane.f32.xlu1 %v189_v36 }
 0x2f7   :  { %87 = vadd.xlane.f32.xlu1 %v86_v38 }
 0x380   :  { %v191_v40 = vpop.xlane.xlu1 %190 }
 0x381   :  { %v192_v42 = vsel %vm188_vm11, %v191_v40, %v182_v35  ;;  %vm302_vm11 = vcmp.eq.s32.totalorder %v741_v1, 17 }
 0x382   :  { %v199_v43 = vmul.f32 %v195_v41, %v192_v42 }
 0x384   :  { %200 = vadd.xlane.f32.xlu0 %v199_v43  ;;  %v772_v44 = vpop.xlane.xlu1 %87 }
 0x385   :  { %723 = vrcp.f32 %v772_v44 }
 0x38f   :  { %v778_v46 = vpop.eup %723 }
 0x390   :  { %v93_v47 = vmul.f32 %v778_v46, %v91_v45  ;;  %v37_v45 = vld [vmem:[%s1003_s0 + $0x8] sm:$0xff] }
 0x392   :  { %94 = vst [vmem:[#allocation2 + $0x10] sm:$0xff] %v93_v47  ;;  %v70_v47 = vsel %vm68_vm8, %v37_v45, 0.0 }
 0x399   :  { %v214_v50 = vld [vmem:[#allocation2 + $0x17] ss:$0 sm:$0xff]  ;;  %v228_v58 = vld [vmem:[#allocation2 + $0x16] ss:$0 sm:$0xff]  ;;  %v242_v4 = vld [vmem:[#allocation2 + $0x15] ss:$0 sm:$0xff] }
 0x39a   :  { %v215_v51 = vxor.u32 2147483648, %v214_v50  ;;  %v229_v59 = vxor.u32 2147483648, %v228_v58  ;;  %v243_v6 = vxor.u32 2147483648, %v242_v4  ;;  %v256_v14 = vld [vmem:[#allocation2 + $0x14] ss:$0 sm:$0xff] }
 0x39b   :  { %v257_v16 = vxor.u32 2147483648, %v256_v14  ;;  %v270_v22 = vld [vmem:[#allocation2 + $0x13] ss:$0 sm:$0xff]  ;;  %v284_v30 = vld [vmem:[#allocation2 + $0x12] ss:$0 sm:$0xff] }
 0x39c   :  { %v219_v52 = vmul.f32 %v215_v51, %v131_v49  ;;  %v271_v24 = vxor.u32 2147483648, %v270_v22  ;;  %v285_v32 = vxor.u32 2147483648, %v284_v30  ;;  %v298_v38 = vld [vmem:[#allocation2 + $0x11] ss:$0 sm:$0xff] }
 0x39d   :  { %v299_v41 = vxor.u32 2147483648, %v298_v38 }
 0x39e   :  { %220 = vadd.xlane.f32.xlu1 %v219_v52 }
 0x411   :  { %v201_v54 = vpop.xlane.xlu0 %200 }
 0x412   :  { %v202_v56 = vsel %vm198_vm15, %v201_v54, %v192_v42  ;;  %v75_v54 = vsel %vm74_vm10, %v37_v45, 0.0  ;;  %vm348_vm15 = vcmp.eq.s32.totalorder %v741_v1, 14  ;;  %vm474_vm10 = vcmp.eq.s32.totalorder %v741_v1, 7 }
 0x413   :  { %v209_v57 = vmul.f32 %v205_v55, %v202_v56 }
 0x415   :  { %210 = vadd.xlane.f32.xlu0 %v209_v57 }
 0x42b   :  { %v221_v60 = vpop.xlane.xlu1 %220 }
 0x42c   :  { %v222_v61 = vsel %vm218_vm1, %v221_v60, %v131_v49 }
 0x42d   :  { %v233_v62 = vmul.f32 %v229_v59, %v222_v61 }
 0x42f   :  { %234 = vadd.xlane.f32.xlu1 %v233_v62 }
 0x4a2   :  { %v211_v63 = vpop.xlane.xlu0 %210 }
 0x4a3   :  { %v212_v0 = vsel %vm208_vm2, %v211_v63, %v202_v56  ;;  %vm384_vm2 = vcmp.eq.s32.totalorder %v741_v1, 12 }
 0x4a4   :  { %v223_v3 = vmul.f32 %v215_v51, %v212_v0 }
 0x4a6   :  { %224 = vadd.xlane.f32.xlu0 %v223_v3  ;;  %v124_v3 = vsel %vm123_vm12, -1.0, %v730_v48  ;;  %vm518_vm12 = vcmp.eq.s32.totalorder %v741_v1, 5 }
 0x4bc   :  { %v235_v5 = vpop.xlane.xlu1 %234 }
 0x4bd   :  { %v236_v9 = vsel %vm232_vm3, %v235_v5, %v222_v61 }
 0x4be   :  { %v247_v10 = vmul.f32 %v243_v6, %v236_v9 }
 0x4c0   :  { %248 = vadd.xlane.f32.xlu1 %v247_v10 }
 0x533   :  { %v225_v11 = vpop.xlane.xlu0 %224 }
 0x534   :  { %v226_v12 = vsel %vm218_vm1, %v225_v11, %v212_v0  ;;  %vm366_vm1 = vcmp.eq.s32.totalorder %v741_v1, 13 }
 0x535   :  { %v237_v13 = vmul.f32 %v229_v59, %v226_v12  ;;  %v312_v59 = vld [vmem:[#allocation2 + $0x10] ss:$0 sm:$0xff] }
 0x536   :  { %v313_v63 = vxor.u32 2147483648, %v312_v59 }
 0x537   :  { %238 = vadd.xlane.f32.xlu0 %v237_v13 }
 0x54d   :  { %v249_v15 = vpop.xlane.xlu1 %248 }
 0x54e   :  { %v250_v17 = vsel %vm246_vm4, %v249_v15, %v236_v9 }
 0x54f   :  { %v261_v18 = vmul.f32 %v257_v16, %v250_v17 }
 0x551   :  { %262 = vadd.xlane.f32.xlu1 %v261_v18 }
 0x5c4   :  { %v239_v19 = vpop.xlane.xlu0 %238 }
 0x5c5   :  { %v240_v20 = vsel %vm232_vm3, %v239_v19, %v226_v12  ;;  %vm402_vm3 = vcmp.eq.s32.totalorder %v741_v1, 11 }
 0x5c6   :  { %v251_v21 = vmul.f32 %v243_v6, %v240_v20 }
 0x5c8   :  { %252 = vadd.xlane.f32.xlu0 %v251_v21 }
 0x5de   :  { %v263_v23 = vpop.xlane.xlu1 %262 }
 0x5df   :  { %v264_v25 = vsel %vm260_vm5, %v263_v23, %v250_v17 }
 0x5e0   :  { %v275_v26 = vmul.f32 %v271_v24, %v264_v25 }
 0x5e2   :  { %276 = vadd.xlane.f32.xlu1 %v275_v26 }
 0x655   :  { %v253_v27 = vpop.xlane.xlu0 %252 }
 0x656   :  { %v254_v28 = vsel %vm246_vm4, %v253_v27, %v240_v20  ;;  %vm420_vm4 = vcmp.eq.s32.totalorder %v741_v1, 10 }
 0x657   :  { %v265_v29 = vmul.f32 %v257_v16, %v254_v28 }
 0x659   :  { %266 = vadd.xlane.f32.xlu0 %v265_v29 }
 0x66f   :  { %v277_v31 = vpop.xlane.xlu1 %276 }
 0x670   :  { %v278_v33 = vsel %vm274_vm6, %v277_v31, %v264_v25 }
 0x671   :  { %v289_v34 = vmul.f32 %v285_v32, %v278_v33 }
 0x673   :  { %290 = vadd.xlane.f32.xlu1 %v289_v34 }
 0x6e6   :  { %v267_v35 = vpop.xlane.xlu0 %266 }
 0x6e7   :  { %v268_v36 = vsel %vm260_vm5, %v267_v35, %v254_v28  ;;  %vm52_vm5 = vcmp.eq.s32.totalorder %v743_v2, %v741_v1 }
 0x6e8   :  { %v279_v37 = vmul.f32 %v271_v24, %v268_v36 }
 0x6ea   :  { %280 = vadd.xlane.f32.xlu0 %v279_v37 }
 0x700   :  { %v291_v40 = vpop.xlane.xlu1 %290 }
 0x701   :  { %v292_v42 = vsel %vm288_vm7, %v291_v40, %v278_v33 }
 0x702   :  { %v303_v43 = vmul.f32 %v299_v41, %v292_v42 }
 0x704   :  { %304 = vadd.xlane.f32.xlu1 %v303_v43 }
 0x708   :  { %71 = vadd.xlane.f32.xlu1 %v70_v47 }
 0x777   :  { %v281_v49 = vpop.xlane.xlu0 %280 }
 0x778   :  { %v282_v50 = vsel %vm274_vm6, %v281_v49, %v268_v36  ;;  %vm438_vm6 = vcmp.eq.s32.totalorder %v741_v1, 9 }
 0x779   :  { %v293_v51 = vmul.f32 %v285_v32, %v282_v50 }
 0x77b   :  { %294 = vadd.xlane.f32.xlu0 %v293_v51 }
 0x791   :  { %v305_v52 = vpop.xlane.xlu1 %304 }
 0x792   :  { %v306_v62 = vsel %vm302_vm11, %v305_v52, %v292_v42 }
 0x793   :  { %v317_v4 = vmul.f32 %v313_v63, %v306_v62 }
 0x795   :  { %v818_v53 = vpop.xlane.xlu1 %71 }
 0x796   :  { %725 = vrcp.f32 %v818_v53 }
 0x7a0   :  { %v824_v55 = vpop.eup %725 }
 0x7a1   :  { %v77_v56 = vmul.f32 %v824_v55, %v75_v54 }
 0x7a3   :  { %78 = vst [vmem:[#allocation2 + $0x8] sm:$0xff] %v77_v56 }
 0x7aa   :  { %v326_v60 = vld [vmem:[#allocation2 + $0xf] ss:$0 sm:$0xff]  ;;  %v344_v11 = vld [vmem:[#allocation2 + $0xe] ss:$0 sm:$0xff]  ;;  %v362_v24 = vld [vmem:[#allocation2 + $0xd] ss:$0 sm:$0xff] }
 0x7ab   :  { %v327_v0 = vxor.u32 2147483648, %v326_v60  ;;  %v345_v15 = vxor.u32 2147483648, %v344_v11  ;;  %v363_v27 = vxor.u32 2147483648, %v362_v24  ;;  %v380_v35 = vld [vmem:[#allocation2 + $0xc] ss:$0 sm:$0xff] }
 0x7ac   :  { %v381_v38 = vxor.u32 2147483648, %v380_v35  ;;  %v398_v49 = vld [vmem:[#allocation2 + $0xb] ss:$0 sm:$0xff] }
 0x7ad   :  { %v331_v5 = vmul.f32 %v327_v0, %v124_v3  ;;  %v399_v52 = vxor.u32 2147483648, %v398_v49 }
 0x808   :  { %v295_v57 = vpop.xlane.xlu0 %294 }
 0x809   :  { %v296_v58 = vsel %vm288_vm7, %v295_v57, %v282_v50  ;;  %vm57_vm7 = vcmp.le.s32.totalorder %v743_v2, %v741_v1 }
 0x80a   :  { %v307_v61 = vmul.f32 %v299_v41, %v296_v58  ;;  %vm58_vm8 = vmand %vm57_vm7, %vm48_vm0  ;;  %vm456_vm0 = vcmp.eq.s32.totalorder %v741_v1, 8 }
 0x80c   :  { %308 = vadd.xlane.f32.xlu0 %v307_v61 }
 0x810   :  { %318 = vadd.xlane.f32.xlu0 %v317_v4 }
 0x814   :  { %332 = vadd.xlane.f32.xlu0 %v331_v5 }
 0x899   :  { %v309_v6 = vpop.xlane.xlu0 %308 }
 0x89a   :  { %v310_v9 = vsel %vm302_vm11, %v309_v6, %v296_v58  ;;  %vm496_vm11 = vcmp.eq.s32.totalorder %v741_v1, 6 }
 0x89b   :  { %v321_v10 = vmul.f32 %v313_v63, %v310_v9 }
 0x89d   :  { %v319_v12 = vpop.xlane.xlu0 %318  ;;  %322 = vadd.xlane.f32.xlu1 %v321_v10 }
 0x89e   :  { %v320_v13 = vsel %vm316_vm13, %v319_v12, %v306_v62  ;;  %v416_v62 = vld [vmem:[#allocation2 + $0xa] ss:$0 sm:$0xff] }
 0x89f   :  { %v335_v14 = vmul.f32 %v327_v0, %v320_v13 }
 0x8a1   :  { %336 = vadd.xlane.f32.xlu1 %v335_v14  ;;  %v333_v16 = vpop.xlane.xlu0 %332 }
 0x8a2   :  { %v334_v17 = vsel %vm330_vm14, %v333_v16, %v124_v3  ;;  %v417_v3 = vxor.u32 2147483648, %v416_v62 }
 0x8a3   :  { %v349_v18 = vmul.f32 %v345_v15, %v334_v17 }
 0x8a5   :  { %350 = vadd.xlane.f32.xlu1 %v349_v18 }
 0x92a   :  { %v323_v19 = vpop.xlane.xlu1 %322 }
 0x92b   :  { %v324_v20 = vsel %vm316_vm13, %v323_v19, %v310_v9  ;;  %vm540_vm13 = vcmp.eq.s32.totalorder %v741_v1, 4 }
 0x92c   :  { %v339_v21 = vmul.f32 %v327_v0, %v324_v20 }
 0x92e   :  { %340 = vadd.xlane.f32.xlu0 %v339_v21  ;;  %v337_v22 = vpop.xlane.xlu1 %336 }
 0x92f   :  { %v338_v23 = vsel %vm330_vm14, %v337_v22, %v320_v13  ;;  %v434_v13 = vld [vmem:[#allocation2 + $0x9] ss:$0 sm:$0xff] }
 0x930   :  { %v353_v25 = vmul.f32 %v345_v15, %v338_v23  ;;  %v435_v16 = vxor.u32 2147483648, %v434_v13 }
 0x932   :  { %354 = vadd.xlane.f32.xlu0 %v353_v25  ;;  %v351_v26 = vpop.xlane.xlu1 %350  ;;  %v35_v25 = vld [vmem:[%s1003_s0] sm:$0xff] }
 0x933   :  { %v352_v28 = vsel %vm348_vm15, %v351_v26, %v334_v17  ;;  %v54_v26 = vsel %vm52_vm5, %v35_v25, 0.0  ;;  %vm651_vm5 = vweird.f32 %v818_v53 }
 0x934   :  { %v367_v29 = vmul.f32 %v363_v27, %v352_v28 }
 0x936   :  { %368 = vadd.xlane.f32.xlu0 %v367_v29 }
 0x9bb   :  { %v341_v30 = vpop.xlane.xlu0 %340 }
 0x9bc   :  { %v342_v31 = vsel %vm330_vm14, %v341_v30, %v324_v20  ;;  %v452_v30 = vld [vmem:[#allocation2 + $0x8] ss:$0 sm:$0xff]  ;;  %vm562_vm14 = vcmp.eq.s32.totalorder %v741_v1, 3 }
 0x9bd   :  { %v357_v32 = vmul.f32 %v345_v15, %v342_v31 }
 0x9bf   :  { %358 = vadd.xlane.f32.xlu1 %v357_v32  ;;  %v355_v33 = vpop.xlane.xlu0 %354 }
 0x9c0   :  { %v356_v34 = vsel %vm348_vm15, %v355_v33, %v338_v23 }
 0x9c1   :  { %v371_v36 = vmul.f32 %v363_v27, %v356_v34 }
 0x9c3   :  { %372 = vadd.xlane.f32.xlu1 %v371_v36  ;;  %v369_v37 = vpop.xlane.xlu0 %368 }
 0x9c4   :  { %v370_v39 = vsel %vm366_vm1, %v369_v37, %v352_v28 }
 0x9c5   :  { %v385_v40 = vmul.f32 %v381_v38, %v370_v39 }
 0x9c7   :  { %386 = vadd.xlane.f32.xlu1 %v385_v40 }
 0xa4c   :  { %v359_v41 = vpop.xlane.xlu1 %358 }
 0xa4d   :  { %v360_v42 = vsel %vm348_vm15, %v359_v41, %v342_v31  ;;  %vm584_vm15 = vcmp.eq.s32.totalorder %v741_v1, 2 }
 0xa4e   :  { %v375_v43 = vmul.f32 %v363_v27, %v360_v42 }
 0xa50   :  { %376 = vadd.xlane.f32.xlu0 %v375_v43  ;;  %v373_v45 = vpop.xlane.xlu1 %372 }
 0xa51   :  { %v374_v47 = vsel %vm366_vm1, %v373_v45, %v356_v34  ;;  %v453_v34 = vxor.u32 2147483648, %v452_v30 }
 0xa52   :  { %v389_v50 = vmul.f32 %v381_v38, %v374_v47 }
 0xa54   :  { %390 = vadd.xlane.f32.xlu0 %v389_v50  ;;  %v387_v51 = vpop.xlane.xlu1 %386 }
 0xa55   :  { %v388_v54 = vsel %vm384_vm2, %v387_v51, %v370_v39  ;;  %v59_v39 = vsel %vm58_vm8, %v35_v25, 0.0 }
 0xa56   :  { %v403_v56 = vmul.f32 %v399_v52, %v388_v54 }
 0xa58   :  { %404 = vadd.xlane.f32.xlu0 %v403_v56 }
 0xadd   :  { %v377_v57 = vpop.xlane.xlu0 %376 }
 0xade   :  { %v378_v58 = vsel %vm366_vm1, %v377_v57, %v360_v42  ;;  %v117_v42 = vsel %vm116_vm9, -1.0, %v730_v48  ;;  %vm606_vm1 = vcmp.eq.s32.totalorder %v741_v1, 1 }
 0xadf   :  { %v393_v59 = vmul.f32 %v381_v38, %v378_v58 }
 0xae1   :  { %394 = vadd.xlane.f32.xlu1 %v393_v59  ;;  %v391_v60 = vpop.xlane.xlu0 %390 }
 0xae2   :  { %v392_v61 = vsel %vm384_vm2, %v391_v60, %v374_v47 }
 0xae3   :  { %v407_v63 = vmul.f32 %v399_v52, %v392_v61 }
 0xae5   :  { %408 = vadd.xlane.f32.xlu1 %v407_v63  ;;  %v405_v0 = vpop.xlane.xlu0 %404 }
 0xae6   :  { %v406_v4 = vsel %vm402_vm3, %v405_v0, %v388_v54 }
 0xae7   :  { %v421_v5 = vmul.f32 %v417_v3, %v406_v4 }
 0xae9   :  { %422 = vadd.xlane.f32.xlu1 %v421_v5 }
 0xb6e   :  { %v395_v6 = vpop.xlane.xlu1 %394 }
 0xb6f   :  { %v396_v9 = vsel %vm384_vm2, %v395_v6, %v378_v58  ;;  %vm627_vm2 = vcmp.eq.s32.totalorder %v741_v1, 0 }
 0xb70   :  { %v411_v10 = vmul.f32 %v399_v52, %v396_v9 }
 0xb72   :  { %412 = vadd.xlane.f32.xlu0 %v411_v10  ;;  %v409_v11 = vpop.xlane.xlu1 %408 }
 0xb73   :  { %v410_v12 = vsel %vm402_vm3, %v409_v11, %v392_v61 }
 0xb74   :  { %v425_v14 = vmul.f32 %v417_v3, %v410_v12 }
 0xb76   :  { %426 = vadd.xlane.f32.xlu0 %v425_v14  ;;  %v423_v15 = vpop.xlane.xlu1 %422 }
 0xb77   :  { %v424_v17 = vsel %vm420_vm4, %v423_v15, %v406_v4 }
 0xb78   :  { %v439_v18 = vmul.f32 %v435_v16, %v424_v17 }
 0xb7a   :  { %440 = vadd.xlane.f32.xlu0 %v439_v18 }
 0xbff   :  { %v413_v19 = vpop.xlane.xlu0 %412 }
 0xc00   :  { %v414_v20 = vsel %vm402_vm3, %v413_v19, %v396_v9 }
 0xc01   :  { %v429_v21 = vmul.f32 %v417_v3, %v414_v20 }
 0xc03   :  { %430 = vadd.xlane.f32.xlu1 %v429_v21  ;;  %v427_v22 = vpop.xlane.xlu0 %426 }
 0xc04   :  { %v428_v23 = vsel %vm420_vm4, %v427_v22, %v410_v12 }
 0xc05   :  { %v443_v24 = vmul.f32 %v435_v16, %v428_v23 }
 0xc07   :  { %444 = vadd.xlane.f32.xlu1 %v443_v24  ;;  %v441_v27 = vpop.xlane.xlu0 %440 }
 0xc08   :  { %v442_v32 = vsel %vm438_vm6, %v441_v27, %v424_v17 }
 0xc09   :  { %v457_v36 = vmul.f32 %v453_v34, %v442_v32 }
 0xc0b   :  { %55 = vadd.xlane.f32.xlu1 %v54_v26 }
 0xc90   :  { %v431_v28 = vpop.xlane.xlu1 %430 }
 0xc91   :  { %v432_v29 = vsel %vm420_vm4, %v431_v28, %v414_v20  ;;  %vm657_vm4 = vweird.f32 %v772_v44 }
 0xc92   :  { %v447_v31 = vmul.f32 %v435_v16, %v432_v29 }
 0xc94   :  { %448 = vadd.xlane.f32.xlu0 %v447_v31  ;;  %v445_v33 = vpop.xlane.xlu1 %444 }
 0xc95   :  { %v446_v35 = vsel %vm438_vm6, %v445_v33, %v428_v23 }
 0xc96   :  { %v461_v37 = vmul.f32 %v453_v34, %v446_v35 }
 0xc98   :  { %458 = vadd.xlane.f32.xlu0 %v457_v36  ;;  %462 = vadd.xlane.f32.xlu1 %v461_v37  ;;  %v889_v38 = vpop.xlane.xlu1 %55 }
 0xc99   :  { %727 = vrcp.f32 %v889_v38  ;;  %vm646_vm3 = vweird.f32 %v889_v38 }
 0xca3   :  { %v896_v40 = vpop.eup %727 }
 0xca4   :  { %v61_v41 = vmul.f32 %v896_v40, %v59_v39 }
 0xca6   :  { %62 = vst [vmem:[#allocation2] sm:$0xff] %v61_v41 }
 0xcad   :  { %v470_v43 = vld [vmem:[#allocation2 + $0x7] ss:$0 sm:$0xff]  ;;  %v492_v58 = vld [vmem:[#allocation2 + $0x6] ss:$0 sm:$0xff]  ;;  %v514_v12 = vld [vmem:[#allocation2 + $0x5] ss:$0 sm:$0xff] }
 0xcae   :  { %v471_v45 = vxor.u32 2147483648, %v470_v43  ;;  %v493_v59 = vxor.u32 2147483648, %v492_v58  ;;  %v515_v14 = vxor.u32 2147483648, %v514_v12  ;;  %v536_v26 = vld [vmem:[#allocation2 + $0x4] ss:$0 sm:$0xff] }
 0xcaf   :  { %v537_v28 = vxor.u32 2147483648, %v536_v26 }
 0xcb0   :  { %v475_v47 = vmul.f32 %v471_v45, %v117_v42 }
 0xcb2   :  { %476 = vadd.xlane.f32.xlu1 %v475_v47 }
 0xd21   :  { %v449_v49 = vpop.xlane.xlu0 %448 }
 0xd22   :  { %v450_v50 = vsel %vm438_vm6, %v449_v49, %v432_v29  ;;  %vm663_vm6 = vweird.f32 %v754_v7 }
 0xd23   :  { %v465_v51 = vmul.f32 %v453_v34, %v450_v50 }
 0xd25   :  { %466 = vadd.xlane.f32.xlu0 %v465_v51  ;;  %v459_v52 = vpop.xlane.xlu0 %458  ;;  %v463_v54 = vpop.xlane.xlu1 %462 }
 0xd26   :  { %v460_v56 = vsel %vm456_vm0, %v459_v52, %v442_v32  ;;  %v464_v2 = vsel %vm456_vm0, %v463_v54, %v446_v35 }
 0xd27   :  { %v479_v48 = vmul.f32 %v471_v45, %v460_v56  ;;  %v483_v57 = vmul.f32 %v471_v45, %v464_v2 }
 0xd29   :  { %480 = vadd.xlane.f32.xlu0 %v479_v48  ;;  %484 = vadd.xlane.f32.xlu1 %v483_v57 }
 0xd3f   :  { %v477_v60 = vpop.xlane.xlu1 %476 }
 0xd40   :  { %v478_v61 = vsel %vm474_vm10, %v477_v60, %v117_v42  ;;  %v558_v42 = vld [vmem:[#allocation2 + $0x3] ss:$0 sm:$0xff] }
 0xd41   :  { %v497_v62 = vmul.f32 %v493_v59, %v478_v61 }
 0xd43   :  { %498 = vadd.xlane.f32.xlu1 %v497_v62 }
 0xdb2   :  { %v467_v63 = vpop.xlane.xlu0 %466 }
 0xdb3   :  { %v468_v0 = vsel %vm456_vm0, %v467_v63, %v450_v50 }
 0xdb4   :  { %v487_v3 = vmul.f32 %v471_v45, %v468_v0  ;;  %v559_v45 = vxor.u32 2147483648, %v558_v42 }
 0xdb6   :  { %488 = vadd.xlane.f32.xlu0 %v487_v3  ;;  %v481_v4 = vpop.xlane.xlu0 %480  ;;  %v485_v5 = vpop.xlane.xlu1 %484 }
 0xdb7   :  { %v482_v6 = vsel %vm474_vm10, %v481_v4, %v460_v56  ;;  %v486_v9 = vsel %vm474_vm10, %v485_v5, %v464_v2 }
 0xdb8   :  { %v501_v10 = vmul.f32 %v493_v59, %v482_v6  ;;  %v505_v11 = vmul.f32 %v493_v59, %v486_v9 }
 0xdba   :  { %502 = vadd.xlane.f32.xlu0 %v501_v10  ;;  %506 = vadd.xlane.f32.xlu1 %v505_v11 }
 0xdd0   :  { %v499_v13 = vpop.xlane.xlu1 %498 }
 0xdd1   :  { %v500_v15 = vsel %vm496_vm11, %v499_v13, %v478_v61  ;;  %v602_v13 = vld [vmem:[#allocation2 + $0x1] ss:$0 sm:$0xff] }
 0xdd2   :  { %v519_v16 = vmul.f32 %v515_v14, %v500_v15 }
 0xdd4   :  { %520 = vadd.xlane.f32.xlu1 %v519_v16 }
 0xe43   :  { %v489_v17 = vpop.xlane.xlu0 %488 }
 0xe44   :  { %v490_v18 = vsel %vm474_vm10, %v489_v17, %v468_v0 }
 0xe45   :  { %v509_v19 = vmul.f32 %v493_v59, %v490_v18  ;;  %v580_v59 = vld [vmem:[#allocation2 + $0x2] ss:$0 sm:$0xff] }
 0xe46   :  { %v581_v61 = vxor.u32 2147483648, %v580_v59 }
 0xe47   :  { %510 = vadd.xlane.f32.xlu0 %v509_v19  ;;  %v503_v20 = vpop.xlane.xlu0 %502  ;;  %v507_v21 = vpop.xlane.xlu1 %506 }
 0xe48   :  { %v504_v22 = vsel %vm496_vm11, %v503_v20, %v482_v6  ;;  %v508_v23 = vsel %vm496_vm11, %v507_v21, %v486_v9 }
 0xe49   :  { %v523_v24 = vmul.f32 %v515_v14, %v504_v22  ;;  %v527_v25 = vmul.f32 %v515_v14, %v508_v23 }
 0xe4b   :  { %524 = vadd.xlane.f32.xlu0 %v523_v24  ;;  %528 = vadd.xlane.f32.xlu1 %v527_v25 }
 0xe61   :  { %v521_v27 = vpop.xlane.xlu1 %520 }
 0xe62   :  { %v522_v29 = vsel %vm518_vm12, %v521_v27, %v500_v15  ;;  %v603_v15 = vxor.u32 2147483648, %v602_v13  ;;  %v623_v27 = vld [vmem:[#allocation2] ss:$0 sm:$0xff] }
 0xe63   :  { %v541_v30 = vmul.f32 %v537_v28, %v522_v29 }
 0xe65   :  { %542 = vadd.xlane.f32.xlu1 %v541_v30 }
 0xed4   :  { %v511_v31 = vpop.xlane.xlu0 %510 }
 0xed5   :  { %v512_v32 = vsel %vm496_vm11, %v511_v31, %v490_v18 }
 0xed6   :  { %v531_v33 = vmul.f32 %v515_v14, %v512_v32 }
 0xed8   :  { %532 = vadd.xlane.f32.xlu0 %v531_v33  ;;  %v525_v34 = vpop.xlane.xlu0 %524  ;;  %v529_v35 = vpop.xlane.xlu1 %528 }
 0xed9   :  { %v526_v36 = vsel %vm518_vm12, %v525_v34, %v504_v22  ;;  %v530_v37 = vsel %vm518_vm12, %v529_v35, %v508_v23 }
 0xeda   :  { %v545_v39 = vmul.f32 %v537_v28, %v526_v36  ;;  %v549_v41 = vmul.f32 %v537_v28, %v530_v37 }
 0xedc   :  { %546 = vadd.xlane.f32.xlu0 %v545_v39  ;;  %550 = vadd.xlane.f32.xlu1 %v549_v41 }
 0xef2   :  { %v543_v43 = vpop.xlane.xlu1 %542 }
 0xef3   :  { %v544_v47 = vsel %vm540_vm13, %v543_v43, %v522_v29  ;;  %v624_v29 = vxor.u32 2147483648, %v623_v27 }
 0xef4   :  { %v563_v49 = vmul.f32 %v559_v45, %v544_v47 }
 0xef6   :  { %564 = vadd.xlane.f32.xlu1 %v563_v49 }
 0xf65   :  { %v533_v50 = vpop.xlane.xlu0 %532 }
 0xf66   :  { %v534_v51 = vsel %vm518_vm12, %v533_v50, %v512_v32 }
 0xf67   :  { %v553_v52 = vmul.f32 %v537_v28, %v534_v51 }
 0xf69   :  { %554 = vadd.xlane.f32.xlu0 %v553_v52  ;;  %v547_v54 = vpop.xlane.xlu0 %546  ;;  %v551_v56 = vpop.xlane.xlu1 %550 }
 0xf6a   :  { %v548_v2 = vsel %vm540_vm13, %v547_v54, %v526_v36  ;;  %v552_v48 = vsel %vm540_vm13, %v551_v56, %v530_v37 }
 0xf6b   :  { %v567_v57 = vmul.f32 %v559_v45, %v548_v2  ;;  %v571_v58 = vmul.f32 %v559_v45, %v552_v48 }
 0xf6d   :  { %568 = vadd.xlane.f32.xlu0 %v567_v57  ;;  %572 = vadd.xlane.f32.xlu1 %v571_v58 }
 0xf83   :  { %v565_v60 = vpop.xlane.xlu1 %564 }
 0xf84   :  { %v566_v62 = vsel %vm562_vm14, %v565_v60, %v544_v47 }
 0xf85   :  { %v585_v63 = vmul.f32 %v581_v61, %v566_v62 }
 0xf87   :  { %586 = vadd.xlane.f32.xlu1 %v585_v63 }
 0xff6   :  { %v555_v0 = vpop.xlane.xlu0 %554 }
 0xff7   :  { %v556_v3 = vsel %vm540_vm13, %v555_v0, %v534_v51 }
 0xff8   :  { %v575_v4 = vmul.f32 %v559_v45, %v556_v3 }
 0xffa   :  { %576 = vadd.xlane.f32.xlu0 %v575_v4  ;;  %v569_v5 = vpop.xlane.xlu0 %568  ;;  %v573_v6 = vpop.xlane.xlu1 %572 }
 0xffb   :  { %v570_v9 = vsel %vm562_vm14, %v569_v5, %v548_v2  ;;  %v574_v10 = vsel %vm562_vm14, %v573_v6, %v552_v48 }
 0xffc   :  { %v589_v11 = vmul.f32 %v581_v61, %v570_v9  ;;  %v593_v12 = vmul.f32 %v581_v61, %v574_v10 }
 0xffe   :  { %590 = vadd.xlane.f32.xlu0 %v589_v11  ;;  %594 = vadd.xlane.f32.xlu1 %v593_v12 }
0x1014   :  { %v587_v14 = vpop.xlane.xlu1 %586 }
0x1015   :  { %v588_v16 = vsel %vm584_vm15, %v587_v14, %v566_v62 }
0x1016   :  { %v607_v17 = vmul.f32 %v603_v15, %v588_v16 }
0x1018   :  { %608 = vadd.xlane.f32.xlu1 %v607_v17 }
0x1087   :  { %v577_v18 = vpop.xlane.xlu0 %576 }
0x1088   :  { %v578_v19 = vsel %vm562_vm14, %v577_v18, %v556_v3 }
0x1089   :  { %v597_v20 = vmul.f32 %v581_v61, %v578_v19 }
0x108b   :  { %598 = vadd.xlane.f32.xlu0 %v597_v20  ;;  %v591_v21 = vpop.xlane.xlu0 %590  ;;  %v595_v22 = vpop.xlane.xlu1 %594 }
0x108c   :  { %v592_v23 = vsel %vm584_vm15, %v591_v21, %v570_v9  ;;  %v596_v24 = vsel %vm584_vm15, %v595_v22, %v574_v10 }
0x108d   :  { %v611_v25 = vmul.f32 %v603_v15, %v592_v23  ;;  %v615_v26 = vmul.f32 %v603_v15, %v596_v24 }
0x108f   :  { %612 = vadd.xlane.f32.xlu0 %v611_v25  ;;  %616 = vadd.xlane.f32.xlu1 %v615_v26 }
0x10a5   :  { %v609_v28 = vpop.xlane.xlu1 %608 }
0x10a6   :  { %v610_v30 = vsel %vm606_vm1, %v609_v28, %v588_v16 }
0x10a7   :  { %v628_v31 = vmul.f32 %v624_v29, %v610_v30 }
0x10a9   :  { %629 = vadd.xlane.f32.xlu1 %v628_v31 }
0x1118   :  { %v599_v32 = vpop.xlane.xlu0 %598 }
0x1119   :  { %v600_v33 = vsel %vm584_vm15, %v599_v32, %v578_v19 }
0x111a   :  { %v619_v34 = vmul.f32 %v603_v15, %v600_v33 }
0x111c   :  { %620 = vadd.xlane.f32.xlu0 %v619_v34  ;;  %v613_v35 = vpop.xlane.xlu0 %612  ;;  %v617_v36 = vpop.xlane.xlu1 %616 }
0x111d   :  { %v614_v37 = vsel %vm606_vm1, %v613_v35, %v592_v23  ;;  %v618_v39 = vsel %vm606_vm1, %v617_v36, %v596_v24 }
0x111e   :  { %v632_v41 = vmul.f32 %v624_v29, %v614_v37  ;;  %v636_v42 = vmul.f32 %v624_v29, %v618_v39 }
0x1120   :  { %633 = vadd.xlane.f32.xlu0 %v632_v41  ;;  %637 = vadd.xlane.f32.xlu1 %v636_v42 }
0x1136   :  { %v630_v43 = vpop.xlane.xlu1 %629 }
0x1137   :  { %v631_v45 = vsel %vm627_vm2, %v630_v43, %v610_v30 }
0x1138   :  { %v645_v47 = vmul.f32 %v896_v40, %v631_v45 }
0x113a   :  { %v647_v49 = vsel %vm646_vm3, %v631_v45, %v645_v47 }
0x113b   :  { %701 = vst [vmem:[%s1004_s1] sm:$0xff] %v647_v49 }
0x11a9   :  { %v621_v50 = vpop.xlane.xlu0 %620 }
0x11aa   :  { %v622_v51 = vsel %vm606_vm1, %v621_v50, %v600_v33 }
0x11ab   :  { %v640_v52 = vmul.f32 %v624_v29, %v622_v51 }
0x11ad   :  { %641 = vadd.xlane.f32.xlu0 %v640_v52  ;;  %v634_v54 = vpop.xlane.xlu0 %633  ;;  %v638_v56 = vpop.xlane.xlu1 %637 }
0x11ae   :  { %v635_v2 = vsel %vm627_vm2, %v634_v54, %v614_v37  ;;  %v639_v40 = vsel %vm627_vm2, %v638_v56, %v618_v39 }
0x11af   :  { %v650_v38 = vmul.f32 %v824_v55, %v635_v2  ;;  %v656_v48 = vmul.f32 %v778_v46, %v639_v40 }
0x11b1   :  { %v652_v57 = vsel %vm651_vm5, %v635_v2, %v650_v38  ;;  %v658_v58 = vsel %vm657_vm4, %v639_v40, %v656_v48 }
0x11b2   :  { %703 = vst [vmem:[%s1004_s1 + $0x8] sm:$0xff] %v652_v57  ;;  %705 = vst [vmem:[%s1004_s1 + $0x10] sm:$0xff] %v658_v58 }
0x123a   :  { %v642_v59 = vpop.xlane.xlu0 %641 }
0x123b   :  { %v643_v55 = vsel %vm627_vm2, %v642_v59, %v622_v51 }
0x123c   :  { %v662_v46 = vmul.f32 %v757_v8, %v643_v55 }
0x123e   :  { %v664_v44 = vsel %vm663_vm6, %v643_v55, %v662_v46 }
0x123f   :  { %707 = vst [vmem:[%s1004_s1 + $0x18] sm:$0xff] %v664_v44 }

// kernel: ltirnn_forward.1
= control target key start
LH: loop header
LB: loop body
LE: loop exit
PB: predicated region body
PF: predicated region fallthrough
CT: control target
= control target key end

     0   :  { %v5683_v3 = vmov 0.0   ;;  %vm4388_vm0 = vmmov 0   ;;  %s5677_s2 = inlined_call_operand.vmem [shape: f32[128,384], index: 2, kind: input, shape index: {}]   ;;  %s5678_s0 = inlined_call_operand.vmem [shape: f32[64,128], index: 0, kind: input, shape index: {}]   ;;  %s5679_s4 = inlined_call_operand.vmem [shape: f32[128,512], index: 4, kind: input, shape index: {}]   ;;  %s5680_s3 = inlined_call_operand.vmem [shape: f32[128,384], index: 3, kind: input, shape index: {}]   ;;  %s5681_s1 = inlined_call_operand.vmem [shape: f32[8,384], index: 1, kind: input, shape index: {}]   ;;  %s5682_s5 = inlined_call_operand.vmem [shape: f32[64,128], index: 5, kind: output, shape index: {}]  }
   0x1   :  { %v39_v0 = vld [vmem:[%s5677_s2 + $0x8] sm:$0xff]  ;;  %v42_v1 = vld [vmem:[%s5677_s2 + $0x20] sm:$0xff]  ;;  %150 = vmatprep.mubr.f32.mxu0 %v5683_v3  ;;  %v41_v5 = vld [vmem:[%s5677_s2 + $0x18] sm:$0xff] }
   0x2   :  { %v38_v2 = vld [vmem:[%s5677_s2] sm:$0xff]  ;;  %v3315_v4 = vpack.c.bf16 %v42_v1, %v39_v0  ;;  %v45_v6 = vld [vmem:[%s5677_s2 + $0x38] sm:$0xff]  ;;  %v48_v7 = vld [vmem:[%s5677_s2 + $0x50] sm:$0xff] }
   0x3   :  { %v3317_v8 = vpack.c.bf16 %v41_v5, %v38_v2  ;;  %v3319_v9 = vpack.c.bf16 %v48_v7, %v45_v6  ;;  %v44_v10 = vld [vmem:[%s5677_s2 + $0x30] sm:$0xff]  ;;  %v47_v11 = vld [vmem:[%s5677_s2 + $0x48] sm:$0xff]  ;;  %v54_v13 = vld [vmem:[%s5677_s2 + $0x80] sm:$0xff] }
   0x4   :  { %v51_v12 = vld [vmem:[%s5677_s2 + $0x68] sm:$0xff]  ;;  %3316 = vmatprep.subr.bf16.mxu0 %v3315_v4  ;;  %v3321_v14 = vpack.c.bf16 %v47_v11, %v44_v10  ;;  %v50_v16 = vld [vmem:[%s5677_s2 + $0x60] sm:$0xff]  ;;  %v53_v17 = vld [vmem:[%s5677_s2 + $0x78] sm:$0xff] }
   0x5   :  { %3318 = vmatpush1.bf16.msra.mxu0 %v3317_v8  ;;  %v3323_v15 = vpack.c.bf16 %v54_v13, %v51_v12  ;;  %v57_v18 = vld [vmem:[%s5677_s2 + $0x98] sm:$0xff]  ;;  %v60_v19 = vld [vmem:[%s5677_s2 + $0xb0] sm:$0xff]  ;;  %v3325_v20 = vpack.c.bf16 %v53_v17, %v50_v16  ;;  %v59_v23 = vld [vmem:[%s5677_s2 + $0xa8] sm:$0xff] }
   0x6   :  { %3320 = vmatprep.subr.bf16.mxu0 %v3319_v9  ;;  %v3327_v21 = vpack.c.bf16 %v60_v19, %v57_v18  ;;  %v56_v22 = vld [vmem:[%s5677_s2 + $0x90] sm:$0xff]  ;;  %v63_v24 = vld [vmem:[%s5677_s2 + $0xc8] sm:$0xff]  ;;  %v66_v25 = vld [vmem:[%s5677_s2 + $0xe0] sm:$0xff] }
   0x7   :  { %v4477_v26 = vld [vmem:[%s5678_s0] sm:$0xff]  ;;  %v40_v27 = vld [vmem:[%s5677_s2 + $0x10] sm:$0xff]  ;;  %v43_v28 = vld [vmem:[%s5677_s2 + $0x28] sm:$0xff]  ;;  %v3329_v30 = vpack.c.bf16 %v59_v23, %v56_v22  ;;  %v3331_v34 = vpack.c.bf16 %v66_v25, %v63_v24 }
   0x8   :  { %v46_v29 = vld [vmem:[%s5677_s2 + $0x40] sm:$0xff]  ;;  %3023 = vmatprep.mubr.f32.mxu1 %v4477_v26  ;;  %v3347_v32 = vpack.c.bf16 %v43_v28, %v40_v27  ;;  %v49_v33 = vld [vmem:[%s5677_s2 + $0x58] sm:$0xff]  ;;  %v52_v37 = vld [vmem:[%s5677_s2 + $0x70] sm:$0xff] }
   0x9   :  { %3322 = vmatpush1.bf16.msra.mxu0 %v3321_v14  ;;  %v62_v31 = vld [vmem:[%s5677_s2 + $0xc0] sm:$0xff]  ;;  %v65_v35 = vld [vmem:[%s5677_s2 + $0xd8] sm:$0xff]  ;;  %v3351_v36 = vpack.c.bf16 %v49_v33, %v46_v29  ;;  %v55_v38 = vld [vmem:[%s5677_s2 + $0x88] sm:$0xff] }
   0xa   :  { %3324 = vmatprep.subr.bf16.mxu0 %v3323_v15  ;;  %v69_v39 = vld [vmem:[%s5677_s2 + $0xf8] sm:$0xff]  ;;  %v72_v40 = vld [vmem:[%s5677_s2 + $0x110] sm:$0xff]  ;;  %3348 = vmatprep.subr.bf16.mxu1 %v3347_v32  ;;  %v3333_v41 = vpack.c.bf16 %v65_v35, %v62_v31  ;;  %v3355_v43 = vpack.c.bf16 %v55_v38, %v52_v37  ;;  %v71_v45 = vld [vmem:[%s5677_s2 + $0x108] sm:$0xff] }
   0xb   :  { %3350 = vmatpush3.bf16.msra.mxu1 %v3347_v32  ;;  %v68_v42 = vld [vmem:[%s5677_s2 + $0xf0] sm:$0xff]  ;;  %v3335_v44 = vpack.c.bf16 %v72_v40, %v69_v39  ;;  %v58_v46 = vld [vmem:[%s5677_s2 + $0xa0] sm:$0xff]  ;;  %v61_v47 = vld [vmem:[%s5677_s2 + $0xb8] sm:$0xff] }
   0xc   :  { %3352 = vmatprep.subr.bf16.mxu1 %v3351_v36  ;;  %v75_v48 = vld [vmem:[%s5677_s2 + $0x128] sm:$0xff]  ;;  %v78_v49 = vld [vmem:[%s5677_s2 + $0x140] sm:$0xff]  ;;  %v3337_v50 = vpack.c.bf16 %v71_v45, %v68_v42  ;;  %v3359_v52 = vpack.c.bf16 %v61_v47, %v58_v46  ;;  %v77_v54 = vld [vmem:[%s5677_s2 + $0x138] sm:$0xff] }
   0xd   :  { %3326 = vmatpush1.bf16.msra.mxu0 %v3325_v20  ;;  %v74_v51 = vld [vmem:[%s5677_s2 + $0x120] sm:$0xff]  ;;  %v3339_v53 = vpack.c.bf16 %v78_v49, %v75_v48  ;;  %v64_v55 = vld [vmem:[%s5677_s2 + $0xd0] sm:$0xff]  ;;  %v67_v56 = vld [vmem:[%s5677_s2 + $0xe8] sm:$0xff] }
   0xe   :  { %3328 = vmatprep.subr.bf16.mxu0 %v3327_v21  ;;  %v81_v57 = vld [vmem:[%s5677_s2 + $0x158] sm:$0xff]  ;;  %v84_v58 = vld [vmem:[%s5677_s2 + $0x170] sm:$0xff]  ;;  %v3341_v59 = vpack.c.bf16 %v77_v54, %v74_v51  ;;  %v3363_v61 = vpack.c.bf16 %v67_v56, %v64_v55  ;;  %v83_v63 = vld [vmem:[%s5677_s2 + $0x168] sm:$0xff] }
   0xf   :  { %3354 = vmatpush3.bf16.msra.mxu1 %v3351_v36  ;;  %v80_v60 = vld [vmem:[%s5677_s2 + $0x150] sm:$0xff]  ;;  %v3343_v62 = vpack.c.bf16 %v84_v58, %v81_v57  ;;  %v70_v0 = vld [vmem:[%s5677_s2 + $0x100] sm:$0xff]  ;;  %v73_v1 = vld [vmem:[%s5677_s2 + $0x118] sm:$0xff] }
  0x10   :  { %3356 = vmatprep.subr.bf16.mxu1 %v3355_v43  ;;  %v377_v2 = vld [vmem:[%s5679_s4 + $0x8] sm:$0xff]  ;;  %v3345_v5 = vpack.c.bf16 %v83_v63, %v80_v60  ;;  %v3367_v6 = vpack.c.bf16 %v73_v1, %v70_v0  ;;  %v76_v7 = vld [vmem:[%s5677_s2 + $0x130] sm:$0xff]  ;;  %v376_v10 = vld [vmem:[%s5679_s4] sm:$0xff] }
  0x11   :  { %3330 = vmatpush1.bf16.msra.mxu0 %v3329_v30  ;;  %v381_v4 = vld [vmem:[%s5679_s4 + $0x28] sm:$0xff]  ;;  %v380_v11 = vld [vmem:[%s5679_s4 + $0x20] sm:$0xff]  ;;  %v85_v17 = vld [vmem:[%s5677_s2 + $0x178] sm:$0xff] }
  0x12   :  { %3332 = vmatprep.subr.bf16.mxu0 %v3331_v34  ;;  %v79_v8 = vld [vmem:[%s5677_s2 + $0x148] sm:$0xff]  ;;  %v4570_v9 = vpack.c.bf16 %v381_v4, %v377_v2  ;;  %v82_v15 = vld [vmem:[%s5677_s2 + $0x160] sm:$0xff]  ;;  %v4587_v16 = vpack.c.bf16 %v380_v11, %v376_v10  ;;  %v379_v24 = vld [vmem:[%s5679_s4 + $0x18] sm:$0xff] }
  0x13   :  { %3358 = vmatpush3.bf16.msra.mxu1 %v3355_v43  ;;  %v385_v12 = vld [vmem:[%s5679_s4 + $0x48] sm:$0xff]  ;;  %v3371_v14 = vpack.c.bf16 %v79_v8, %v76_v7  ;;  %v384_v19 = vld [vmem:[%s5679_s4 + $0x40] sm:$0xff]  ;;  %v3375_v23 = vpack.c.bf16 %v85_v17, %v82_v15  ;;  %v383_v27 = vld [vmem:[%s5679_s4 + $0x38] sm:$0xff] }
  0x14   :  { %3360 = vmatprep.subr.bf16.mxu1 %v3359_v52  ;;  %v389_v13 = vld [vmem:[%s5679_s4 + $0x68] sm:$0xff]  ;;  %v388_v20 = vld [vmem:[%s5679_s4 + $0x60] sm:$0xff]  ;;  %v378_v33 = vld [vmem:[%s5679_s4 + $0x10] sm:$0xff]  ;;  %v4639_v34 = vpack.c.bf16 %v383_v27, %v379_v24 }
  0x15   :  { %3334 = vmatpush1.bf16.msra.mxu0 %v3333_v41  ;;  %v4593_v18 = vpack.c.bf16 %v389_v13, %v385_v12  ;;  %v393_v21 = vld [vmem:[%s5679_s4 + $0x88] sm:$0xff]  ;;  %v4612_v25 = vpack.c.bf16 %v388_v20, %v384_v19  ;;  %v392_v28 = vld [vmem:[%s5679_s4 + $0x80] sm:$0xff]  ;;  %v382_v35 = vld [vmem:[%s5679_s4 + $0x30] sm:$0xff] }
  0x16   :  { %3336 = vmatprep.subr.bf16.mxu0 %v3335_v44  ;;  %v397_v22 = vld [vmem:[%s5679_s4 + $0xa8] sm:$0xff]  ;;  %v396_v29 = vld [vmem:[%s5679_s4 + $0xa0] sm:$0xff]  ;;  %v387_v36 = vld [vmem:[%s5679_s4 + $0x58] sm:$0xff]  ;;  %v4672_v45 = vpack.c.bf16 %v382_v35, %v378_v33 }
  0x17   :  { %3362 = vmatpush3.bf16.msra.mxu1 %v3359_v52  ;;  %v31_v30 = vld [vmem:[%s5678_s0 + $0x8] sm:$0xff]  ;;  %v32_v37 = vld [vmem:[%s5678_s0 + $0x10] sm:$0xff]  ;;  %v4651_v38 = vpack.c.bf16 %v396_v29, %v392_v28  ;;  %v391_v39 = vld [vmem:[%s5679_s4 + $0x78] sm:$0xff] }
  0x18   :  { %3364 = vmatprep.subr.bf16.mxu1 %v3363_v61  ;;  %v401_v31 = vld [vmem:[%s5679_s4 + $0xc8] sm:$0xff]  ;;  %v400_v41 = vld [vmem:[%s5679_s4 + $0xc0] sm:$0xff]  ;;  %v386_v46 = vld [vmem:[%s5679_s4 + $0x50] sm:$0xff]  ;;  %v4678_v47 = vpack.c.bf16 %v391_v39, %v387_v36 }
  0x19   :  { %3338 = vmatpush1.bf16.msra.mxu0 %v3337_v50  ;;  %v405_v32 = vld [vmem:[%s5679_s4 + $0xe8] sm:$0xff]  ;;  %v404_v42 = vld [vmem:[%s5679_s4 + $0xe0] sm:$0xff]  ;;  %v390_v48 = vld [vmem:[%s5679_s4 + $0x70] sm:$0xff] }
  0x1a   :  { %3340 = vmatprep.subr.bf16.mxu0 %v3339_v53  ;;  %v4658_v40 = vpack.c.bf16 %v405_v32, %v401_v31  ;;  %v409_v43 = vld [vmem:[%s5679_s4 + $0x108] sm:$0xff]  ;;  %v395_v49 = vld [vmem:[%s5679_s4 + $0x98] sm:$0xff]  ;;  %v4690_v51 = vpack.c.bf16 %v404_v42, %v400_v41  ;;  %v408_v54 = vld [vmem:[%s5679_s4 + $0x100] sm:$0xff]  ;;  %v4706_v56 = vpack.c.bf16 %v390_v48, %v386_v46 }
  0x1b   :  { %3366 = vmatpush3.bf16.msra.mxu1 %v3363_v61  ;;  %v413_v44 = vld [vmem:[%s5679_s4 + $0x128] sm:$0xff]  ;;  %v33_v50 = vld [vmem:[%s5678_s0 + $0x18] sm:$0xff]  ;;  %v412_v55 = vld [vmem:[%s5679_s4 + $0x120] sm:$0xff] }
  0x1c   :  { %3368 = vmatprep.subr.bf16.mxu1 %v3367_v6  ;;  %v399_v52 = vld [vmem:[%s5679_s4 + $0xb8] sm:$0xff]  ;;  %v4697_v53 = vpack.c.bf16 %v413_v44, %v409_v43  ;;  %v394_v58 = vld [vmem:[%s5679_s4 + $0x90] sm:$0xff]  ;;  %v34_v60 = vld [vmem:[%s5678_s0 + $0x20] sm:$0xff]  ;;  %v4721_v61 = vpack.c.bf16 %v412_v55, %v408_v54 }
  0x1d   :  { %3342 = vmatpush1.bf16.msra.mxu0 %v3341_v59  ;;  %v4709_v57 = vpack.c.bf16 %v399_v52, %v395_v49  ;;  %v398_v59 = vld [vmem:[%s5679_s4 + $0xb0] sm:$0xff]  ;;  %v407_v63 = vld [vmem:[%s5679_s4 + $0xf8] sm:$0xff]  ;;  %v417_v13 = vld [vmem:[%s5679_s4 + $0x148] sm:$0xff] }
  0x1e   :  { %3344 = vmatprep.subr.bf16.mxu0 %v3343_v62  ;;  %v403_v62 = vld [vmem:[%s5679_s4 + $0xd8] sm:$0xff]  ;;  %v4732_v0 = vpack.c.bf16 %v398_v59, %v394_v58  ;;  %v402_v2 = vld [vmem:[%s5679_s4 + $0xd0] sm:$0xff]  ;;  %v416_v20 = vld [vmem:[%s5679_s4 + $0x140] sm:$0xff] }
  0x1f   :  { %3370 = vmatpush3.bf16.msra.mxu1 %v3367_v6  ;;  %v4735_v1 = vpack.c.bf16 %v407_v63, %v403_v62  ;;  %v406_v4 = vld [vmem:[%s5679_s4 + $0xf0] sm:$0xff]  ;;  %v415_v6 = vld [vmem:[%s5679_s4 + $0x138] sm:$0xff]  ;;  %v35_v28 = vld [vmem:[%s5678_s0 + $0x28] sm:$0xff] }
  0x20   :  { %3372 = vmatprep.subr.bf16.mxu1 %v3371_v14  ;;  %v4752_v7 = vpack.c.bf16 %v406_v4, %v402_v2  ;;  %v410_v10 = vld [vmem:[%s5679_s4 + $0x110] sm:$0xff]  ;;  %v419_v15 = vld [vmem:[%s5679_s4 + $0x158] sm:$0xff]  ;;  %v429_v31 = vld [vmem:[%s5679_s4 + $0x1a8] sm:$0xff] }
  0x21   :  { %3346 = vmatpush1.bf16.msra.mxu0 %v3345_v5  ;;  %v411_v5 = vld [vmem:[%s5679_s4 + $0x118] sm:$0xff]  ;;  %v414_v11 = vld [vmem:[%s5679_s4 + $0x130] sm:$0xff]  ;;  %v428_v41 = vld [vmem:[%s5679_s4 + $0x1a0] sm:$0xff] }
  0x22   :  { %3380 = vmatprep.subr.bf16.mxu0 %v4570_v9  ;;  %v4755_v8 = vpack.c.bf16 %v415_v6, %v411_v5  ;;  %v4764_v12 = vpack.c.bf16 %v414_v11, %v410_v10  ;;  %v423_v19 = vld [vmem:[%s5679_s4 + $0x178] sm:$0xff]  ;;  %v418_v24 = vld [vmem:[%s5679_s4 + $0x150] sm:$0xff]  ;;  %v433_v48 = vld [vmem:[%s5679_s4 + $0x1c8] sm:$0xff]  ;;  %v5685_v11 = vmov 0.0|0.0  }
  0x23   :  { %3374 = vmatpush3.bf16.msra.mxu1 %v3371_v14  ;;  %v421_v14 = vld [vmem:[%s5679_s4 + $0x168] sm:$0xff]  ;;  %v422_v27 = vld [vmem:[%s5679_s4 + $0x170] sm:$0xff]  ;;  %v427_v32 = vld [vmem:[%s5679_s4 + $0x198] sm:$0xff] }
  0x24   :  { %151 = vmatmul.mubr.f32.vlgmr.msra.gmra.mrb[0].mxu0 %v4477_v26  ;;  %v4619_v26 = vpack.c.bf16 %v397_v22, %v393_v21  ;;  %3376 = vmatprep.subr.bf16.mxu1 %v3375_v23  ;;  %v4777_v17 = vpack.c.bf16 %v421_v14, %v417_v13  ;;  %v420_v21 = vld [vmem:[%s5679_s4 + $0x160] sm:$0xff]  ;;  %v4788_v22 = vpack.c.bf16 %v423_v19, %v419_v15  ;;  %v431_v35 = vld [vmem:[%s5679_s4 + $0x1b8] sm:$0xff]  ;;  %v36_v36 = vld [vmem:[%s5678_s0 + $0x30] sm:$0xff] }
  0x25   :  { %3382 = vmatpush1.bf16.msra.mxu0 %v4587_v16  ;;  %156 = vmatprep.mubr.f32.mxu0 %v5683_v3  ;;  %v4802_v29 = vpack.c.bf16 %v422_v27, %v418_v24  ;;  %v4828_v39 = vpack.c.bf16 %v431_v35, %v427_v32  ;;  %v426_v42 = vld [vmem:[%s5679_s4 + $0x190] sm:$0xff]  ;;  %v437_v49 = vld [vmem:[%s5679_s4 + $0x1e8] sm:$0xff]  ;;  %v439_v54 = vld [vmem:[%s5679_s4 + $0x1f8] sm:$0xff] }
  0x26   :  { %3384 = vmatprep.subr.bf16.mxu0 %v4593_v18  ;;  %v430_v43 = vld [vmem:[%s5679_s4 + $0x1b0] sm:$0xff]  ;;  %v4854_v52 = vpack.c.bf16 %v437_v49, %v433_v48  ;;  %v37_v55 = vld [vmem:[%s5678_s0 + $0x38] sm:$0xff]  ;;  %v432_v58 = vld [vmem:[%s5679_s4 + $0x1c0] sm:$0xff] }
  0x27   :  { %3378 = vmatpush3.bf16.msra.mxu1 %v3375_v23  ;;  %v4790_v23 = vpack.c.bf16 %v420_v21, %v416_v20  ;;  %v4842_v46 = vpack.c.bf16 %v430_v43, %v426_v42  ;;  %v434_v62 = vld [vmem:[%s5679_s4 + $0x1d0] sm:$0xff]  ;;  %v329_v5 = vld [vmem:[%s5680_s3 + $0x8] sm:$0xff]  ;;  %v332_v6 = vld [vmem:[%s5680_s3 + $0x20] sm:$0xff] }
  0x28   :  { %157 = vmatmul.mubr.f32.gmra.mrb[2].mxu0 %v31_v30  ;;  %3412 = vmatprep.subr.bf16.mxu1 %v4639_v34  ;;  %5704 = vst [vmem:[#allocation5_spill] sm:$0xff] %v4854_v52  ;;  %v438_v63 = vld [vmem:[%s5679_s4 + $0x1f0] sm:$0xff]  ;;  %v4891_v10 = vpack.c.bf16 %v332_v6, %v329_v5  ;;  %v24_v13 = vld [vmem:[%s5681_s1] sm:$0xff]  ;;  %v331_v21 = vld [vmem:[%s5680_s3 + $0x18] sm:$0xff] }
  0x29   :  { %3386 = vmatpush1.bf16.msra.mxu0 %v4612_v25  ;;  %162 = vmatprep.mubr.f32.mxu0 %v5683_v3  ;;  %5703 = vst [vmem:[#allocation4_spill] sm:$0xff] %v4842_v46  ;;  %v4882_v4 = vpack.c.bf16 %v438_v63, %v434_v62  ;;  %v328_v20 = vld [vmem:[%s5680_s3] sm:$0xff]  ;;  %v330_v24 = vld [vmem:[%s5680_s3 + $0x10] sm:$0xff]  ;;  %v333_v27 = vld [vmem:[%s5680_s3 + $0x28] sm:$0xff] }
  0x2a   :  { %3388 = vmatprep.subr.bf16.mxu0 %v4619_v26  ;;  %3024 = vmatmul.mubr.f32.vlgmr.msra.gmra.mrb[0].mxu1 %v31_v30  ;;  %v425_v30 = vld [vmem:[%s5679_s4 + $0x188] sm:$0xff]  ;;  %5708 = vst [vmem:[#allocation9_spill] sm:$0xff] %v4891_v10  ;;  %v4924_v32 = vpack.c.bf16 %v333_v27, %v330_v24  ;;  %v334_v35 = vld [vmem:[%s5680_s3 + $0x30] sm:$0xff]  ;;  %v336_v42 = vld [vmem:[%s5680_s3 + $0x40] sm:$0xff] }
  0x2b   :  { %3414 = vmatpush1.bf16.msra.mxu1 %v4672_v45  ;;  %3026 = vmatprep.mubr.f32.mxu1 %v32_v37  ;;  %v4816_v33 = vpack.c.bf16 %v429_v31, %v425_v30  ;;  %5707 = vst [vmem:[#allocation8_spill] sm:$0xff] %v4882_v4  ;;  %v338_v30 = vld [vmem:[%s5680_s3 + $0x50] sm:$0xff]  ;;  %v4922_v31 = vpack.c.bf16 %v331_v21, %v328_v20  ;;  %v339_v43 = vld [vmem:[%s5680_s3 + $0x58] sm:$0xff]  ;;  %v345_v6 = vld [vmem:[%s5680_s3 + $0x88] sm:$0xff] }
  0x2c   :  { %163 = vmatmul.mubr.f32.gmra.mrb[4].mxu0 %v32_v37  ;;  %3416 = vmatprep.subr.bf16.mxu1 %v4678_v47  ;;  %v424_v37 = vld [vmem:[%s5679_s4 + $0x180] sm:$0xff]  ;;  %v343_v63 = vld [vmem:[%s5680_s3 + $0x78] sm:$0xff]  ;;  %v342_v5 = vld [vmem:[%s5680_s3 + $0x70] sm:$0xff] }
  0x2d   :  { %3390 = vmatpush1.bf16.msra.mxu0 %v4651_v38  ;;  %168 = vmatprep.mubr.f32.mxu0 %v5683_v3  ;;  %v4840_v44 = vpack.c.bf16 %v428_v41, %v424_v37  ;;  %v337_v41 = vld [vmem:[%s5680_s3 + $0x48] sm:$0xff]  ;;  %v4987_v21 = vpack.c.bf16 %v345_v6, %v342_v5  ;;  %v346_v24 = vld [vmem:[%s5680_s3 + $0x90] sm:$0xff] }
  0x2e   :  { %3392 = vmatprep.subr.bf16.mxu0 %v4658_v40  ;;  %3027 = vmatmul.mubr.f32.gmra.mrb[2].mxu1 %v33_v50  ;;  %v354_v5 = vld [vmem:[%s5680_s3 + $0xd0] sm:$0xff]  ;;  %v357_v6 = vld [vmem:[%s5680_s3 + $0xe8] sm:$0xff] }
  0x2f   :  { %3418 = vmatpush1.bf16.msra.mxu1 %v4706_v56  ;;  %3029 = vmatprep.mubr.f32.mxu1 %v34_v60 }
  0x30   :  { %169 = vmatmul.mubr.f32.gmra.mrb[6].mxu0 %v33_v50  ;;  %3420 = vmatprep.subr.bf16.mxu1 %v4709_v57  ;;  %v435_v50 = vld [vmem:[%s5679_s4 + $0x1d8] sm:$0xff] }
  0x31   :  { %3394 = vmatpush1.bf16.msra.mxu0 %v4690_v51  ;;  %174 = vmatprep.mubr.f32.mxu0 %v5683_v3  ;;  %v4867_v59 = vpack.c.bf16 %v439_v54, %v435_v50  ;;  %v341_v50 = vld [vmem:[%s5680_s3 + $0x68] sm:$0xff]  ;;  %v344_v54 = vld [vmem:[%s5680_s3 + $0x80] sm:$0xff] }
  0x32   :  { %3396 = vmatprep.subr.bf16.mxu0 %v4697_v53  ;;  %3030 = vmatmul.mubr.f32.gmra.mrb[4].mxu1 %v35_v28  ;;  %v4961_v62 = vpack.c.bf16 %v344_v54, %v341_v50  ;;  %v352_v54 = vld [vmem:[%s5680_s3 + $0xc0] sm:$0xff] }
  0x33   :  { %3422 = vmatpush1.bf16.msra.mxu1 %v4732_v0  ;;  %3032 = vmatprep.mubr.f32.mxu1 %v36_v36  ;;  %5705 = vst [vmem:[#allocation6_spill] sm:$0xff] %v4867_v59 }
  0x34   :  { %175 = vmatmul.mubr.f32.gmra.mrb[8].mxu0 %v34_v60  ;;  %3424 = vmatprep.subr.bf16.mxu1 %v4735_v1  ;;  %v436_v60 = vld [vmem:[%s5679_s4 + $0x1e0] sm:$0xff] }
  0x35   :  { %3398 = vmatpush1.bf16.msra.mxu0 %v4721_v61  ;;  %180 = vmatprep.mubr.f32.mxu0 %v5683_v3  ;;  %v4880_v2 = vpack.c.bf16 %v436_v60, %v432_v58  ;;  %v4954_v58 = vpack.c.bf16 %v339_v43, %v336_v42  ;;  %v340_v60 = vld [vmem:[%s5680_s3 + $0x60] sm:$0xff]  ;;  %v353_v42 = vld [vmem:[%s5680_s3 + $0xc8] sm:$0xff] }
  0x36   :  { %3400 = vmatprep.subr.bf16.mxu0 %v4777_v17  ;;  %3033 = vmatmul.mubr.f32.gmra.mrb[6].mxu1 %v37_v55  ;;  %v4985_v20 = vpack.c.bf16 %v343_v63, %v340_v60  ;;  %v356_v43 = vld [vmem:[%s5680_s3 + $0xe0] sm:$0xff]  ;;  %v355_v63 = vld [vmem:[%s5680_s3 + $0xd8] sm:$0xff] }
  0x37   :  { %3426 = vmatpush1.bf16.msra.mxu1 %v4752_v7  ;;  %5706 = vst [vmem:[#allocation7_spill] sm:$0xff] %v4880_v2  ;;  %588 = vmatprep.mubr.f32.mxu1 %v5683_v3  ;;  %v5024_v60 = vpack.c.bf16 %v356_v43, %v353_v42  ;;  %v361_v42 = vld [vmem:[%s5680_s3 + $0x108] sm:$0xff]  ;;  %v360_v43 = vld [vmem:[%s5680_s3 + $0x100] sm:$0xff] }
  0x38   :  { %3428 = vmatprep.subr.bf16.mxu1 %v4755_v8  ;;  %181 = vmatmul.mubr.f32.gmra.mrb[10].mxu0 %v35_v28  ;;  %v335_v28 = vld [vmem:[%s5680_s3 + $0x38] sm:$0xff] }
  0x39   :  { %3402 = vmatpush1.bf16.msra.mxu0 %v4790_v23  ;;  %186 = vmatprep.mubr.f32.mxu0 %v5683_v3  ;;  %v4931_v37 = vpack.c.bf16 %v338_v30, %v335_v28  ;;  %v349_v30 = vld [vmem:[%s5680_s3 + $0xa8] sm:$0xff] }
  0x3a   :  { %3404 = vmatprep.subr.bf16.mxu0 %v4816_v33 }
  0x3b   :  { %3430 = vmatpush1.bf16.msra.mxu1 %v4764_v12 }
  0x3c   :  { %3432 = vmatprep.subr.bf16.mxu1 %v4788_v22  ;;  %187 = vmatmul.mubr.f32.gmra.mrb[12].mxu0 %v36_v36 }
  0x3d   :  { %3406 = vmatpush1.bf16.msra.mxu0 %v4840_v44  ;;  %192 = vmatprep.mubr.f32.mxu0 %v5683_v3 }
  0x3e   :  { %3408 = vmatprep.subr.bf16.mxu0 %v4854_v52 }
  0x3f   :  { %3434 = vmatpush1.bf16.msra.mxu1 %v4802_v29 }
  0x40   :  { %3436 = vmatprep.subr.bf16.mxu1 %v4828_v39  ;;  %193 = vmatmul.mubr.f32.gmra.mrb[14].mxu0 %v37_v55  ;;  %v4952_v55 = vpack.c.bf16 %v337_v41, %v334_v35  ;;  %v348_v35 = vld [vmem:[%s5680_s3 + $0xa0] sm:$0xff]  ;;  %v351_v41 = vld [vmem:[%s5680_s3 + $0xb8] sm:$0xff] }
  0x41   :  { %3410 = vmatpush1.bf16.msra.mxu0 %v4880_v2  ;;  %517 = vmatprep.mubr.f32.mxu0 %v5683_v3  ;;  %v5017_v50 = vpack.c.bf16 %v351_v41, %v348_v35  ;;  %v358_v35 = vld [vmem:[%s5680_s3 + $0xf0] sm:$0xff] }
  0x42   :  { %3444 = vmatprep.subr.bf16.mxu0 %v4891_v10 }
  0x43   :  { %3438 = vmatpush1.bf16.msra.mxu1 %v4842_v46 }
  0x44   :  { %3440 = vmatprep.subr.bf16.mxu1 %v4867_v59 }
  0x47   :  { %3442 = vmatpush1.bf16.msra.mxu1 %v4882_v4 }
  0x48   :  { %3475 = vmatprep.subr.bf16.mxu1 %v5685_v11 }
  0xf7   :  { %v152_v14 = vpop.f32.mrb[0].mxu0 }
  0xf8   :  { %v449_v15 = vadd.f32 %v152_v14, %v24_v13  ;;  %v4902_v19 = vpop.f32.mrb[1].mxu0  ;;  %v347_v13 = vld [vmem:[%s5680_s3 + $0x98] sm:$0xff]  ;;  %v350_v14 = vld [vmem:[%s5680_s3 + $0xb0] sm:$0xff] }
  0xf9   :  { %v4996_v28 = vpack.c.bf16 %v350_v14, %v347_v13  ;;  %v359_v13 = vld [vmem:[%s5680_s3 + $0xf8] sm:$0xff]  ;;  %v362_v14 = vld [vmem:[%s5680_s3 + $0x110] sm:$0xff] }
  0xfa   :  { %4370 = vtanh.f32 %v449_v15  ;;  %v5052_v41 = vpack.c.bf16 %v362_v14, %v359_v13  ;;  %v364_v14 = vld [vmem:[%s5680_s3 + $0x120] sm:$0xff] }
  0xfc   :  { %5711 = vst [vmem:[#allocation12_spill] sm:$0xff] %v5052_v41 }
  0xfd   :  { %v4929_v36 = vpop.f32.mrb[0].mxu1 }
  0xfe   :  { %v4942_v48 = vpop.f32.mrb[1].mxu1 }
 0x101   :  { %v4981_v15 = vpop.f32.mrb[2].mxu1 }
 0x102   :  { %5709 = vst [vmem:[#allocation10_spill] sm:$0xff] %v4981_v15  ;;  %v4992_v27 = vpop.f32.mrb[3].mxu1  ;;  %v367_v15 = vld [vmem:[%s5680_s3 + $0x138] sm:$0xff] }
 0x103   :  { %5710 = vst [vmem:[#allocation11_spill] sm:$0xff] %v4992_v27  ;;  %v5713_v27 = vmov 0.0|0.0  }
 0x104   :  { %v4371_v49 = vpop.eup %4370 }
 0x105   :  { %518 = vmatmul.mubr.f32.vlgmr.msra.gmra.mrb[2].mxu0 %v4371_v49  ;;  %589 = vmatmul.mubr.f32.vlgmr.msra.gmra.mrb[8].mxu1 %v4371_v49  ;;  %v5015_v49 = vpack.c.bf16 %v349_v30, %v346_v24  ;;  %v5043_v24 = vpack.c.bf16 %v355_v63, %v352_v54  ;;  %v5045_v30 = vpack.c.bf16 %v357_v6, %v354_v5  ;;  %v363_v54 = vld [vmem:[%s5680_s3 + $0x118] sm:$0xff]  ;;  %v365_v63 = vld [vmem:[%s5680_s3 + $0x128] sm:$0xff]  ;;  %v368_v5 = vld [vmem:[%s5680_s3 + $0x140] sm:$0xff] }
 0x106   :  { %3446 = vmatpush1.bf16.msra.mxu0 %v4922_v31  ;;  %3477 = vmatpush3.bf16.msra.mxu1 %v4924_v32  ;;  %v5071_v6 = vpack.c.bf16 %v361_v42, %v358_v35  ;;  %v5073_v13 = vpack.c.bf16 %v363_v54, %v360_v43  ;;  %v366_v35 = vld [vmem:[%s5680_s3 + $0x130] sm:$0xff]  ;;  %v369_v42 = vld [vmem:[%s5680_s3 + $0x148] sm:$0xff]  ;;  %v371_v43 = vld [vmem:[%s5680_s3 + $0x158] sm:$0xff] }
 0x107   :  { %3448 = vmatprep.subr.bf16.mxu0 %v4931_v37  ;;  %3478 = vmatprep.subr.bf16.mxu1 %v5685_v11  ;;  %v374_v54 = vld [vmem:[%s5680_s3 + $0x170] sm:$0xff] }
 0x108   :  { %661 = vmatprep.mubr.f32.mxu0 %v5683_v3  ;;  %3067 = vmatprep.mubr.msk.f32.mxu1 %vm4388_vm0, %v5683_v3  ;;  %5712 = vst [vmem:[#allocation13_spill] sm:$0xff] %v5071_v6  ;;  %v5080_v3 = vpack.c.bf16 %v368_v5, %v365_v63  ;;  %v5099_v63 = vpack.c.bf16 %v367_v15, %v364_v14  ;;  %v372_v15 = vld [vmem:[%s5680_s3 + $0x160] sm:$0xff]  ;;  %v375_v14 = vld [vmem:[%s5680_s3 + $0x178] sm:$0xff] }
 0x109   :  { %v5101_v5 = vpack.c.bf16 %v369_v42, %v366_v35  ;;  %v26_v35 = vld [vmem:[%s5681_s1 + $0x10] sm:$0xff] }
 0x10a   :  { %3450 = vmatpush1.bf16.msra.mxu0 %v4952_v55  ;;  %3480 = vmatpush3.bf16.msra.mxu1 %v4954_v58 }
 0x10b   :  { %3452 = vmatprep.subr.bf16.mxu0 %v4961_v62  ;;  %3481 = vmatprep.subr.bf16.mxu1 %v5685_v11 }
 0x10e   :  { %3454 = vmatpush1.bf16.msra.mxu0 %v4985_v20  ;;  %3483 = vmatpush3.bf16.msra.mxu1 %v4987_v21 }
 0x10f   :  { %3456 = vmatprep.subr.bf16.mxu0 %v4996_v28  ;;  %3484 = vmatprep.subr.bf16.mxu1 %v5685_v11 }
 0x112   :  { %3458 = vmatpush1.bf16.msra.mxu0 %v5015_v49  ;;  %3486 = vmatpush3.bf16.msra.mxu1 %v5017_v50 }
 0x113   :  { %3460 = vmatprep.subr.bf16.mxu0 %v5024_v60  ;;  %3487 = vmatprep.subr.bf16.mxu1 %v5685_v11 }
 0x116   :  { %3462 = vmatpush1.bf16.msra.mxu0 %v5043_v24  ;;  %3489 = vmatpush3.bf16.msra.mxu1 %v5045_v30 }
 0x117   :  { %3464 = vmatprep.subr.bf16.mxu0 %v5052_v41  ;;  %3490 = vmatprep.subr.bf16.mxu1 %v5685_v11  ;;  %v370_v11 = vld [vmem:[%s5680_s3 + $0x150] sm:$0xff]  ;;  %v5108_v41 = vpack.c.bf16 %v374_v54, %v371_v43  ;;  %v5126_v43 = vpack.c.bf16 %v375_v14, %v372_v15  ;;  %v451_v54 = vadd.f32 %v4942_v48, %v26_v35  ;;  %v5169_v48 = vpop.f32.mrb[4].mxu1  ;;  %v25_v35 = vld [vmem:[%s5681_s1 + $0x8] sm:$0xff] }
 0x118   :  { %5715 = vst [vmem:[#allocation14_spill] sm:$0xff] %v5169_v48 }
 0x11a   :  { %3466 = vmatpush1.bf16.msra.mxu0 %v5071_v6  ;;  %3492 = vmatpush3.bf16.msra.mxu1 %v5073_v13  ;;  %v373_v6 = vld [vmem:[%s5680_s3 + $0x168] sm:$0xff] }
 0x11b   :  { %3468 = vmatprep.subr.bf16.mxu0 %v5080_v3  ;;  %3493 = vmatprep.subr.bf16.mxu1 %v5713_v27  ;;  %v5124_v42 = vpack.c.bf16 %v373_v6, %v370_v11  ;;  %v5714_v11 = vmov 0.0   ;;  %v5171_v6 = vpop.f32.mrb[5].mxu1 }
 0x11c   :  { %5716 = vst [vmem:[#allocation15_spill] sm:$0xff] %v5171_v6  ;;  %v5173_v15 = vpop.f32.mrb[6].mxu1 }
 0x11d   :  { %5717 = vst [vmem:[#allocation16_spill] sm:$0xff] %v5173_v15  ;;  %v5175_v14 = vpop.f32.mrb[7].mxu1 }
 0x11e   :  { %3470 = vmatpush1.bf16.msra.mxu0 %v5099_v63  ;;  %3495 = vmatpush3.bf16.msra.mxu1 %v5101_v5  ;;  %5718 = vst [vmem:[#allocation17_spill] sm:$0xff] %v5175_v14 }
 0x11f   :  { %3472 = vmatprep.subr.bf16.mxu0 %v5108_v41  ;;  %3496 = vmatprep.subr.bf16.mxu1 %v5713_v27 }
 0x122   :  { %3474 = vmatpush1.bf16.msra.mxu0 %v5124_v42  ;;  %3498 = vmatpush3.bf16.msra.mxu1 %v5126_v43 }
 0x123   :  { %3500 = vmatprep.subr.bf16.mxu0 %v4570_v9  ;;  %3532 = vmatprep.subr.bf16.mxu1 %v4639_v34 }
 0x125   :  { %662 = vmatmul.mubr.f32.vlgmr.msra.gmra.mrb[2].mxu0 %v451_v54  ;;  %3068 = vmatmul.mubr.f32.vlgmr.msra.gmra.mrb[10].mxu1 %v451_v54  ;;  %v450_v54 = vadd.f32 %v4902_v19, %v25_v35  ;;  %v5725_v19 = vld [vmem:[#allocation8_spill] sm:$0xff] }
 0x126   :  { %3502 = vmatpush1.bf16.msra.mxu0 %v4587_v16  ;;  %3534 = vmatpush1.bf16.msra.mxu1 %v4672_v45 }
 0x127   :  { %3504 = vmatprep.subr.bf16.mxu0 %v4593_v18  ;;  %3536 = vmatprep.subr.bf16.mxu1 %v4678_v47 }
 0x128   :  { %812 = vmatprep.mubr.f32.mxu0 %v5714_v11  ;;  %883 = vmatprep.mubr.f32.mxu1 %v5714_v11 }
 0x12a   :  { %3506 = vmatpush1.bf16.msra.mxu0 %v4612_v25  ;;  %3538 = vmatpush1.bf16.msra.mxu1 %v4706_v56 }
 0x12b   :  { %3508 = vmatprep.subr.bf16.mxu0 %v4619_v26  ;;  %3540 = vmatprep.subr.bf16.mxu1 %v4709_v57 }
 0x12e   :  { %3510 = vmatpush1.bf16.msra.mxu0 %v4651_v38  ;;  %3542 = vmatpush1.bf16.msra.mxu1 %v4732_v0 }
 0x12f   :  { %3512 = vmatprep.subr.bf16.mxu0 %v4658_v40  ;;  %3544 = vmatprep.subr.bf16.mxu1 %v4735_v1 }
 0x132   :  { %3514 = vmatpush1.bf16.msra.mxu0 %v4690_v51  ;;  %3546 = vmatpush1.bf16.msra.mxu1 %v4752_v7 }
 0x133   :  { %3516 = vmatprep.subr.bf16.mxu0 %v4697_v53  ;;  %3548 = vmatprep.subr.bf16.mxu1 %v4755_v8 }
 0x136   :  { %3518 = vmatpush1.bf16.msra.mxu0 %v4721_v61  ;;  %3550 = vmatpush1.bf16.msra.mxu1 %v4764_v12 }
 0x137   :  { %3520 = vmatprep.subr.bf16.mxu0 %v4777_v17  ;;  %3552 = vmatprep.subr.bf16.mxu1 %v4788_v22 }
 0x13a   :  { %3522 = vmatpush1.bf16.msra.mxu0 %v4790_v23  ;;  %3554 = vmatpush1.bf16.msra.mxu1 %v4802_v29 }
 0x13b   :  { %3524 = vmatprep.subr.bf16.mxu0 %v4816_v33  ;;  %3556 = vmatprep.subr.bf16.mxu1 %v4828_v39 }
 0x13e   :  { %3526 = vmatpush1.bf16.msra.mxu0 %v4840_v44  ;;  %3558 = vmatpush1.bf16.msra.mxu1 %v4842_v46 }
 0x13f   :  { %3528 = vmatprep.subr.bf16.mxu0 %v4854_v52  ;;  %3560 = vmatprep.subr.bf16.mxu1 %v4867_v59 }
 0x142   :  { %3530 = vmatpush1.bf16.msra.mxu0 %v4880_v2  ;;  %3562 = vmatpush1.bf16.msra.mxu1 %v4882_v4 }
 0x143   :  { %3564 = vmatprep.subr.bf16.mxu0 %v4891_v10  ;;  %3595 = vmatprep.subr.bf16.mxu1 %v5713_v27 }
 0x1d8   :  { %v590_v2 = vpop.f32.mrb[8].mxu1 }
 0x1d9   :  { %v592_v4 = vpop.f32.mrb[9].mxu1 }
 0x1da   :  { %v595_v59 = vadd.f32 %v592_v4, %v450_v54  ;;  %v5723_v4 = vld [vmem:[#allocation6_spill] sm:$0xff] }
 0x1dc   :  { %596 = vst [vmem:[%s5682_s5] sm:$0xff] %v595_v59  ;;  %v5720_v59 = vld [vmem:[#allocation13_spill] sm:$0xff] }
 0x1f8   :  { %v663_v48 = vpop.f32.mrb[2].mxu0  ;;  %v734_v10 = vpop.f32.mrb[10].mxu1 }
 0x1f9   :  { %4372 = vtanh.f32 %v663_v48  ;;  %v735_v6 = vadd.f32 %v734_v10, %v590_v2  ;;  %v5184_v15 = vpop.f32.mrb[3].mxu0  ;;  %v3069_v14 = vpop.f32.mrb[11].mxu1  ;;  %v5722_v2 = vld [vmem:[#allocation5_spill] sm:$0xff]  ;;  %v5724_v10 = vld [vmem:[#allocation7_spill] sm:$0xff] }
 0x1fb   :  { %v746_v52 = vadd.f32 %v4929_v36, %v735_v6  ;;  %v5726_v36 = vld [vmem:[#allocation9_spill] sm:$0xff] }
 0x203   :  { %v4373_v46 = vpop.eup %4372 }
 0x204   :  { %813 = vmatmul.mubr.f32.vlgmr.msra.gmra.mrb[4].mxu0 %v4373_v46  ;;  %884 = vmatmul.mubr.f32.vlgmr.msra.gmra.mrb[12].mxu1 %v4373_v46  ;;  %v5719_v46 = vld [vmem:[#allocation12_spill] sm:$0xff] }
 0x205   :  { %3566 = vmatpush1.bf16.msra.mxu0 %v4922_v31  ;;  %3597 = vmatpush3.bf16.msra.mxu1 %v4924_v32 }
 0x206   :  { %3568 = vmatprep.subr.bf16.mxu0 %v4931_v37  ;;  %3598 = vmatprep.subr.bf16.mxu1 %v5713_v27 }
 0x207   :  { %957 = vmatprep.mubr.f32.mxu0 %v5714_v11  ;;  %3102 = vmatprep.mubr.msk.f32.mxu1 %vm4388_vm0, %v5714_v11 }
 0x209   :  { %3570 = vmatpush1.bf16.msra.mxu0 %v4952_v55  ;;  %3600 = vmatpush3.bf16.msra.mxu1 %v4954_v58 }
 0x20a   :  { %3572 = vmatprep.subr.bf16.mxu0 %v4961_v62  ;;  %3601 = vmatprep.subr.bf16.mxu1 %v5713_v27 }
 0x20d   :  { %3574 = vmatpush1.bf16.msra.mxu0 %v4985_v20  ;;  %3603 = vmatpush3.bf16.msra.mxu1 %v4987_v21 }
 0x20e   :  { %3576 = vmatprep.subr.bf16.mxu0 %v4996_v28  ;;  %3604 = vmatprep.subr.bf16.mxu1 %v5713_v27 }
 0x211   :  { %3578 = vmatpush1.bf16.msra.mxu0 %v5015_v49  ;;  %3606 = vmatpush3.bf16.msra.mxu1 %v5017_v50 }
 0x212   :  { %3580 = vmatprep.subr.bf16.mxu0 %v5024_v60  ;;  %3607 = vmatprep.subr.bf16.mxu1 %v5713_v27 }
 0x215   :  { %3582 = vmatpush1.bf16.msra.mxu0 %v5043_v24  ;;  %3609 = vmatpush3.bf16.msra.mxu1 %v5045_v30 }
 0x216   :  { %3584 = vmatprep.subr.bf16.mxu0 %v5719_v46  ;;  %3610 = vmatprep.subr.bf16.mxu1 %v5713_v27 }
 0x219   :  { %3586 = vmatpush1.bf16.msra.mxu0 %v5720_v59  ;;  %3612 = vmatpush3.bf16.msra.mxu1 %v5073_v13 }
 0x21a   :  { %3588 = vmatprep.subr.bf16.mxu0 %v5080_v3  ;;  %3613 = vmatprep.subr.bf16.mxu1 %v5713_v27 }
 0x21d   :  { %3590 = vmatpush1.bf16.msra.mxu0 %v5099_v63  ;;  %3615 = vmatpush3.bf16.msra.mxu1 %v5101_v5 }
 0x21e   :  { %3592 = vmatprep.subr.bf16.mxu0 %v5108_v41  ;;  %3616 = vmatprep.subr.bf16.mxu1 %v5713_v27 }
 0x221   :  { %3594 = vmatpush1.bf16.msra.mxu0 %v5124_v42  ;;  %3618 = vmatpush3.bf16.msra.mxu1 %v5126_v43 }
 0x222   :  { %3620 = vmatprep.subr.bf16.mxu0 %v4570_v9  ;;  %3652 = vmatprep.subr.bf16.mxu1 %v4639_v34 }
 0x224   :  { %958 = vmatmul.mubr.f32.vlgmr.msra.gmra.mrb[4].mxu0 %v746_v52  ;;  %3103 = vmatmul.mubr.f32.vlgmr.msra.gmra.mrb[14].mxu1 %v746_v52  ;;  %v5721_v52 = vld [vmem:[#allocation4_spill] sm:$0xff] }
 0x225   :  { %3622 = vmatpush1.bf16.msra.mxu0 %v4587_v16  ;;  %3654 = vmatpush1.bf16.msra.mxu1 %v4672_v45 }
 0x226   :  { %3624 = vmatprep.subr.bf16.mxu0 %v4593_v18  ;;  %3656 = vmatprep.subr.bf16.mxu1 %v4678_v47 }
 0x227   :  { %1108 = vmatprep.mubr.f32.mxu0 %v5714_v11  ;;  %1179 = vmatprep.mubr.f32.mxu1 %v5714_v11 }
 0x229   :  { %3626 = vmatpush1.bf16.msra.mxu0 %v4612_v25  ;;  %3658 = vmatpush1.bf16.msra.mxu1 %v4706_v56 }
 0x22a   :  { %3628 = vmatprep.subr.bf16.mxu0 %v4619_v26  ;;  %3660 = vmatprep.subr.bf16.mxu1 %v4709_v57 }
 0x22d   :  { %3630 = vmatpush1.bf16.msra.mxu0 %v4651_v38  ;;  %3662 = vmatpush1.bf16.msra.mxu1 %v4732_v0 }
 0x22e   :  { %3632 = vmatprep.subr.bf16.mxu0 %v4658_v40  ;;  %3664 = vmatprep.subr.bf16.mxu1 %v4735_v1 }
 0x231   :  { %3634 = vmatpush1.bf16.msra.mxu0 %v4690_v51  ;;  %3666 = vmatpush1.bf16.msra.mxu1 %v4752_v7 }
 0x232   :  { %3636 = vmatprep.subr.bf16.mxu0 %v4697_v53  ;;  %3668 = vmatprep.subr.bf16.mxu1 %v4755_v8 }
 0x235   :  { %3638 = vmatpush1.bf16.msra.mxu0 %v4721_v61  ;;  %3670 = vmatpush1.bf16.msra.mxu1 %v4764_v12 }
 0x236   :  { %3640 = vmatprep.subr.bf16.mxu0 %v4777_v17  ;;  %3672 = vmatprep.subr.bf16.mxu1 %v4788_v22 }
 0x239   :  { %3642 = vmatpush1.bf16.msra.mxu0 %v4790_v23  ;;  %3674 = vmatpush1.bf16.msra.mxu1 %v4802_v29 }
 0x23a   :  { %3644 = vmatprep.subr.bf16.mxu0 %v4816_v33  ;;  %3676 = vmatprep.subr.bf16.mxu1 %v4828_v39 }
 0x23d   :  { %3646 = vmatpush1.bf16.msra.mxu0 %v4840_v44  ;;  %3678 = vmatpush1.bf16.msra.mxu1 %v5721_v52 }
 0x23e   :  { %3648 = vmatprep.subr.bf16.mxu0 %v5722_v2  ;;  %3680 = vmatprep.subr.bf16.mxu1 %v5723_v4 }
 0x241   :  { %3650 = vmatpush1.bf16.msra.mxu0 %v5724_v10  ;;  %3682 = vmatpush1.bf16.msra.mxu1 %v5725_v19  ;;  %v5727_v19 = vld [vmem:[#allocation11_spill] sm:$0xff] }
 0x242   :  { %3684 = vmatprep.subr.bf16.mxu0 %v5726_v36  ;;  %3715 = vmatprep.subr.bf16.mxu1 %v5713_v27 }
 0x2d7   :  { %v885_v48 = vpop.f32.mrb[12].mxu1 }
 0x2d8   :  { %v887_v6 = vpop.f32.mrb[13].mxu1 }
 0x2d9   :  { %v890_v14 = vadd.f32 %v887_v6, %v5184_v15  ;;  %v5728_v15 = vld [vmem:[#allocation4_spill] sm:$0xff] }
 0x2db   :  { %2824 = vst [vmem:[%s5682_s5 + $0x8] sm:$0xff] %v890_v14 }
 0x2f7   :  { %v959_v35 = vpop.f32.mrb[4].mxu0  ;;  %v1030_v54 = vpop.f32.mrb[14].mxu1 }
 0x2f8   :  { %4374 = vtanh.f32 %v959_v35  ;;  %v1031_v4 = vadd.f32 %v1030_v54, %v885_v48  ;;  %v5260_v2 = vpop.f32.mrb[5].mxu0  ;;  %v3104_v10 = vpop.f32.mrb[15].mxu1 }
 0x2f9   :  { %v5731_v10 = vld [vmem:[#allocation7_spill] sm:$0xff] }
 0x2fa   :  { %v1042_v52 = vadd.f32 %v1031_v4, %v5727_v19  ;;  %v5730_v4 = vld [vmem:[#allocation6_spill] sm:$0xff]  ;;  %v5732_v19 = vld [vmem:[#allocation8_spill] sm:$0xff] }
 0x302   :  { %v4375_v36 = vpop.eup %4374 }
 0x303   :  { %1109 = vmatmul.mubr.f32.vlgmr.msra.gmra.mrb[6].mxu0 %v4375_v36  ;;  %1180 = vmatmul.mubr.f32.vlgmr.msra.gmra.mrb[16].mxu1 %v4375_v36  ;;  %v5733_v36 = vld [vmem:[#allocation9_spill] sm:$0xff] }
 0x304   :  { %3686 = vmatpush1.bf16.msra.mxu0 %v4922_v31  ;;  %3717 = vmatpush3.bf16.msra.mxu1 %v4924_v32 }
 0x305   :  { %3688 = vmatprep.subr.bf16.mxu0 %v4931_v37  ;;  %3718 = vmatprep.subr.bf16.mxu1 %v5713_v27 }
 0x306   :  { %1253 = vmatprep.mubr.f32.mxu0 %v5714_v11  ;;  %3137 = vmatprep.mubr.msk.f32.mxu1 %vm4388_vm0, %v5714_v11 }
 0x308   :  { %3690 = vmatpush1.bf16.msra.mxu0 %v4952_v55  ;;  %3720 = vmatpush3.bf16.msra.mxu1 %v4954_v58 }
 0x309   :  { %3692 = vmatprep.subr.bf16.mxu0 %v4961_v62  ;;  %3721 = vmatprep.subr.bf16.mxu1 %v5713_v27 }
 0x30c   :  { %3694 = vmatpush1.bf16.msra.mxu0 %v4985_v20  ;;  %3723 = vmatpush3.bf16.msra.mxu1 %v4987_v21 }
 0x30d   :  { %3696 = vmatprep.subr.bf16.mxu0 %v4996_v28  ;;  %3724 = vmatprep.subr.bf16.mxu1 %v5713_v27 }
 0x310   :  { %3698 = vmatpush1.bf16.msra.mxu0 %v5015_v49  ;;  %3726 = vmatpush3.bf16.msra.mxu1 %v5017_v50 }
 0x311   :  { %3700 = vmatprep.subr.bf16.mxu0 %v5024_v60  ;;  %3727 = vmatprep.subr.bf16.mxu1 %v5713_v27 }
 0x314   :  { %3702 = vmatpush1.bf16.msra.mxu0 %v5043_v24  ;;  %3729 = vmatpush3.bf16.msra.mxu1 %v5045_v30 }
 0x315   :  { %3704 = vmatprep.subr.bf16.mxu0 %v5719_v46  ;;  %3730 = vmatprep.subr.bf16.mxu1 %v5713_v27 }
 0x318   :  { %3706 = vmatpush1.bf16.msra.mxu0 %v5720_v59  ;;  %3732 = vmatpush3.bf16.msra.mxu1 %v5073_v13 }
 0x319   :  { %3708 = vmatprep.subr.bf16.mxu0 %v5080_v3  ;;  %3733 = vmatprep.subr.bf16.mxu1 %v5713_v27 }
 0x31c   :  { %3710 = vmatpush1.bf16.msra.mxu0 %v5099_v63  ;;  %3735 = vmatpush3.bf16.msra.mxu1 %v5101_v5 }
 0x31d   :  { %3712 = vmatprep.subr.bf16.mxu0 %v5108_v41  ;;  %3736 = vmatprep.subr.bf16.mxu1 %v5713_v27 }
 0x320   :  { %3714 = vmatpush1.bf16.msra.mxu0 %v5124_v42  ;;  %3738 = vmatpush3.bf16.msra.mxu1 %v5126_v43 }
 0x321   :  { %3740 = vmatprep.subr.bf16.mxu0 %v4570_v9  ;;  %3772 = vmatprep.subr.bf16.mxu1 %v4639_v34 }
 0x323   :  { %1254 = vmatmul.mubr.f32.vlgmr.msra.gmra.mrb[6].mxu0 %v1042_v52  ;;  %3138 = vmatmul.mubr.f32.vlgmr.msra.gmra.mrb[18].mxu1 %v1042_v52  ;;  %v5729_v52 = vld [vmem:[#allocation5_spill] sm:$0xff] }
 0x324   :  { %3742 = vmatpush1.bf16.msra.mxu0 %v4587_v16  ;;  %3774 = vmatpush1.bf16.msra.mxu1 %v4672_v45 }
 0x325   :  { %3744 = vmatprep.subr.bf16.mxu0 %v4593_v18  ;;  %3776 = vmatprep.subr.bf16.mxu1 %v4678_v47 }
 0x326   :  { %1404 = vmatprep.mubr.f32.mxu0 %v5714_v11  ;;  %1475 = vmatprep.mubr.f32.mxu1 %v5714_v11 }
 0x328   :  { %3746 = vmatpush1.bf16.msra.mxu0 %v4612_v25  ;;  %3778 = vmatpush1.bf16.msra.mxu1 %v4706_v56 }
 0x329   :  { %3748 = vmatprep.subr.bf16.mxu0 %v4619_v26  ;;  %3780 = vmatprep.subr.bf16.mxu1 %v4709_v57 }
 0x32c   :  { %3750 = vmatpush1.bf16.msra.mxu0 %v4651_v38  ;;  %3782 = vmatpush1.bf16.msra.mxu1 %v4732_v0 }
 0x32d   :  { %3752 = vmatprep.subr.bf16.mxu0 %v4658_v40  ;;  %3784 = vmatprep.subr.bf16.mxu1 %v4735_v1 }
 0x330   :  { %3754 = vmatpush1.bf16.msra.mxu0 %v4690_v51  ;;  %3786 = vmatpush1.bf16.msra.mxu1 %v4752_v7 }
 0x331   :  { %3756 = vmatprep.subr.bf16.mxu0 %v4697_v53  ;;  %3788 = vmatprep.subr.bf16.mxu1 %v4755_v8 }
 0x334   :  { %3758 = vmatpush1.bf16.msra.mxu0 %v4721_v61  ;;  %3790 = vmatpush1.bf16.msra.mxu1 %v4764_v12 }
 0x335   :  { %3760 = vmatprep.subr.bf16.mxu0 %v4777_v17  ;;  %3792 = vmatprep.subr.bf16.mxu1 %v4788_v22 }
 0x338   :  { %3762 = vmatpush1.bf16.msra.mxu0 %v4790_v23  ;;  %3794 = vmatpush1.bf16.msra.mxu1 %v4802_v29 }
 0x339   :  { %3764 = vmatprep.subr.bf16.mxu0 %v4816_v33  ;;  %3796 = vmatprep.subr.bf16.mxu1 %v4828_v39 }
 0x33c   :  { %3766 = vmatpush1.bf16.msra.mxu0 %v4840_v44  ;;  %3798 = vmatpush1.bf16.msra.mxu1 %v5728_v15 }
 0x33d   :  { %3768 = vmatprep.subr.bf16.mxu0 %v5729_v52  ;;  %3800 = vmatprep.subr.bf16.mxu1 %v5730_v4 }
 0x340   :  { %3770 = vmatpush1.bf16.msra.mxu0 %v5731_v10  ;;  %3802 = vmatpush1.bf16.msra.mxu1 %v5732_v19  ;;  %v5734_v19 = vld [vmem:[#allocation10_spill] sm:$0xff] }
 0x341   :  { %3804 = vmatprep.subr.bf16.mxu0 %v5733_v36  ;;  %3835 = vmatprep.subr.bf16.mxu1 %v5713_v27 }
 0x3d6   :  { %v1181_v48 = vpop.f32.mrb[16].mxu1 }
 0x3d7   :  { %v1183_v6 = vpop.f32.mrb[17].mxu1 }
 0x3d8   :  { %v1186_v14 = vadd.f32 %v1183_v6, %v5260_v2  ;;  %v5735_v2 = vld [vmem:[#allocation4_spill] sm:$0xff] }
 0x3da   :  { %2825 = vst [vmem:[%s5682_s5 + $0x10] sm:$0xff] %v1186_v14 }
 0x3f6   :  { %v1255_v35 = vpop.f32.mrb[6].mxu0  ;;  %v1326_v54 = vpop.f32.mrb[18].mxu1 }
 0x3f7   :  { %4376 = vtanh.f32 %v1255_v35  ;;  %v1327_v4 = vadd.f32 %v1326_v54, %v1181_v48  ;;  %v5336_v52 = vpop.f32.mrb[7].mxu0  ;;  %v3139_v10 = vpop.f32.mrb[19].mxu1 }
 0x3f8   :  { %v5738_v10 = vld [vmem:[#allocation7_spill] sm:$0xff] }
 0x3f9   :  { %v1338_v15 = vadd.f32 %v5734_v19, %v1327_v4  ;;  %v5737_v4 = vld [vmem:[#allocation6_spill] sm:$0xff]  ;;  %v5739_v19 = vld [vmem:[#allocation8_spill] sm:$0xff] }
 0x401   :  { %v4377_v36 = vpop.eup %4376 }
 0x402   :  { %1405 = vmatmul.mubr.f32.vlgmr.msra.gmra.mrb[8].mxu0 %v4377_v36  ;;  %1476 = vmatmul.mubr.f32.vlgmr.msra.gmra.mrb[20].mxu1 %v4377_v36  ;;  %v5740_v36 = vld [vmem:[#allocation9_spill] sm:$0xff] }
 0x403   :  { %3806 = vmatpush1.bf16.msra.mxu0 %v4922_v31  ;;  %3837 = vmatpush3.bf16.msra.mxu1 %v4924_v32 }
 0x404   :  { %3808 = vmatprep.subr.bf16.mxu0 %v4931_v37  ;;  %3838 = vmatprep.subr.bf16.mxu1 %v5713_v27 }
 0x405   :  { %1549 = vmatprep.mubr.f32.mxu0 %v5714_v11  ;;  %3172 = vmatprep.mubr.msk.f32.mxu1 %vm4388_vm0, %v5714_v11 }
 0x407   :  { %3810 = vmatpush1.bf16.msra.mxu0 %v4952_v55  ;;  %3840 = vmatpush3.bf16.msra.mxu1 %v4954_v58 }
 0x408   :  { %3812 = vmatprep.subr.bf16.mxu0 %v4961_v62  ;;  %3841 = vmatprep.subr.bf16.mxu1 %v5713_v27 }
 0x40b   :  { %3814 = vmatpush1.bf16.msra.mxu0 %v4985_v20  ;;  %3843 = vmatpush3.bf16.msra.mxu1 %v4987_v21 }
 0x40c   :  { %3816 = vmatprep.subr.bf16.mxu0 %v4996_v28  ;;  %3844 = vmatprep.subr.bf16.mxu1 %v5713_v27 }
 0x40f   :  { %3818 = vmatpush1.bf16.msra.mxu0 %v5015_v49  ;;  %3846 = vmatpush3.bf16.msra.mxu1 %v5017_v50 }
 0x410   :  { %3820 = vmatprep.subr.bf16.mxu0 %v5024_v60  ;;  %3847 = vmatprep.subr.bf16.mxu1 %v5713_v27 }
 0x413   :  { %3822 = vmatpush1.bf16.msra.mxu0 %v5043_v24  ;;  %3849 = vmatpush3.bf16.msra.mxu1 %v5045_v30 }
 0x414   :  { %3824 = vmatprep.subr.bf16.mxu0 %v5719_v46  ;;  %3850 = vmatprep.subr.bf16.mxu1 %v5713_v27 }
 0x417   :  { %3826 = vmatpush1.bf16.msra.mxu0 %v5720_v59  ;;  %3852 = vmatpush3.bf16.msra.mxu1 %v5073_v13 }
 0x418   :  { %3828 = vmatprep.subr.bf16.mxu0 %v5080_v3  ;;  %3853 = vmatprep.subr.bf16.mxu1 %v5713_v27 }
 0x41b   :  { %3830 = vmatpush1.bf16.msra.mxu0 %v5099_v63  ;;  %3855 = vmatpush3.bf16.msra.mxu1 %v5101_v5 }
 0x41c   :  { %3832 = vmatprep.subr.bf16.mxu0 %v5108_v41  ;;  %3856 = vmatprep.subr.bf16.mxu1 %v5713_v27 }
 0x41f   :  { %3834 = vmatpush1.bf16.msra.mxu0 %v5124_v42  ;;  %3858 = vmatpush3.bf16.msra.mxu1 %v5126_v43 }
 0x420   :  { %3860 = vmatprep.subr.bf16.mxu0 %v4570_v9  ;;  %3892 = vmatprep.subr.bf16.mxu1 %v4639_v34 }
 0x422   :  { %1550 = vmatmul.mubr.f32.vlgmr.msra.gmra.mrb[8].mxu0 %v1338_v15  ;;  %3173 = vmatmul.mubr.f32.vlgmr.msra.gmra.mrb[22].mxu1 %v1338_v15  ;;  %v5736_v15 = vld [vmem:[#allocation5_spill] sm:$0xff] }
 0x423   :  { %3862 = vmatpush1.bf16.msra.mxu0 %v4587_v16  ;;  %3894 = vmatpush1.bf16.msra.mxu1 %v4672_v45 }
 0x424   :  { %3864 = vmatprep.subr.bf16.mxu0 %v4593_v18  ;;  %3896 = vmatprep.subr.bf16.mxu1 %v4678_v47 }
 0x425   :  { %1700 = vmatprep.mubr.f32.mxu0 %v5714_v11  ;;  %1771 = vmatprep.mubr.f32.mxu1 %v5714_v11 }
 0x427   :  { %3866 = vmatpush1.bf16.msra.mxu0 %v4612_v25  ;;  %3898 = vmatpush1.bf16.msra.mxu1 %v4706_v56 }
 0x428   :  { %3868 = vmatprep.subr.bf16.mxu0 %v4619_v26  ;;  %3900 = vmatprep.subr.bf16.mxu1 %v4709_v57 }
 0x42b   :  { %3870 = vmatpush1.bf16.msra.mxu0 %v4651_v38  ;;  %3902 = vmatpush1.bf16.msra.mxu1 %v4732_v0 }
 0x42c   :  { %3872 = vmatprep.subr.bf16.mxu0 %v4658_v40  ;;  %3904 = vmatprep.subr.bf16.mxu1 %v4735_v1 }
 0x42f   :  { %3874 = vmatpush1.bf16.msra.mxu0 %v4690_v51  ;;  %3906 = vmatpush1.bf16.msra.mxu1 %v4752_v7 }
 0x430   :  { %3876 = vmatprep.subr.bf16.mxu0 %v4697_v53  ;;  %3908 = vmatprep.subr.bf16.mxu1 %v4755_v8 }
 0x433   :  { %3878 = vmatpush1.bf16.msra.mxu0 %v4721_v61  ;;  %3910 = vmatpush1.bf16.msra.mxu1 %v4764_v12 }
 0x434   :  { %3880 = vmatprep.subr.bf16.mxu0 %v4777_v17  ;;  %3912 = vmatprep.subr.bf16.mxu1 %v4788_v22 }
 0x437   :  { %3882 = vmatpush1.bf16.msra.mxu0 %v4790_v23  ;;  %3914 = vmatpush1.bf16.msra.mxu1 %v4802_v29 }
 0x438   :  { %3884 = vmatprep.subr.bf16.mxu0 %v4816_v33  ;;  %3916 = vmatprep.subr.bf16.mxu1 %v4828_v39 }
 0x43b   :  { %3886 = vmatpush1.bf16.msra.mxu0 %v4840_v44  ;;  %3918 = vmatpush1.bf16.msra.mxu1 %v5735_v2 }
 0x43c   :  { %3888 = vmatprep.subr.bf16.mxu0 %v5736_v15  ;;  %3920 = vmatprep.subr.bf16.mxu1 %v5737_v4 }
 0x43f   :  { %3890 = vmatpush1.bf16.msra.mxu0 %v5738_v10  ;;  %3922 = vmatpush1.bf16.msra.mxu1 %v5739_v19  ;;  %v5741_v19 = vld [vmem:[#allocation15_spill] sm:$0xff] }
 0x440   :  { %3924 = vmatprep.subr.bf16.mxu0 %v5740_v36  ;;  %3955 = vmatprep.subr.bf16.mxu1 %v5713_v27 }
 0x4d5   :  { %v1477_v48 = vpop.f32.mrb[20].mxu1 }
 0x4d6   :  { %v1479_v6 = vpop.f32.mrb[21].mxu1 }
 0x4d7   :  { %v1482_v14 = vadd.f32 %v1479_v6, %v5336_v52  ;;  %v5742_v52 = vld [vmem:[#allocation4_spill] sm:$0xff] }
 0x4d9   :  { %2826 = vst [vmem:[%s5682_s5 + $0x18] sm:$0xff] %v1482_v14 }
 0x4f5   :  { %v1551_v35 = vpop.f32.mrb[8].mxu0  ;;  %v1622_v54 = vpop.f32.mrb[22].mxu1 }
 0x4f6   :  { %4378 = vtanh.f32 %v1551_v35  ;;  %v1623_v4 = vadd.f32 %v1622_v54, %v1477_v48  ;;  %v5412_v15 = vpop.f32.mrb[9].mxu0  ;;  %v3174_v10 = vpop.f32.mrb[23].mxu1 }
 0x4f7   :  { %v5745_v10 = vld [vmem:[#allocation7_spill] sm:$0xff] }
 0x4f8   :  { %v1634_v2 = vadd.f32 %v1623_v4, %v5741_v19  ;;  %v5744_v4 = vld [vmem:[#allocation6_spill] sm:$0xff]  ;;  %v5746_v19 = vld [vmem:[#allocation8_spill] sm:$0xff] }
 0x500   :  { %v4379_v36 = vpop.eup %4378 }
 0x501   :  { %1701 = vmatmul.mubr.f32.vlgmr.msra.gmra.mrb[10].mxu0 %v4379_v36  ;;  %1772 = vmatmul.mubr.f32.vlgmr.msra.gmra.mrb[24].mxu1 %v4379_v36  ;;  %v5747_v36 = vld [vmem:[#allocation9_spill] sm:$0xff] }
 0x502   :  { %3926 = vmatpush1.bf16.msra.mxu0 %v4922_v31  ;;  %3957 = vmatpush3.bf16.msra.mxu1 %v4924_v32 }
 0x503   :  { %3928 = vmatprep.subr.bf16.mxu0 %v4931_v37  ;;  %3958 = vmatprep.subr.bf16.mxu1 %v5713_v27 }
 0x504   :  { %1845 = vmatprep.mubr.f32.mxu0 %v5714_v11  ;;  %3207 = vmatprep.mubr.msk.f32.mxu1 %vm4388_vm0, %v5714_v11 }
 0x506   :  { %3930 = vmatpush1.bf16.msra.mxu0 %v4952_v55  ;;  %3960 = vmatpush3.bf16.msra.mxu1 %v4954_v58 }
 0x507   :  { %3932 = vmatprep.subr.bf16.mxu0 %v4961_v62  ;;  %3961 = vmatprep.subr.bf16.mxu1 %v5713_v27 }
 0x50a   :  { %3934 = vmatpush1.bf16.msra.mxu0 %v4985_v20  ;;  %3963 = vmatpush3.bf16.msra.mxu1 %v4987_v21 }
 0x50b   :  { %3936 = vmatprep.subr.bf16.mxu0 %v4996_v28  ;;  %3964 = vmatprep.subr.bf16.mxu1 %v5713_v27 }
 0x50e   :  { %3938 = vmatpush1.bf16.msra.mxu0 %v5015_v49  ;;  %3966 = vmatpush3.bf16.msra.mxu1 %v5017_v50 }
 0x50f   :  { %3940 = vmatprep.subr.bf16.mxu0 %v5024_v60  ;;  %3967 = vmatprep.subr.bf16.mxu1 %v5713_v27 }
 0x512   :  { %3942 = vmatpush1.bf16.msra.mxu0 %v5043_v24  ;;  %3969 = vmatpush3.bf16.msra.mxu1 %v5045_v30 }
 0x513   :  { %3944 = vmatprep.subr.bf16.mxu0 %v5719_v46  ;;  %3970 = vmatprep.subr.bf16.mxu1 %v5713_v27 }
 0x516   :  { %3946 = vmatpush1.bf16.msra.mxu0 %v5720_v59  ;;  %3972 = vmatpush3.bf16.msra.mxu1 %v5073_v13 }
 0x517   :  { %3948 = vmatprep.subr.bf16.mxu0 %v5080_v3  ;;  %3973 = vmatprep.subr.bf16.mxu1 %v5713_v27 }
 0x51a   :  { %3950 = vmatpush1.bf16.msra.mxu0 %v5099_v63  ;;  %3975 = vmatpush3.bf16.msra.mxu1 %v5101_v5 }
 0x51b   :  { %3952 = vmatprep.subr.bf16.mxu0 %v5108_v41  ;;  %3976 = vmatprep.subr.bf16.mxu1 %v5713_v27 }
 0x51e   :  { %3954 = vmatpush1.bf16.msra.mxu0 %v5124_v42  ;;  %3978 = vmatpush3.bf16.msra.mxu1 %v5126_v43 }
 0x51f   :  { %3980 = vmatprep.subr.bf16.mxu0 %v4570_v9  ;;  %4012 = vmatprep.subr.bf16.mxu1 %v4639_v34 }
 0x521   :  { %1846 = vmatmul.mubr.f32.vlgmr.msra.gmra.mrb[10].mxu0 %v1634_v2  ;;  %3208 = vmatmul.mubr.f32.vlgmr.msra.gmra.mrb[26].mxu1 %v1634_v2  ;;  %v5743_v2 = vld [vmem:[#allocation5_spill] sm:$0xff] }
 0x522   :  { %3982 = vmatpush1.bf16.msra.mxu0 %v4587_v16  ;;  %4014 = vmatpush1.bf16.msra.mxu1 %v4672_v45 }
 0x523   :  { %3984 = vmatprep.subr.bf16.mxu0 %v4593_v18  ;;  %4016 = vmatprep.subr.bf16.mxu1 %v4678_v47 }
 0x524   :  { %1996 = vmatprep.mubr.f32.mxu0 %v5714_v11  ;;  %2067 = vmatprep.mubr.f32.mxu1 %v5714_v11 }
 0x526   :  { %3986 = vmatpush1.bf16.msra.mxu0 %v4612_v25  ;;  %4018 = vmatpush1.bf16.msra.mxu1 %v4706_v56 }
 0x527   :  { %3988 = vmatprep.subr.bf16.mxu0 %v4619_v26  ;;  %4020 = vmatprep.subr.bf16.mxu1 %v4709_v57 }
 0x52a   :  { %3990 = vmatpush1.bf16.msra.mxu0 %v4651_v38  ;;  %4022 = vmatpush1.bf16.msra.mxu1 %v4732_v0 }
 0x52b   :  { %3992 = vmatprep.subr.bf16.mxu0 %v4658_v40  ;;  %4024 = vmatprep.subr.bf16.mxu1 %v4735_v1 }
 0x52e   :  { %3994 = vmatpush1.bf16.msra.mxu0 %v4690_v51  ;;  %4026 = vmatpush1.bf16.msra.mxu1 %v4752_v7 }
 0x52f   :  { %3996 = vmatprep.subr.bf16.mxu0 %v4697_v53  ;;  %4028 = vmatprep.subr.bf16.mxu1 %v4755_v8 }
 0x532   :  { %3998 = vmatpush1.bf16.msra.mxu0 %v4721_v61  ;;  %4030 = vmatpush1.bf16.msra.mxu1 %v4764_v12 }
 0x533   :  { %4000 = vmatprep.subr.bf16.mxu0 %v4777_v17  ;;  %4032 = vmatprep.subr.bf16.mxu1 %v4788_v22 }
 0x536   :  { %4002 = vmatpush1.bf16.msra.mxu0 %v4790_v23  ;;  %4034 = vmatpush1.bf16.msra.mxu1 %v4802_v29 }
 0x537   :  { %4004 = vmatprep.subr.bf16.mxu0 %v4816_v33  ;;  %4036 = vmatprep.subr.bf16.mxu1 %v4828_v39 }
 0x53a   :  { %4006 = vmatpush1.bf16.msra.mxu0 %v4840_v44  ;;  %4038 = vmatpush1.bf16.msra.mxu1 %v5742_v52 }
 0x53b   :  { %4008 = vmatprep.subr.bf16.mxu0 %v5743_v2  ;;  %4040 = vmatprep.subr.bf16.mxu1 %v5744_v4 }
 0x53e   :  { %4010 = vmatpush1.bf16.msra.mxu0 %v5745_v10  ;;  %4042 = vmatpush1.bf16.msra.mxu1 %v5746_v19  ;;  %v5748_v19 = vld [vmem:[#allocation14_spill] sm:$0xff] }
 0x53f   :  { %4044 = vmatprep.subr.bf16.mxu0 %v5747_v36  ;;  %4075 = vmatprep.subr.bf16.mxu1 %v5713_v27 }
 0x5d4   :  { %v1773_v48 = vpop.f32.mrb[24].mxu1 }
 0x5d5   :  { %v1775_v6 = vpop.f32.mrb[25].mxu1 }
 0x5d6   :  { %v1778_v14 = vadd.f32 %v1775_v6, %v5412_v15  ;;  %v5749_v15 = vld [vmem:[#allocation4_spill] sm:$0xff] }
 0x5d8   :  { %2827 = vst [vmem:[%s5682_s5 + $0x20] sm:$0xff] %v1778_v14 }
 0x5f4   :  { %v1847_v35 = vpop.f32.mrb[10].mxu0  ;;  %v1918_v54 = vpop.f32.mrb[26].mxu1 }
 0x5f5   :  { %4380 = vtanh.f32 %v1847_v35  ;;  %v1919_v4 = vadd.f32 %v1918_v54, %v1773_v48  ;;  %v5488_v2 = vpop.f32.mrb[11].mxu0  ;;  %v3209_v10 = vpop.f32.mrb[27].mxu1 }
 0x5f6   :  { %v5752_v10 = vld [vmem:[#allocation7_spill] sm:$0xff] }
 0x5f7   :  { %v1930_v52 = vadd.f32 %v5748_v19, %v1919_v4  ;;  %v5751_v4 = vld [vmem:[#allocation6_spill] sm:$0xff]  ;;  %v5753_v19 = vld [vmem:[#allocation8_spill] sm:$0xff] }
 0x5ff   :  { %v4381_v36 = vpop.eup %4380 }
 0x600   :  { %1997 = vmatmul.mubr.f32.vlgmr.msra.gmra.mrb[12].mxu0 %v4381_v36  ;;  %2068 = vmatmul.mubr.f32.vlgmr.msra.gmra.mrb[28].mxu1 %v4381_v36  ;;  %v5754_v36 = vld [vmem:[#allocation9_spill] sm:$0xff] }
 0x601   :  { %4046 = vmatpush1.bf16.msra.mxu0 %v4922_v31  ;;  %4077 = vmatpush3.bf16.msra.mxu1 %v4924_v32 }
 0x602   :  { %4048 = vmatprep.subr.bf16.mxu0 %v4931_v37  ;;  %4078 = vmatprep.subr.bf16.mxu1 %v5713_v27 }
 0x603   :  { %2141 = vmatprep.mubr.f32.mxu0 %v5714_v11  ;;  %3242 = vmatprep.mubr.msk.f32.mxu1 %vm4388_vm0, %v5714_v11 }
 0x605   :  { %4050 = vmatpush1.bf16.msra.mxu0 %v4952_v55  ;;  %4080 = vmatpush3.bf16.msra.mxu1 %v4954_v58 }
 0x606   :  { %4052 = vmatprep.subr.bf16.mxu0 %v4961_v62  ;;  %4081 = vmatprep.subr.bf16.mxu1 %v5713_v27 }
 0x609   :  { %4054 = vmatpush1.bf16.msra.mxu0 %v4985_v20  ;;  %4083 = vmatpush3.bf16.msra.mxu1 %v4987_v21 }
 0x60a   :  { %4056 = vmatprep.subr.bf16.mxu0 %v4996_v28  ;;  %4084 = vmatprep.subr.bf16.mxu1 %v5713_v27 }
 0x60d   :  { %4058 = vmatpush1.bf16.msra.mxu0 %v5015_v49  ;;  %4086 = vmatpush3.bf16.msra.mxu1 %v5017_v50 }
 0x60e   :  { %4060 = vmatprep.subr.bf16.mxu0 %v5024_v60  ;;  %4087 = vmatprep.subr.bf16.mxu1 %v5713_v27 }
 0x611   :  { %4062 = vmatpush1.bf16.msra.mxu0 %v5043_v24  ;;  %4089 = vmatpush3.bf16.msra.mxu1 %v5045_v30 }
 0x612   :  { %4064 = vmatprep.subr.bf16.mxu0 %v5719_v46  ;;  %4090 = vmatprep.subr.bf16.mxu1 %v5713_v27 }
 0x615   :  { %4066 = vmatpush1.bf16.msra.mxu0 %v5720_v59  ;;  %4092 = vmatpush3.bf16.msra.mxu1 %v5073_v13 }
 0x616   :  { %4068 = vmatprep.subr.bf16.mxu0 %v5080_v3  ;;  %4093 = vmatprep.subr.bf16.mxu1 %v5713_v27 }
 0x619   :  { %4070 = vmatpush1.bf16.msra.mxu0 %v5099_v63  ;;  %4095 = vmatpush3.bf16.msra.mxu1 %v5101_v5 }
 0x61a   :  { %4072 = vmatprep.subr.bf16.mxu0 %v5108_v41  ;;  %4096 = vmatprep.subr.bf16.mxu1 %v5713_v27 }
 0x61d   :  { %4074 = vmatpush1.bf16.msra.mxu0 %v5124_v42  ;;  %4098 = vmatpush3.bf16.msra.mxu1 %v5126_v43 }
 0x61e   :  { %4100 = vmatprep.subr.bf16.mxu0 %v4570_v9  ;;  %4132 = vmatprep.subr.bf16.mxu1 %v4639_v34 }
 0x620   :  { %2142 = vmatmul.mubr.f32.vlgmr.msra.gmra.mrb[12].mxu0 %v1930_v52  ;;  %3243 = vmatmul.mubr.f32.vlgmr.msra.gmra.mrb[30].mxu1 %v1930_v52  ;;  %v5750_v52 = vld [vmem:[#allocation5_spill] sm:$0xff] }
 0x621   :  { %4102 = vmatpush1.bf16.msra.mxu0 %v4587_v16  ;;  %4134 = vmatpush1.bf16.msra.mxu1 %v4672_v45 }
 0x622   :  { %4104 = vmatprep.subr.bf16.mxu0 %v4593_v18  ;;  %4136 = vmatprep.subr.bf16.mxu1 %v4678_v47 }
 0x623   :  { %2292 = vmatprep.mubr.f32.mxu0 %v5714_v11  ;;  %2363 = vmatprep.mubr.f32.mxu1 %v5714_v11 }
 0x625   :  { %4106 = vmatpush1.bf16.msra.mxu0 %v4612_v25  ;;  %4138 = vmatpush1.bf16.msra.mxu1 %v4706_v56 }
 0x626   :  { %4108 = vmatprep.subr.bf16.mxu0 %v4619_v26  ;;  %4140 = vmatprep.subr.bf16.mxu1 %v4709_v57 }
 0x629   :  { %4110 = vmatpush1.bf16.msra.mxu0 %v4651_v38  ;;  %4142 = vmatpush1.bf16.msra.mxu1 %v4732_v0 }
 0x62a   :  { %4112 = vmatprep.subr.bf16.mxu0 %v4658_v40  ;;  %4144 = vmatprep.subr.bf16.mxu1 %v4735_v1 }
 0x62d   :  { %4114 = vmatpush1.bf16.msra.mxu0 %v4690_v51  ;;  %4146 = vmatpush1.bf16.msra.mxu1 %v4752_v7 }
 0x62e   :  { %4116 = vmatprep.subr.bf16.mxu0 %v4697_v53  ;;  %4148 = vmatprep.subr.bf16.mxu1 %v4755_v8 }
 0x631   :  { %4118 = vmatpush1.bf16.msra.mxu0 %v4721_v61  ;;  %4150 = vmatpush1.bf16.msra.mxu1 %v4764_v12 }
 0x632   :  { %4120 = vmatprep.subr.bf16.mxu0 %v4777_v17  ;;  %4152 = vmatprep.subr.bf16.mxu1 %v4788_v22 }
 0x635   :  { %4122 = vmatpush1.bf16.msra.mxu0 %v4790_v23  ;;  %4154 = vmatpush1.bf16.msra.mxu1 %v4802_v29 }
 0x636   :  { %4124 = vmatprep.subr.bf16.mxu0 %v4816_v33  ;;  %4156 = vmatprep.subr.bf16.mxu1 %v4828_v39 }
 0x639   :  { %4126 = vmatpush1.bf16.msra.mxu0 %v4840_v44  ;;  %4158 = vmatpush1.bf16.msra.mxu1 %v5749_v15 }
 0x63a   :  { %4128 = vmatprep.subr.bf16.mxu0 %v5750_v52  ;;  %4160 = vmatprep.subr.bf16.mxu1 %v5751_v4 }
 0x63d   :  { %4130 = vmatpush1.bf16.msra.mxu0 %v5752_v10  ;;  %4162 = vmatpush1.bf16.msra.mxu1 %v5753_v19  ;;  %v5755_v19 = vld [vmem:[#allocation17_spill] sm:$0xff] }
 0x63e   :  { %4164 = vmatprep.subr.bf16.mxu0 %v5754_v36  ;;  %4195 = vmatprep.subr.bf16.mxu1 %v5713_v27 }
 0x6d3   :  { %v2069_v48 = vpop.f32.mrb[28].mxu1 }
 0x6d4   :  { %v2071_v6 = vpop.f32.mrb[29].mxu1 }
 0x6d5   :  { %v2074_v14 = vadd.f32 %v2071_v6, %v5488_v2 }
 0x6d7   :  { %2828 = vst [vmem:[%s5682_s5 + $0x28] sm:$0xff] %v2074_v14 }
 0x6f3   :  { %v2143_v35 = vpop.f32.mrb[12].mxu0  ;;  %v2214_v54 = vpop.f32.mrb[30].mxu1 }
 0x6f4   :  { %4382 = vtanh.f32 %v2143_v35  ;;  %v2215_v4 = vadd.f32 %v2214_v54, %v2069_v48  ;;  %v5564_v52 = vpop.f32.mrb[13].mxu0  ;;  %v3244_v10 = vpop.f32.mrb[31].mxu1 }
 0x6f6   :  { %v2226_v15 = vadd.f32 %v2215_v4, %v5755_v19 }
 0x6fe   :  { %v4383_v36 = vpop.eup %4382 }
 0x6ff   :  { %2293 = vmatmul.mubr.f32.vlgmr.msra.gmra.mrb[14].mxu0 %v4383_v36  ;;  %2364 = vmatmul.mubr.f32.vlgmr.msra.gmra.mrb[32].mxu1 %v4383_v36 }
 0x700   :  { %4166 = vmatpush1.bf16.msra.mxu0 %v4922_v31  ;;  %4197 = vmatpush3.bf16.msra.mxu1 %v4924_v32 }
 0x701   :  { %4168 = vmatprep.subr.bf16.mxu0 %v4931_v37  ;;  %4198 = vmatprep.subr.bf16.mxu1 %v5713_v27 }
 0x702   :  { %2437 = vmatprep.mubr.f32.mxu0 %v5714_v11  ;;  %3277 = vmatprep.mubr.msk.f32.mxu1 %vm4388_vm0, %v5714_v11 }
 0x704   :  { %4170 = vmatpush1.bf16.msra.mxu0 %v4952_v55  ;;  %4200 = vmatpush3.bf16.msra.mxu1 %v4954_v58 }
 0x705   :  { %4172 = vmatprep.subr.bf16.mxu0 %v4961_v62  ;;  %4201 = vmatprep.subr.bf16.mxu1 %v5713_v27 }
 0x708   :  { %4174 = vmatpush1.bf16.msra.mxu0 %v4985_v20  ;;  %4203 = vmatpush3.bf16.msra.mxu1 %v4987_v21 }
 0x709   :  { %4176 = vmatprep.subr.bf16.mxu0 %v4996_v28  ;;  %4204 = vmatprep.subr.bf16.mxu1 %v5713_v27 }
 0x70c   :  { %4178 = vmatpush1.bf16.msra.mxu0 %v5015_v49  ;;  %4206 = vmatpush3.bf16.msra.mxu1 %v5017_v50 }
 0x70d   :  { %4180 = vmatprep.subr.bf16.mxu0 %v5024_v60  ;;  %4207 = vmatprep.subr.bf16.mxu1 %v5713_v27 }
 0x710   :  { %4182 = vmatpush1.bf16.msra.mxu0 %v5043_v24  ;;  %4209 = vmatpush3.bf16.msra.mxu1 %v5045_v30 }
 0x711   :  { %4184 = vmatprep.subr.bf16.mxu0 %v5719_v46  ;;  %4210 = vmatprep.subr.bf16.mxu1 %v5713_v27 }
 0x714   :  { %4186 = vmatpush1.bf16.msra.mxu0 %v5720_v59  ;;  %4212 = vmatpush3.bf16.msra.mxu1 %v5073_v13 }
 0x715   :  { %4188 = vmatprep.subr.bf16.mxu0 %v5080_v3  ;;  %4213 = vmatprep.subr.bf16.mxu1 %v5713_v27 }
 0x718   :  { %4190 = vmatpush1.bf16.msra.mxu0 %v5099_v63  ;;  %4215 = vmatpush3.bf16.msra.mxu1 %v5101_v5 }
 0x719   :  { %4192 = vmatprep.subr.bf16.mxu0 %v5108_v41  ;;  %4216 = vmatprep.subr.bf16.mxu1 %v5713_v27 }
 0x71c   :  { %4194 = vmatpush1.bf16.msra.mxu0 %v5124_v42  ;;  %4218 = vmatpush3.bf16.msra.mxu1 %v5126_v43 }
 0x71d   :  { %4220 = vmatprep.subr.bf16.mxu0 %v4570_v9  ;;  %4252 = vmatprep.subr.bf16.mxu1 %v4639_v34  ;;  %v5756_v9 = vld [vmem:[#allocation4_spill] sm:$0xff]  ;;  %v5761_v34 = vld [vmem:[#allocation9_spill] sm:$0xff] }
 0x71f   :  { %2438 = vmatmul.mubr.f32.vlgmr.msra.gmra.mrb[14].mxu0 %v2226_v15  ;;  %3278 = vmatmul.mubr.f32.vlgmr.msra.gmra.mrb[34].mxu1 %v2226_v15 }
 0x720   :  { %4222 = vmatpush1.bf16.msra.mxu0 %v4587_v16  ;;  %4254 = vmatpush1.bf16.msra.mxu1 %v4672_v45  ;;  %v5757_v16 = vld [vmem:[#allocation5_spill] sm:$0xff] }
 0x721   :  { %4224 = vmatprep.subr.bf16.mxu0 %v4593_v18  ;;  %4256 = vmatprep.subr.bf16.mxu1 %v4678_v47  ;;  %v5758_v18 = vld [vmem:[#allocation6_spill] sm:$0xff] }
 0x722   :  { %2588 = vmatprep.mubr.f32.mxu0 %v5714_v11  ;;  %2659 = vmatprep.mubr.f32.mxu1 %v5714_v11 }
 0x724   :  { %4226 = vmatpush1.bf16.msra.mxu0 %v4612_v25  ;;  %4258 = vmatpush1.bf16.msra.mxu1 %v4706_v56  ;;  %v5759_v25 = vld [vmem:[#allocation7_spill] sm:$0xff] }
 0x725   :  { %4228 = vmatprep.subr.bf16.mxu0 %v4619_v26  ;;  %4260 = vmatprep.subr.bf16.mxu1 %v4709_v57  ;;  %v5760_v26 = vld [vmem:[#allocation8_spill] sm:$0xff] }
 0x728   :  { %4230 = vmatpush1.bf16.msra.mxu0 %v4651_v38  ;;  %4262 = vmatpush1.bf16.msra.mxu1 %v4732_v0 }
 0x729   :  { %4232 = vmatprep.subr.bf16.mxu0 %v4658_v40  ;;  %4264 = vmatprep.subr.bf16.mxu1 %v4735_v1 }
 0x72c   :  { %4234 = vmatpush1.bf16.msra.mxu0 %v4690_v51  ;;  %4266 = vmatpush1.bf16.msra.mxu1 %v4752_v7 }
 0x72d   :  { %4236 = vmatprep.subr.bf16.mxu0 %v4697_v53  ;;  %4268 = vmatprep.subr.bf16.mxu1 %v4755_v8 }
 0x730   :  { %4238 = vmatpush1.bf16.msra.mxu0 %v4721_v61  ;;  %4270 = vmatpush1.bf16.msra.mxu1 %v4764_v12  ;;  %v5762_v61 = vld [vmem:[#allocation16_spill] sm:$0xff] }
 0x731   :  { %4240 = vmatprep.subr.bf16.mxu0 %v4777_v17  ;;  %4272 = vmatprep.subr.bf16.mxu1 %v4788_v22 }
 0x734   :  { %4242 = vmatpush1.bf16.msra.mxu0 %v4790_v23  ;;  %4274 = vmatpush1.bf16.msra.mxu1 %v4802_v29 }
 0x735   :  { %4244 = vmatprep.subr.bf16.mxu0 %v4816_v33  ;;  %4276 = vmatprep.subr.bf16.mxu1 %v4828_v39 }
 0x738   :  { %4246 = vmatpush1.bf16.msra.mxu0 %v4840_v44  ;;  %4278 = vmatpush1.bf16.msra.mxu1 %v5756_v9 }
 0x739   :  { %4248 = vmatprep.subr.bf16.mxu0 %v5757_v16  ;;  %4280 = vmatprep.subr.bf16.mxu1 %v5758_v18 }
 0x73c   :  { %4250 = vmatpush1.bf16.msra.mxu0 %v5759_v25  ;;  %4282 = vmatpush1.bf16.msra.mxu1 %v5760_v26 }
 0x73d   :  { %4284 = vmatprep.subr.bf16.mxu0 %v5761_v34  ;;  %4315 = vmatprep.subr.bf16.mxu1 %v5713_v27 }
 0x7d2   :  { %v2365_v38 = vpop.f32.mrb[32].mxu1 }
 0x7d3   :  { %v2367_v40 = vpop.f32.mrb[33].mxu1 }
 0x7d4   :  { %v2370_v45 = vadd.f32 %v2367_v40, %v5564_v52 }
 0x7d6   :  { %2829 = vst [vmem:[%s5682_s5 + $0x30] sm:$0xff] %v2370_v45 }
 0x7f2   :  { %v2439_v47 = vpop.f32.mrb[14].mxu0  ;;  %v2510_v51 = vpop.f32.mrb[34].mxu1 }
 0x7f3   :  { %4384 = vtanh.f32 %v2439_v47  ;;  %v2511_v53 = vadd.f32 %v2510_v51, %v2365_v38  ;;  %v2441_v56 = vpop.f32.mrb[15].mxu0  ;;  %v3279_v57 = vpop.f32.mrb[35].mxu1 }
 0x7f5   :  { %v2522_v0 = vadd.f32 %v5762_v61, %v2511_v53 }
 0x7fd   :  { %v4385_v1 = vpop.eup %4384 }
 0x7fe   :  { %2589 = vmatmul.mubr.f32.vlgmr.msra.gmra.mrb[16].mxu0 %v4385_v1  ;;  %2660 = vmatmul.mubr.f32.vlgmr.msra.gmra.mrb[36].mxu1 %v4385_v1 }
 0x7ff   :  { %4286 = vmatpush1.bf16.msra.mxu0 %v4922_v31  ;;  %4317 = vmatpush3.bf16.msra.mxu1 %v4924_v32 }
 0x800   :  { %4288 = vmatprep.subr.bf16.mxu0 %v4931_v37  ;;  %4318 = vmatprep.subr.bf16.mxu1 %v5713_v27 }
 0x801   :  { %2733 = vmatprep.mubr.f32.mxu0 %v5714_v11  ;;  %3312 = vmatprep.mubr.msk.f32.mxu1 %vm4388_vm0, %v5714_v11 }
 0x803   :  { %4290 = vmatpush1.bf16.msra.mxu0 %v4952_v55  ;;  %4320 = vmatpush3.bf16.msra.mxu1 %v4954_v58 }
 0x804   :  { %4292 = vmatprep.subr.bf16.mxu0 %v4961_v62  ;;  %4321 = vmatprep.subr.bf16.mxu1 %v5713_v27 }
 0x807   :  { %4294 = vmatpush1.bf16.msra.mxu0 %v4985_v20  ;;  %4323 = vmatpush3.bf16.msra.mxu1 %v4987_v21 }
 0x808   :  { %4296 = vmatprep.subr.bf16.mxu0 %v4996_v28  ;;  %4324 = vmatprep.subr.bf16.mxu1 %v5713_v27 }
 0x80b   :  { %4298 = vmatpush1.bf16.msra.mxu0 %v5015_v49  ;;  %4326 = vmatpush3.bf16.msra.mxu1 %v5017_v50 }
 0x80c   :  { %4300 = vmatprep.subr.bf16.mxu0 %v5024_v60  ;;  %4327 = vmatprep.subr.bf16.mxu1 %v5713_v27 }
 0x80f   :  { %4302 = vmatpush1.bf16.msra.mxu0 %v5043_v24  ;;  %4329 = vmatpush3.bf16.msra.mxu1 %v5045_v30 }
 0x810   :  { %4304 = vmatprep.subr.bf16.mxu0 %v5719_v46  ;;  %4330 = vmatprep.subr.bf16.mxu1 %v5713_v27 }
 0x813   :  { %4306 = vmatpush1.bf16.msra.mxu0 %v5720_v59  ;;  %4332 = vmatpush3.bf16.msra.mxu1 %v5073_v13 }
 0x814   :  { %4308 = vmatprep.subr.bf16.mxu0 %v5080_v3  ;;  %4333 = vmatprep.subr.bf16.mxu1 %v5713_v27 }
 0x817   :  { %4310 = vmatpush1.bf16.msra.mxu0 %v5099_v63  ;;  %4335 = vmatpush3.bf16.msra.mxu1 %v5101_v5 }
 0x818   :  { %4312 = vmatprep.subr.bf16.mxu0 %v5108_v41  ;;  %4336 = vmatprep.subr.bf16.mxu1 %v5713_v27 }
 0x81b   :  { %4314 = vmatpush1.bf16.msra.mxu0 %v5124_v42  ;;  %4338 = vmatpush3.bf16.msra.mxu1 %v5126_v43 }
 0x81e   :  { %2734 = vmatmul.mubr.f32.vlgmr.msra.gmra.mrb[18].mxu0 %v2522_v0  ;;  %3313 = vmatmul.mubr.f32.vlgmr.msra.gmra.mrb[38].mxu1 %v2522_v0 }
 0x8d1   :  { %v2590_v7 = vpop.f32.mrb[16].mxu0  ;;  %v2661_v8 = vpop.f32.mrb[36].mxu1 }
 0x8d2   :  { %v2592_v12 = vpop.f32.mrb[17].mxu0  ;;  %v2663_v3 = vpop.f32.mrb[37].mxu1 }
 0x8d3   :  { %v2666_v17 = vadd.f32 %v2663_v3, %v2441_v56 }
 0x8d5   :  { %2830 = vst [vmem:[%s5682_s5 + $0x38] sm:$0xff] %v2666_v17 }
 0x8f1   :  { %v2735_v22 = vpop.f32.mrb[18].mxu0  ;;  %v2806_v23 = vpop.f32.mrb[38].mxu1 }
 0x8f2   :  { %v2737_v29 = vpop.f32.mrb[19].mxu0  ;;  %v3314_v33 = vpop.f32.mrb[39].mxu1 }

</bundles_post_ra>
